<compile_context>
chip_gen: v5e
topology: v5e:2x2
jax: 0.10.0
libtpu: 0.0.40
codegen_flags: <defaults>
</compile_context>

<pallas_src>
import jax
import jax.numpy as jnp
from jax.experimental import pallas as pl
from jax.experimental.pallas import tpu as pltpu


_BN_EPS = 1e-5


def _ru(x, m):
    return ((x + m - 1) // m) * m


# ----------------------------------------------------------------------------
# Pallas kernel: fused  out(Np, tm) = epilogue( W(Np, Kp) @ A(Kp, tm) )
#   epilogue = (+bias) -> act -> (*scale + shift)  [folded eval BN] -> (+skip)
# ----------------------------------------------------------------------------
def _make_gemm_kernel(act, has_skip):
    def kernel(*refs):
        if has_skip:
            w_ref, a_ref, p_ref, s_ref, o_ref = refs
        else:
            w_ref, a_ref, p_ref, o_ref = refs
            s_ref = None

        # single-tile contraction on the MXU, f32 accumulate
        y = jnp.dot(w_ref[...], a_ref[...], preferred_element_type=jnp.float32)

        prm = p_ref[...]                       # (Np, 3) f32: [bias, scale, shift]
        y = y + prm[:, 0:1]                    # per-output-channel bias (row bcast)
        if act == "leaky":
            y = jnp.where(y >= 0.0, y, 0.02 * y)
        else:                                  # "sigmoid"
            y = jax.nn.sigmoid(y)
        y = y * prm[:, 1:2] + prm[:, 2:3]      # folded eval-mode BatchNorm3d

        if s_ref is not None:                  # fused U-Net skip connection add
            y = y + s_ref[...].astype(jnp.float32)

        o_ref[...] = y.astype(o_ref.dtype)
    return kernel


def fused_gemm(w_mat, patches, params, act, skip=None, out_dtype=jnp.bfloat16):
    """w_mat: (Nout, K), patches: (K, M), params: (Nout, 3) [bias,scale,shift].

    Returns (Nout, M) = act(W @ patches + b) * scale + shift (+ skip)."""
    n_out, k_dim = w_mat.shape
    _, m_dim = patches.shape

    n_p = _ru(n_out, 16)                 # output channels -> sublanes (bf16 pack)
    k_p = _ru(k_dim, 128)                # contraction, single tile
    tm = min(512, _ru(m_dim, 128))       # big spatial dim -> lanes
    m_p = _ru(m_dim, tm)

    w_p = jnp.pad(w_mat.astype(jnp.bfloat16), ((0, n_p - n_out), (0, k_p - k_dim)))
    a_p = jnp.pad(patches.astype(jnp.bfloat16), ((0, k_p - k_dim), (0, m_p - m_dim)))
    p_p = jnp.pad(params.astype(jnp.float32), ((0, n_p - n_out), (0, 0)))

    in_specs = [
        pl.BlockSpec((n_p, k_p), lambda i: (0, 0)),   # weights: resident
        pl.BlockSpec((k_p, tm), lambda i: (0, i)),    # patches: stream M tiles
        pl.BlockSpec((n_p, 3), lambda i: (0, 0)),     # packed bias/scale/shift
    ]
    args = [w_p, a_p, p_p]
    has_skip = skip is not None
    if has_skip:
        s_p = jnp.pad(skip.astype(jnp.bfloat16),
                      ((0, n_p - n_out), (0, m_p - m_dim)))
        in_specs.append(pl.BlockSpec((n_p, tm), lambda i: (0, i)))
        args.append(s_p)

    out_bytes = n_p * m_p * (4 if out_dtype == jnp.float32 else 2)
    bytes_accessed = (n_p * k_p * 2 + k_p * m_p * 2 + n_p * 3 * 4 + out_bytes
                      + (n_p * m_p * 2 if has_skip else 0))
    cost = pl.CostEstimate(
        flops=2 * n_p * k_p * m_p,
        transcendentals=(n_p * m_p if act == "sigmoid" else 0),
        bytes_accessed=bytes_accessed)

    out = pl.pallas_call(
        _make_gemm_kernel(act, has_skip),
        out_shape=jax.ShapeDtypeStruct((n_p, m_p), out_dtype),
        grid_spec=pltpu.PrefetchScalarGridSpec(
            num_scalar_prefetch=0,
            grid=(m_p // tm,),
            in_specs=in_specs,
            out_specs=pl.BlockSpec((n_p, tm), lambda i: (0, i)),
        ),
        compiler_params=pltpu.CompilerParams(dimension_semantics=("parallel",)),
        cost_estimate=cost,
    )(*args)
    return out[:n_out, :m_dim]


# ----------------------------------------------------------------------------
# Conv3d / ConvTranspose3d lowering (channel-first activations)
# ----------------------------------------------------------------------------
def _patches_cf(x, k, stride, pad):
    """x: (C, N, D, H, W) -> (k^3*C, N*Do*Ho*Wo); K order = (kd, kh, kw, c)."""
    c, n, d, h, w = x.shape
    xp = jnp.pad(x, ((0, 0), (0, 0), (pad, pad), (pad, pad), (pad, pad)))
    do = (d + 2 * pad - k) // stride + 1
    ho = (h + 2 * pad - k) // stride + 1
    wo = (w + 2 * pad - k) // stride + 1
    slabs = []
    for kd in range(k):
        for kh in range(k):
            for kw in range(k):
                slabs.append(xp[:, :,
                                kd:kd + do * stride:stride,
                                kh:kh + ho * stride:stride,
                                kw:kw + wo * stride:stride])
    # TODO(synk): this materializes the k^3-amplified patch tensor in HBM.
    pat = jnp.stack(slabs, axis=0)           # (k^3, C, N, Do, Ho, Wo)
    return pat.reshape(k * k * k * c, n * do * ho * wo), (do, ho, wo)


def conv3d(x, w_mat, params, *, k, stride, pad, act,
           skip=None, out_dtype=jnp.bfloat16):
    c, n, d, h, w = x.shape
    pat, (do, ho, wo) = _patches_cf(x, k, stride, pad)
    skip_flat = None if skip is None else skip.reshape(skip.shape[0], -1)
    cout = w_mat.shape[0]
    y = fused_gemm(w_mat, pat, params, act, skip=skip_flat, out_dtype=out_dtype)
    return y.reshape(cout, n, do, ho, wo)


def conv_transpose3d_s2(x, w_mat_all, params, *, act, out_dtype=jnp.bfloat16):
    """ConvTranspose3d(k=4, s=2, p=1) via sub-pixel phase decomposition."""
    c, n, d, h, w = x.shape
    cout = w_mat_all.shape[0] // 8
    xp = jnp.pad(x, ((0, 0), (0, 0), (1, 1), (1, 1), (1, 1)))
    slabs = []
    for ud in range(2):
        for uh in range(2):
            for uw in range(2):
                slabs.append(xp[:, :, ud:ud + d + 1, uh:uh + h + 1, uw:uw + w + 1])
    pat = jnp.stack(slabs, axis=0).reshape(8 * c, n * (d + 1) * (h + 1) * (w + 1))
    y = fused_gemm(w_mat_all, pat, params, act, out_dtype=out_dtype)
    yr = y.reshape(2, 2, 2, cout, n, d + 1, h + 1, w + 1)   # (pd,ph,pw,co,n,·,·,·)
    parts = []
    for pd in range(2):
        for ph in range(2):
            for pw in range(2):
                parts.append(yr[pd, ph, pw, :, :, pd:pd + d, ph:ph + h, pw:pw + w])
    parts = jnp.stack(parts, axis=0).reshape(2, 2, 2, cout, n, d, h, w)
    out = jnp.transpose(parts, (3, 4, 5, 0, 6, 1, 7, 2))    # (co,n,d,pd,h,ph,w,pw)
    return out.reshape(cout, n, 2 * d, 2 * h, 2 * w)


# ----------------------------------------------------------------------------
# Weight conversions (PyTorch layouts -> GEMM matrices)
# ----------------------------------------------------------------------------
def _conv_w_to_mat(w):
    # Conv3d weight (Cout, Cin, kD, kH, kW) -> (Cout, k^3*Cin), cols = (tap, cin)
    cout, cin, kd, kh, kw = w.shape
    return jnp.transpose(w, (0, 2, 3, 4, 1)).reshape(cout, kd * kh * kw * cin)


def _convT_s1_w_to_mat(w):
    # ConvTranspose3d(k=3,s=1,p=1) weight (Cin, Cout, 3,3,3) == conv with flipped
    # kernel and swapped channel axes, padding k-1-p = 1.
    w_conv = jnp.transpose(jnp.flip(w, axis=(2, 3, 4)), (1, 0, 2, 3, 4))
    return _conv_w_to_mat(w_conv)


def _convT_s2_w_to_mat(w):
    # ConvTranspose3d(k=4,s=2,p=1) weight (Cin, Cout, 4,4,4) -> sub-pixel matrix
    # (8*Cout, 8*Cin): rows = (pd,ph,pw,co), cols = (ud,uh,uw,ci),
    # value = w[ci, co, 3-2ud-pd, 3-2uh-ph, 3-2uw-pw].
    cin, cout = w.shape[0], w.shape[1]
    idx = jnp.array([[3, 1], [2, 0]], dtype=jnp.int32)        # [phase, tap]
    wg = w[:, :,
           idx[:, :, None, None, None, None],
           idx[None, None, :, :, None, None],
           idx[None, None, None, None, :, :]]
    # wg axes: (ci, co, pd, ud, ph, uh, pw, uw)
    wg = jnp.transpose(wg, (2, 4, 6, 1, 3, 5, 7, 0))          # (pd,ph,pw,co,ud,uh,uw,ci)
    return wg.reshape(8 * cout, 8 * cin)


# ----------------------------------------------------------------------------
# Parameter init (deterministic, synthetic) — stores GEMM-ready bf16 matrices
# and packed f32 (bias, scale, shift) per conv.
# ----------------------------------------------------------------------------
def _pack(b, s, t):
    return jnp.stack([b, s, t], axis=1)        # (Cout, 3)


def _bn_fold(key_g, key_b, cout):
    gamma = 1.0 + 0.1 * jax.random.normal(key_g, (cout,), jnp.float32)
    beta = 0.1 * jax.random.normal(key_b, (cout,), jnp.float32)
    scale = gamma / jnp.sqrt(1.0 + _BN_EPS)    # running_var = 1
    shift = beta                               # running_mean = 0
    return scale, shift


def _init_down_block(key, cin, cout):
    ks = jax.random.split(key, 8)
    w1 = 0.05 * jax.random.normal(ks[0], (cout, cin, 4, 4, 4), jnp.float32)
    b1 = 0.01 * jax.random.normal(ks[1], (cout,), jnp.float32)
    w2 = 0.05 * jax.random.normal(ks[2], (cout, cout, 3, 3, 3), jnp.float32)
    b2 = 0.01 * jax.random.normal(ks[3], (cout,), jnp.float32)
    w3 = 0.05 * jax.random.normal(ks[4], (cout, cout, 3, 3, 3), jnp.float32)
    b3 = 0.01 * jax.random.normal(ks[5], (cout,), jnp.float32)
    scale, shift = _bn_fold(ks[6], ks[7], cout)
    ones = jnp.ones((cout,), jnp.float32)
    zeros = jnp.zeros((cout,), jnp.float32)
    return {
        "m1": _conv_w_to_mat(w1).astype(jnp.bfloat16), "p1": _pack(b1, ones, zeros),
        "m2": _conv_w_to_mat(w2).astype(jnp.bfloat16), "p2": _pack(b2, ones, zeros),
        "m3": _conv_w_to_mat(w3).astype(jnp.bfloat16), "p3": _pack(b3, scale, shift),
    }


def _init_up_block(key, cin, cout, last=False):
    ks = jax.random.split(key, 8)
    w1 = 0.05 * jax.random.normal(ks[0], (cin, cout, 4, 4, 4), jnp.float32)
    b1 = 0.01 * jax.random.normal(ks[1], (cout,), jnp.float32)
    w2 = 0.05 * jax.random.normal(ks[2], (cout, cout, 3, 3, 3), jnp.float32)
    b2 = 0.01 * jax.random.normal(ks[3], (cout,), jnp.float32)
    w3 = 0.05 * jax.random.normal(ks[4], (cout, cout, 3, 3, 3), jnp.float32)
    b3 = 0.01 * jax.random.normal(ks[5], (cout,), jnp.float32)
    ones = jnp.ones((cout,), jnp.float32)
    zeros = jnp.zeros((cout,), jnp.float32)
    p = {
        "m1": _convT_s2_w_to_mat(w1).astype(jnp.bfloat16),
        "p1": jnp.tile(_pack(b1, ones, zeros), (8, 1)),     # replicate over phases
        "m2": _convT_s1_w_to_mat(w2).astype(jnp.bfloat16),
        "p2": _pack(b2, ones, zeros),
        "m3": _convT_s1_w_to_mat(w3).astype(jnp.bfloat16),
    }
    if last:                                   # upsamplingLast: ... ConvT, Sigmoid
        p["p3"] = _pack(b3, ones, zeros)
    else:                                      # upsampling: ... ConvT, Leaky, BN
        scale, shift = _bn_fold(ks[6], ks[7], cout)
        p["p3"] = _pack(b3, scale, shift)
    return p


def init_nowcasting_params(key, n_filter):
    ks = jax.random.split(key, 8)
    nf = n_filter
    return {
        "e0": _init_down_block(ks[0], 1, nf),
        "e1": _init_down_block(ks[1], nf, nf * 2),
        "e2": _init_down_block(ks[2], nf * 2, nf * 3),
        "e3": _init_down_block(ks[3], nf * 3, nf * 4),
        "d3": _init_up_block(ks[4], nf * 4, nf * 3),
        "d2": _init_up_block(ks[5], nf * 3, nf * 2),
        "d1": _init_up_block(ks[6], nf * 2, nf),
        "d0": _init_up_block(ks[7], nf, 1, last=True),
    }


# ----------------------------------------------------------------------------
# Block forwards (Sequential order: Conv, LeakyReLU(0.02), Conv, Leaky, Conv,
# Leaky, BatchNorm3d, Dropout) — Dropout is identity in eval mode.
# ----------------------------------------------------------------------------
def _down_block(x, p):
    x = conv3d(x, p["m1"], p["p1"], k=4, stride=2, pad=1, act="leaky")
    x = conv3d(x, p["m2"], p["p2"], k=3, stride=1, pad=1, act="leaky")
    x = conv3d(x, p["m3"], p["p3"], k=3, stride=1, pad=1, act="leaky")
    return x


def _up_block(x, p, skip=None, last=False):
    x = conv_transpose3d_s2(x, p["m1"], p["p1"], act="leaky")
    x = conv3d(x, p["m2"], p["p2"], k=3, stride=1, pad=1, act="leaky")
    if last:
        return conv3d(x, p["m3"], p["p3"], k=3, stride=1, pad=1, act="sigmoid",
                      out_dtype=jnp.float32)
    # the skip tensor for the NEXT block's input is fused into this epilogue
    return conv3d(x, p["m3"], p["p3"], k=3, stride=1, pad=1, act="leaky", skip=skip)


def nowcasting_forward(params, x_ncdhw):
    # x: (N, 1, T, H, W)  ->  (1, N, T, H, W) channel-first bf16
    x = jnp.transpose(x_ncdhw, (1, 0, 2, 3, 4)).astype(jnp.bfloat16)
    e1 = _down_block(x, params["e0"])
    e2 = _down_block(e1, params["e1"])
    e3 = _down_block(e2, params["e2"])
    e4 = _down_block(e3, params["e3"])
    d3pe3 = _up_block(e4, params["d3"], skip=e3)     # == d3 + e3 (fused add)
    d2pe2 = _up_block(d3pe3, params["d2"], skip=e2)  # == d2 + e2
    d1pe1 = _up_block(d2pe2, params["d1"], skip=e1)  # == d1 + e1
    y = _up_block(d1pe1, params["d0"], last=True)    # (1, N, T, H, W) f32
    return jnp.transpose(y, (1, 0, 2, 3, 4))         # back to NCDHW


if __name__ == "__main__":
    key = jax.random.PRNGKey(0)
    k_param, k_x = jax.random.split(key)

    n_filter = 4
    # input: (batch=2, channels=1, T=16, H=16, W=16) — divisible by 2^4
    x = jax.random.uniform(k_x, (2, 1, 16, 16, 16), jnp.float32)

    params = init_nowcasting_params(k_param, n_filter)
    fwd = jax.jit(nowcasting_forward)
    y = fwd(params, x)
    y = jax.block_until_ready(y)

    assert y.shape == (2, 1, 16, 16, 16), y.shape
    assert bool(jnp.all(jnp.isfinite(y)))
    assert bool(jnp.all((y >= 0.0) & (y <= 1.0)))  # sigmoid output range
    print("KERNEL_OK")
</pallas_src>

<mosaic_0001>
module attributes {stable_mosaic.version = 11 : i64} {
  func.func @kernel(%arg0: i32, %arg1: memref<16x128xbf16, #tpu.memory_space<vmem>>, %arg2: memref<128x512xbf16, #tpu.memory_space<vmem>>, %arg3: memref<16x3xf32, #tpu.memory_space<vmem>>, %arg4: memref<16x512xbf16, #tpu.memory_space<vmem>>) attributes {dimension_semantics = [#tpu.dimension_semantics<parallel>], iteration_bounds = array<i64: 2>, scalar_prefetch = 0 : i64, scratch_operands = 0 : i64, tpu.core_type = #tpu.core_type<tc>, window_params = [{pipeline_mode = #tpu.pipeline_mode<synchronous>, transform_indices = @transform_0, window_bounds = array<i64: 16, 128>}, {transform_indices = @transform_1, window_bounds = array<i64: 128, 512>}, {pipeline_mode = #tpu.pipeline_mode<synchronous>, transform_indices = @transform_2, window_bounds = array<i64: 16, 3>}, {transform_indices = @transform_3, window_bounds = array<i64: 16, 512>}]} {
    %c0 = arith.constant 0 : index
    %c0_0 = arith.constant 0 : index
    %0 = vector.load %arg1[%c0, %c0_0] : memref<16x128xbf16, #tpu.memory_space<vmem>>, vector<16x128xbf16>
    %c0_1 = arith.constant 0 : index
    %c0_2 = arith.constant 0 : index
    %1 = vector.load %arg2[%c0_1, %c0_2] : memref<128x512xbf16, #tpu.memory_space<vmem>>, vector<128x512xbf16>
    %cst = arith.constant dense<0.000000e+00> : vector<16x512xf32>
    %2 = tpu.matmul %0, %1, %cst {dimension_numbers = #tpu.dot_dimension_numbers<[1], [0], [0], [1], [0, 0, 1, 1], [], []>} : vector<16x128xbf16>, vector<128x512xbf16>, vector<16x512xf32> -> vector<16x512xf32>
    %c0_3 = arith.constant 0 : index
    %c0_4 = arith.constant 0 : index
    %3 = vector.load %arg3[%c0_3, %c0_4] : memref<16x3xf32, #tpu.memory_space<vmem>>, vector<16x3xf32>
    %4 = vector.extract_strided_slice %3 {offsets = [0, 0], sizes = [16, 1], strides = [1, 1]} : vector<16x3xf32> to vector<16x1xf32>
    %5 = vector.broadcast %4 : vector<16x1xf32> to vector<16x512xf32>
    %6 = arith.addf %2, %5 : vector<16x512xf32>
    %cst_5 = arith.constant 0.000000e+00 : f32
    %7 = vector.broadcast %cst_5 : f32 to vector<16x512xf32>
    %8 = arith.cmpf oge, %6, %7 : vector<16x512xf32>
    %cst_6 = arith.constant 2.000000e-02 : f32
    %9 = vector.broadcast %cst_6 : f32 to vector<16x512xf32>
    %10 = arith.mulf %9, %6 : vector<16x512xf32>
    %11 = arith.select %8, %6, %10 : vector<16x512xi1>, vector<16x512xf32>
    %12 = vector.extract_strided_slice %3 {offsets = [0, 1], sizes = [16, 1], strides = [1, 1]} : vector<16x3xf32> to vector<16x1xf32>
    %13 = vector.broadcast %12 : vector<16x1xf32> to vector<16x512xf32>
    %14 = arith.mulf %11, %13 : vector<16x512xf32>
    %15 = vector.extract_strided_slice %3 {offsets = [0, 2], sizes = [16, 1], strides = [1, 1]} : vector<16x3xf32> to vector<16x1xf32>
    %16 = vector.broadcast %15 : vector<16x1xf32> to vector<16x512xf32>
    %17 = arith.addf %14, %16 : vector<16x512xf32>
    %18 = arith.truncf %17 : vector<16x512xf32> to vector<16x512xbf16>
    %c0_7 = arith.constant 0 : index
    %c0_8 = arith.constant 0 : index
    %19 = vector.load %arg4[%c0_7, %c0_8] : memref<16x512xbf16, #tpu.memory_space<vmem>>, vector<16x512xbf16>
    tpu.vector_store %arg4[%c0_7, %c0_8], %18 {strides = array<i32>} : memref<16x512xbf16, #tpu.memory_space<vmem>>, vector<16x512xbf16>,
    return
  }
  func.func @transform_0(%arg0: i32) -> (i32, i32) {
    %c0_i32 = arith.constant 0 : i32
    %c0_i32_0 = arith.constant 0 : i32
    %c0_i32_1 = arith.constant 0 : i32
    return %c0_i32, %c0_i32_0 : i32, i32
  }
  func.func @transform_1(%arg0: i32) -> (i32, i32) {
    %c0_i32 = arith.constant 0 : i32
    %c0_i32_0 = arith.constant 0 : i32
    return %c0_i32, %arg0 : i32, i32
  }
  func.func @transform_2(%arg0: i32) -> (i32, i32) {
    %c0_i32 = arith.constant 0 : i32
    %c0_i32_0 = arith.constant 0 : i32
    %c0_i32_1 = arith.constant 0 : i32
    return %c0_i32, %c0_i32_0 : i32, i32
  }
  func.func @transform_3(%arg0: i32) -> (i32, i32) {
    %c0_i32 = arith.constant 0 : i32
    %c0_i32_0 = arith.constant 0 : i32
    return %c0_i32, %arg0 : i32, i32
  }
}

module attributes {stable_mosaic.version = 11 : i64} {
  func.func @kernel(%arg0: i32, %arg1: memref<16x256xbf16, #tpu.memory_space<vmem>>, %arg2: memref<256x128xbf16, #tpu.memory_space<vmem>>, %arg3: memref<16x3xf32, #tpu.memory_space<vmem>>, %arg4: memref<16x128xbf16, #tpu.memory_space<vmem>>) attributes {dimension_semantics = [#tpu.dimension_semantics<parallel>], iteration_bounds = array<i64: 1>, scalar_prefetch = 0 : i64, scratch_operands = 0 : i64, tpu.core_type = #tpu.core_type<tc>, window_params = [{pipeline_mode = #tpu.pipeline_mode<synchronous>, transform_indices = @transform_0, window_bounds = array<i64: 16, 256>}, {transform_indices = @transform_1, window_bounds = array<i64: 256, 128>}, {pipeline_mode = #tpu.pipeline_mode<synchronous>, transform_indices = @transform_2, window_bounds = array<i64: 16, 3>}, {transform_indices = @transform_3, window_bounds = array<i64: 16, 128>}]} {
    %c0 = arith.constant 0 : index
    %c0_0 = arith.constant 0 : index
    %0 = vector.load %arg1[%c0, %c0_0] : memref<16x256xbf16, #tpu.memory_space<vmem>>, vector<16x256xbf16>
    %c0_1 = arith.constant 0 : index
    %c0_2 = arith.constant 0 : index
    %1 = vector.load %arg2[%c0_1, %c0_2] : memref<256x128xbf16, #tpu.memory_space<vmem>>, vector<256x128xbf16>
    %cst = arith.constant dense<0.000000e+00> : vector<16x128xf32>
    %2 = tpu.matmul %0, %1, %cst {dimension_numbers = #tpu.dot_dimension_numbers<[1], [0], [0], [1], [0, 0, 1, 1], [], []>} : vector<16x256xbf16>, vector<256x128xbf16>, vector<16x128xf32> -> vector<16x128xf32>
    %c0_3 = arith.constant 0 : index
    %c0_4 = arith.constant 0 : index
    %3 = vector.load %arg3[%c0_3, %c0_4] : memref<16x3xf32, #tpu.memory_space<vmem>>, vector<16x3xf32>
    %4 = vector.extract_strided_slice %3 {offsets = [0, 0], sizes = [16, 1], strides = [1, 1]} : vector<16x3xf32> to vector<16x1xf32>
    %5 = vector.broadcast %4 : vector<16x1xf32> to vector<16x128xf32>
    %6 = arith.addf %2, %5 : vector<16x128xf32>
    %cst_5 = arith.constant 0.000000e+00 : f32
    %7 = vector.broadcast %cst_5 : f32 to vector<16x128xf32>
    %8 = arith.cmpf oge, %6, %7 : vector<16x128xf32>
    %cst_6 = arith.constant 2.000000e-02 : f32
    %9 = vector.broadcast %cst_6 : f32 to vector<16x128xf32>
    %10 = arith.mulf %9, %6 : vector<16x128xf32>
    %11 = arith.select %8, %6, %10 : vector<16x128xi1>, vector<16x128xf32>
    %12 = vector.extract_strided_slice %3 {offsets = [0, 1], sizes = [16, 1], strides = [1, 1]} : vector<16x3xf32> to vector<16x1xf32>
    %13 = vector.broadcast %12 : vector<16x1xf32> to vector<16x128xf32>
    %14 = arith.mulf %11, %13 : vector<16x128xf32>
    %15 = vector.extract_strided_slice %3 {offsets = [0, 2], sizes = [16, 1], strides = [1, 1]} : vector<16x3xf32> to vector<16x1xf32>
    %16 = vector.broadcast %15 : vector<16x1xf32> to vector<16x128xf32>
    %17 = arith.addf %14, %16 : vector<16x128xf32>
    %18 = arith.truncf %17 : vector<16x128xf32> to vector<16x128xbf16>
    %c0_7 = arith.constant 0 : index
    %c0_8 = arith.constant 0 : index
    %19 = vector.load %arg4[%c0_7, %c0_8] : memref<16x128xbf16, #tpu.memory_space<vmem>>, vector<16x128xbf16>
    tpu.vector_store %arg4[%c0_7, %c0_8], %18 {strides = array<i32>} : memref<16x128xbf16, #tpu.memory_space<vmem>>, vector<16x128xbf16>,
    return
  }
  func.func @transform_0(%arg0: i32) -> (i32, i32) {
    %c0_i32 = arith.constant 0 : i32
    %c0_i32_0 = arith.constant 0 : i32
    %c0_i32_1 = arith.constant 0 : i32
    return %c0_i32, %c0_i32_0 : i32, i32
  }
  func.func @transform_1(%arg0: i32) -> (i32, i32) {
    %c0_i32 = arith.constant 0 : i32
    %c0_i32_0 = arith.constant 0 : i32
    return %c0_i32, %arg0 : i32, i32
  }
  func.func @transform_2(%arg0: i32) -> (i32, i32) {
    %c0_i32 = arith.constant 0 : i32
    %c0_i32_0 = arith.constant 0 : i32
    %c0_i32_1 = arith.constant 0 : i32
    return %c0_i32, %c0_i32_0 : i32, i32
  }
  func.func @transform_3(%arg0: i32) -> (i32, i32) {
    %c0_i32 = arith.constant 0 : i32
    %c0_i32_0 = arith.constant 0 : i32
    return %c0_i32, %arg0 : i32, i32
  }
}

module attributes {stable_mosaic.version = 11 : i64} {
  func.func @kernel(%arg0: i32, %arg1: memref<16x512xbf16, #tpu.memory_space<vmem>>, %arg2: memref<512x128xbf16, #tpu.memory_space<vmem>>, %arg3: memref<16x3xf32, #tpu.memory_space<vmem>>, %arg4: memref<16x128xbf16, #tpu.memory_space<vmem>>) attributes {dimension_semantics = [#tpu.dimension_semantics<parallel>], iteration_bounds = array<i64: 1>, scalar_prefetch = 0 : i64, scratch_operands = 0 : i64, tpu.core_type = #tpu.core_type<tc>, window_params = [{pipeline_mode = #tpu.pipeline_mode<synchronous>, transform_indices = @transform_0, window_bounds = array<i64: 16, 512>}, {transform_indices = @transform_1, window_bounds = array<i64: 512, 128>}, {pipeline_mode = #tpu.pipeline_mode<synchronous>, transform_indices = @transform_2, window_bounds = array<i64: 16, 3>}, {transform_indices = @transform_3, window_bounds = array<i64: 16, 128>}]} {
    %c0 = arith.constant 0 : index
    %c0_0 = arith.constant 0 : index
    %0 = vector.load %arg1[%c0, %c0_0] : memref<16x512xbf16, #tpu.memory_space<vmem>>, vector<16x512xbf16>
    %c0_1 = arith.constant 0 : index
    %c0_2 = arith.constant 0 : index
    %1 = vector.load %arg2[%c0_1, %c0_2] : memref<512x128xbf16, #tpu.memory_space<vmem>>, vector<512x128xbf16>
    %cst = arith.constant dense<0.000000e+00> : vector<16x128xf32>
    %2 = tpu.matmul %0, %1, %cst {dimension_numbers = #tpu.dot_dimension_numbers<[1], [0], [0], [1], [0, 0, 1, 1], [], []>} : vector<16x512xbf16>, vector<512x128xbf16>, vector<16x128xf32> -> vector<16x128xf32>
    %c0_3 = arith.constant 0 : index
    %c0_4 = arith.constant 0 : index
    %3 = vector.load %arg3[%c0_3, %c0_4] : memref<16x3xf32, #tpu.memory_space<vmem>>, vector<16x3xf32>
    %4 = vector.extract_strided_slice %3 {offsets = [0, 0], sizes = [16, 1], strides = [1, 1]} : vector<16x3xf32> to vector<16x1xf32>
    %5 = vector.broadcast %4 : vector<16x1xf32> to vector<16x128xf32>
    %6 = arith.addf %2, %5 : vector<16x128xf32>
    %cst_5 = arith.constant 0.000000e+00 : f32
    %7 = vector.broadcast %cst_5 : f32 to vector<16x128xf32>
    %8 = arith.cmpf oge, %6, %7 : vector<16x128xf32>
    %cst_6 = arith.constant 2.000000e-02 : f32
    %9 = vector.broadcast %cst_6 : f32 to vector<16x128xf32>
    %10 = arith.mulf %9, %6 : vector<16x128xf32>
    %11 = arith.select %8, %6, %10 : vector<16x128xi1>, vector<16x128xf32>
    %12 = vector.extract_strided_slice %3 {offsets = [0, 1], sizes = [16, 1], strides = [1, 1]} : vector<16x3xf32> to vector<16x1xf32>
    %13 = vector.broadcast %12 : vector<16x1xf32> to vector<16x128xf32>
    %14 = arith.mulf %11, %13 : vector<16x128xf32>
    %15 = vector.extract_strided_slice %3 {offsets = [0, 2], sizes = [16, 1], strides = [1, 1]} : vector<16x3xf32> to vector<16x1xf32>
    %16 = vector.broadcast %15 : vector<16x1xf32> to vector<16x128xf32>
    %17 = arith.addf %14, %16 : vector<16x128xf32>
    %18 = arith.truncf %17 : vector<16x128xf32> to vector<16x128xbf16>
    %c0_7 = arith.constant 0 : index
    %c0_8 = arith.constant 0 : index
    %19 = vector.load %arg4[%c0_7, %c0_8] : memref<16x128xbf16, #tpu.memory_space<vmem>>, vector<16x128xbf16>
    tpu.vector_store %arg4[%c0_7, %c0_8], %18 {strides = array<i32>} : memref<16x128xbf16, #tpu.memory_space<vmem>>, vector<16x128xbf16>,
    return
  }
  func.func @transform_0(%arg0: i32) -> (i32, i32) {
    %c0_i32 = arith.constant 0 : i32
    %c0_i32_0 = arith.constant 0 : i32
    %c0_i32_1 = arith.constant 0 : i32
    return %c0_i32, %c0_i32_0 : i32, i32
  }
  func.func @transform_1(%arg0: i32) -> (i32, i32) {
    %c0_i32 = arith.constant 0 : i32
    %c0_i32_0 = arith.constant 0 : i32
    return %c0_i32, %arg0 : i32, i32
  }
  func.func @transform_2(%arg0: i32) -> (i32, i32) {
    %c0_i32 = arith.constant 0 : i32
    %c0_i32_0 = arith.constant 0 : i32
    %c0_i32_1 = arith.constant 0 : i32
    return %c0_i32, %c0_i32_0 : i32, i32
  }
  func.func @transform_3(%arg0: i32) -> (i32, i32) {
    %c0_i32 = arith.constant 0 : i32
    %c0_i32_0 = arith.constant 0 : i32
    return %c0_i32, %arg0 : i32, i32
  }
}

module attributes {stable_mosaic.version = 11 : i64} {
  func.func @kernel(%arg0: i32, %arg1: memref<16x384xbf16, #tpu.memory_space<vmem>>, %arg2: memref<384x128xbf16, #tpu.memory_space<vmem>>, %arg3: memref<16x3xf32, #tpu.memory_space<vmem>>, %arg4: memref<16x128xbf16, #tpu.memory_space<vmem>>) attributes {dimension_semantics = [#tpu.dimension_semantics<parallel>], iteration_bounds = array<i64: 1>, scalar_prefetch = 0 : i64, scratch_operands = 0 : i64, tpu.core_type = #tpu.core_type<tc>, window_params = [{pipeline_mode = #tpu.pipeline_mode<synchronous>, transform_indices = @transform_0, window_bounds = array<i64: 16, 384>}, {transform_indices = @transform_1, window_bounds = array<i64: 384, 128>}, {pipeline_mode = #tpu.pipeline_mode<synchronous>, transform_indices = @transform_2, window_bounds = array<i64: 16, 3>}, {transform_indices = @transform_3, window_bounds = array<i64: 16, 128>}]} {
    %c0 = arith.constant 0 : index
    %c0_0 = arith.constant 0 : index
    %0 = vector.load %arg1[%c0, %c0_0] : memref<16x384xbf16, #tpu.memory_space<vmem>>, vector<16x384xbf16>
    %c0_1 = arith.constant 0 : index
    %c0_2 = arith.constant 0 : index
    %1 = vector.load %arg2[%c0_1, %c0_2] : memref<384x128xbf16, #tpu.memory_space<vmem>>, vector<384x128xbf16>
    %cst = arith.constant dense<0.000000e+00> : vector<16x128xf32>
    %2 = tpu.matmul %0, %1, %cst {dimension_numbers = #tpu.dot_dimension_numbers<[1], [0], [0], [1], [0, 0, 1, 1], [], []>} : vector<16x384xbf16>, vector<384x128xbf16>, vector<16x128xf32> -> vector<16x128xf32>
    %c0_3 = arith.constant 0 : index
    %c0_4 = arith.constant 0 : index
    %3 = vector.load %arg3[%c0_3, %c0_4] : memref<16x3xf32, #tpu.memory_space<vmem>>, vector<16x3xf32>
    %4 = vector.extract_strided_slice %3 {offsets = [0, 0], sizes = [16, 1], strides = [1, 1]} : vector<16x3xf32> to vector<16x1xf32>
    %5 = vector.broadcast %4 : vector<16x1xf32> to vector<16x128xf32>
    %6 = arith.addf %2, %5 : vector<16x128xf32>
    %cst_5 = arith.constant 0.000000e+00 : f32
    %7 = vector.broadcast %cst_5 : f32 to vector<16x128xf32>
    %8 = arith.cmpf oge, %6, %7 : vector<16x128xf32>
    %cst_6 = arith.constant 2.000000e-02 : f32
    %9 = vector.broadcast %cst_6 : f32 to vector<16x128xf32>
    %10 = arith.mulf %9, %6 : vector<16x128xf32>
    %11 = arith.select %8, %6, %10 : vector<16x128xi1>, vector<16x128xf32>
    %12 = vector.extract_strided_slice %3 {offsets = [0, 1], sizes = [16, 1], strides = [1, 1]} : vector<16x3xf32> to vector<16x1xf32>
    %13 = vector.broadcast %12 : vector<16x1xf32> to vector<16x128xf32>
    %14 = arith.mulf %11, %13 : vector<16x128xf32>
    %15 = vector.extract_strided_slice %3 {offsets = [0, 2], sizes = [16, 1], strides = [1, 1]} : vector<16x3xf32> to vector<16x1xf32>
    %16 = vector.broadcast %15 : vector<16x1xf32> to vector<16x128xf32>
    %17 = arith.addf %14, %16 : vector<16x128xf32>
    %18 = arith.truncf %17 : vector<16x128xf32> to vector<16x128xbf16>
    %c0_7 = arith.constant 0 : index
    %c0_8 = arith.constant 0 : index
    %19 = vector.load %arg4[%c0_7, %c0_8] : memref<16x128xbf16, #tpu.memory_space<vmem>>, vector<16x128xbf16>
    tpu.vector_store %arg4[%c0_7, %c0_8], %18 {strides = array<i32>} : memref<16x128xbf16, #tpu.memory_space<vmem>>, vector<16x128xbf16>,
    return
  }
  func.func @transform_0(%arg0: i32) -> (i32, i32) {
    %c0_i32 = arith.constant 0 : i32
    %c0_i32_0 = arith.constant 0 : i32
    %c0_i32_1 = arith.constant 0 : i32
    return %c0_i32, %c0_i32_0 : i32, i32
  }
  func.func @transform_1(%arg0: i32) -> (i32, i32) {
    %c0_i32 = arith.constant 0 : i32
    %c0_i32_0 = arith.constant 0 : i32
    return %c0_i32, %arg0 : i32, i32
  }
  func.func @transform_2(%arg0: i32) -> (i32, i32) {
    %c0_i32 = arith.constant 0 : i32
    %c0_i32_0 = arith.constant 0 : i32
    %c0_i32_1 = arith.constant 0 : i32
    return %c0_i32, %c0_i32_0 : i32, i32
  }
  func.func @transform_3(%arg0: i32) -> (i32, i32) {
    %c0_i32 = arith.constant 0 : i32
    %c0_i32_0 = arith.constant 0 : i32
    return %c0_i32, %arg0 : i32, i32
  }
}

module attributes {stable_mosaic.version = 11 : i64} {
  func.func @kernel(%arg0: i32, %arg1: memref<16x768xbf16, #tpu.memory_space<vmem>>, %arg2: memref<768x128xbf16, #tpu.memory_space<vmem>>, %arg3: memref<16x3xf32, #tpu.memory_space<vmem>>, %arg4: memref<16x128xbf16, #tpu.memory_space<vmem>>) attributes {dimension_semantics = [#tpu.dimension_semantics<parallel>], iteration_bounds = array<i64: 1>, scalar_prefetch = 0 : i64, scratch_operands = 0 : i64, tpu.core_type = #tpu.core_type<tc>, window_params = [{pipeline_mode = #tpu.pipeline_mode<synchronous>, transform_indices = @transform_0, window_bounds = array<i64: 16, 768>}, {transform_indices = @transform_1, window_bounds = array<i64: 768, 128>}, {pipeline_mode = #tpu.pipeline_mode<synchronous>, transform_indices = @transform_2, window_bounds = array<i64: 16, 3>}, {transform_indices = @transform_3, window_bounds = array<i64: 16, 128>}]} {
    %c0 = arith.constant 0 : index
    %c0_0 = arith.constant 0 : index
    %0 = vector.load %arg1[%c0, %c0_0] : memref<16x768xbf16, #tpu.memory_space<vmem>>, vector<16x768xbf16>
    %c0_1 = arith.constant 0 : index
    %c0_2 = arith.constant 0 : index
    %1 = vector.load %arg2[%c0_1, %c0_2] : memref<768x128xbf16, #tpu.memory_space<vmem>>, vector<768x128xbf16>
    %cst = arith.constant dense<0.000000e+00> : vector<16x128xf32>
    %2 = tpu.matmul %0, %1, %cst {dimension_numbers = #tpu.dot_dimension_numbers<[1], [0], [0], [1], [0, 0, 1, 1], [], []>} : vector<16x768xbf16>, vector<768x128xbf16>, vector<16x128xf32> -> vector<16x128xf32>
    %c0_3 = arith.constant 0 : index
    %c0_4 = arith.constant 0 : index
    %3 = vector.load %arg3[%c0_3, %c0_4] : memref<16x3xf32, #tpu.memory_space<vmem>>, vector<16x3xf32>
    %4 = vector.extract_strided_slice %3 {offsets = [0, 0], sizes = [16, 1], strides = [1, 1]} : vector<16x3xf32> to vector<16x1xf32>
    %5 = vector.broadcast %4 : vector<16x1xf32> to vector<16x128xf32>
    %6 = arith.addf %2, %5 : vector<16x128xf32>
    %cst_5 = arith.constant 0.000000e+00 : f32
    %7 = vector.broadcast %cst_5 : f32 to vector<16x128xf32>
    %8 = arith.cmpf oge, %6, %7 : vector<16x128xf32>
    %cst_6 = arith.constant 2.000000e-02 : f32
    %9 = vector.broadcast %cst_6 : f32 to vector<16x128xf32>
    %10 = arith.mulf %9, %6 : vector<16x128xf32>
    %11 = arith.select %8, %6, %10 : vector<16x128xi1>, vector<16x128xf32>
    %12 = vector.extract_strided_slice %3 {offsets = [0, 1], sizes = [16, 1], strides = [1, 1]} : vector<16x3xf32> to vector<16x1xf32>
    %13 = vector.broadcast %12 : vector<16x1xf32> to vector<16x128xf32>
    %14 = arith.mulf %11, %13 : vector<16x128xf32>
    %15 = vector.extract_strided_slice %3 {offsets = [0, 2], sizes = [16, 1], strides = [1, 1]} : vector<16x3xf32> to vector<16x1xf32>
    %16 = vector.broadcast %15 : vector<16x1xf32> to vector<16x128xf32>
    %17 = arith.addf %14, %16 : vector<16x128xf32>
    %18 = arith.truncf %17 : vector<16x128xf32> to vector<16x128xbf16>
    %c0_7 = arith.constant 0 : index
    %c0_8 = arith.constant 0 : index
    %19 = vector.load %arg4[%c0_7, %c0_8] : memref<16x128xbf16, #tpu.memory_space<vmem>>, vector<16x128xbf16>
    tpu.vector_store %arg4[%c0_7, %c0_8], %18 {strides = array<i32>} : memref<16x128xbf16, #tpu.memory_space<vmem>>, vector<16x128xbf16>,
    return
  }
  func.func @transform_0(%arg0: i32) -> (i32, i32) {
    %c0_i32 = arith.constant 0 : i32
    %c0_i32_0 = arith.constant 0 : i32
    %c0_i32_1 = arith.constant 0 : i32
    return %c0_i32, %c0_i32_0 : i32, i32
  }
  func.func @transform_1(%arg0: i32) -> (i32, i32) {
    %c0_i32 = arith.constant 0 : i32
    %c0_i32_0 = arith.constant 0 : i32
    return %c0_i32, %arg0 : i32, i32
  }
  func.func @transform_2(%arg0: i32) -> (i32, i32) {
    %c0_i32 = arith.constant 0 : i32
    %c0_i32_0 = arith.constant 0 : i32
    %c0_i32_1 = arith.constant 0 : i32
    return %c0_i32, %c0_i32_0 : i32, i32
  }
  func.func @transform_3(%arg0: i32) -> (i32, i32) {
    %c0_i32 = arith.constant 0 : i32
    %c0_i32_0 = arith.constant 0 : i32
    return %c0_i32, %arg0 : i32, i32
  }
}

module attributes {stable_mosaic.version = 11 : i64} {
  func.func @kernel(%arg0: i32, %arg1: memref<96x128xbf16, #tpu.memory_space<vmem>>, %arg2: memref<128x128xbf16, #tpu.memory_space<vmem>>, %arg3: memref<96x3xf32, #tpu.memory_space<vmem>>, %arg4: memref<96x128xbf16, #tpu.memory_space<vmem>>) attributes {dimension_semantics = [#tpu.dimension_semantics<parallel>], iteration_bounds = array<i64: 1>, scalar_prefetch = 0 : i64, scratch_operands = 0 : i64, tpu.core_type = #tpu.core_type<tc>, window_params = [{pipeline_mode = #tpu.pipeline_mode<synchronous>, transform_indices = @transform_0, window_bounds = array<i64: 96, 128>}, {transform_indices = @transform_1, window_bounds = array<i64: 128, 128>}, {pipeline_mode = #tpu.pipeline_mode<synchronous>, transform_indices = @transform_2, window_bounds = array<i64: 96, 3>}, {transform_indices = @transform_3, window_bounds = array<i64: 96, 128>}]} {
    %c0 = arith.constant 0 : index
    %c0_0 = arith.constant 0 : index
    %0 = vector.load %arg1[%c0, %c0_0] : memref<96x128xbf16, #tpu.memory_space<vmem>>, vector<96x128xbf16>
    %c0_1 = arith.constant 0 : index
    %c0_2 = arith.constant 0 : index
    %1 = vector.load %arg2[%c0_1, %c0_2] : memref<128x128xbf16, #tpu.memory_space<vmem>>, vector<128x128xbf16>
    %cst = arith.constant dense<0.000000e+00> : vector<96x128xf32>
    %2 = tpu.matmul %0, %1, %cst {dimension_numbers = #tpu.dot_dimension_numbers<[1], [0], [0], [1], [0, 0, 1, 1], [], []>} : vector<96x128xbf16>, vector<128x128xbf16>, vector<96x128xf32> -> vector<96x128xf32>
    %c0_3 = arith.constant 0 : index
    %c0_4 = arith.constant 0 : index
    %3 = vector.load %arg3[%c0_3, %c0_4] : memref<96x3xf32, #tpu.memory_space<vmem>>, vector<96x3xf32>
    %4 = vector.extract_strided_slice %3 {offsets = [0, 0], sizes = [96, 1], strides = [1, 1]} : vector<96x3xf32> to vector<96x1xf32>
    %5 = vector.broadcast %4 : vector<96x1xf32> to vector<96x128xf32>
    %6 = arith.addf %2, %5 : vector<96x128xf32>
    %cst_5 = arith.constant 0.000000e+00 : f32
    %7 = vector.broadcast %cst_5 : f32 to vector<96x128xf32>
    %8 = arith.cmpf oge, %6, %7 : vector<96x128xf32>
    %cst_6 = arith.constant 2.000000e-02 : f32
    %9 = vector.broadcast %cst_6 : f32 to vector<96x128xf32>
    %10 = arith.mulf %9, %6 : vector<96x128xf32>
    %11 = arith.select %8, %6, %10 : vector<96x128xi1>, vector<96x128xf32>
    %12 = vector.extract_strided_slice %3 {offsets = [0, 1], sizes = [96, 1], strides = [1, 1]} : vector<96x3xf32> to vector<96x1xf32>
    %13 = vector.broadcast %12 : vector<96x1xf32> to vector<96x128xf32>
    %14 = arith.mulf %11, %13 : vector<96x128xf32>
    %15 = vector.extract_strided_slice %3 {offsets = [0, 2], sizes = [96, 1], strides = [1, 1]} : vector<96x3xf32> to vector<96x1xf32>
    %16 = vector.broadcast %15 : vector<96x1xf32> to vector<96x128xf32>
    %17 = arith.addf %14, %16 : vector<96x128xf32>
    %18 = arith.truncf %17 : vector<96x128xf32> to vector<96x128xbf16>
    %c0_7 = arith.constant 0 : index
    %c0_8 = arith.constant 0 : index
    %19 = vector.load %arg4[%c0_7, %c0_8] : memref<96x128xbf16, #tpu.memory_space<vmem>>, vector<96x128xbf16>
    tpu.vector_store %arg4[%c0_7, %c0_8], %18 {strides = array<i32>} : memref<96x128xbf16, #tpu.memory_space<vmem>>, vector<96x128xbf16>,
    return
  }
  func.func @transform_0(%arg0: i32) -> (i32, i32) {
    %c0_i32 = arith.constant 0 : i32
    %c0_i32_0 = arith.constant 0 : i32
    %c0_i32_1 = arith.constant 0 : i32
    return %c0_i32, %c0_i32_0 : i32, i32
  }
  func.func @transform_1(%arg0: i32) -> (i32, i32) {
    %c0_i32 = arith.constant 0 : i32
    %c0_i32_0 = arith.constant 0 : i32
    return %c0_i32, %arg0 : i32, i32
  }
  func.func @transform_2(%arg0: i32) -> (i32, i32) {
    %c0_i32 = arith.constant 0 : i32
    %c0_i32_0 = arith.constant 0 : i32
    %c0_i32_1 = arith.constant 0 : i32
    return %c0_i32, %c0_i32_0 : i32, i32
  }
  func.func @transform_3(%arg0: i32) -> (i32, i32) {
    %c0_i32 = arith.constant 0 : i32
    %c0_i32_0 = arith.constant 0 : i32
    return %c0_i32, %arg0 : i32, i32
  }
}

module attributes {stable_mosaic.version = 11 : i64} {
  func.func @kernel(%arg0: i32, %arg1: memref<16x384xbf16, #tpu.memory_space<vmem>>, %arg2: memref<384x128xbf16, #tpu.memory_space<vmem>>, %arg3: memref<16x3xf32, #tpu.memory_space<vmem>>, %arg4: memref<16x128xbf16, #tpu.memory_space<vmem>>, %arg5: memref<16x128xbf16, #tpu.memory_space<vmem>>) attributes {dimension_semantics = [#tpu.dimension_semantics<parallel>], iteration_bounds = array<i64: 1>, scalar_prefetch = 0 : i64, scratch_operands = 0 : i64, tpu.core_type = #tpu.core_type<tc>, window_params = [{pipeline_mode = #tpu.pipeline_mode<synchronous>, transform_indices = @transform_0, window_bounds = array<i64: 16, 384>}, {transform_indices = @transform_1, window_bounds = array<i64: 384, 128>}, {pipeline_mode = #tpu.pipeline_mode<synchronous>, transform_indices = @transform_2, window_bounds = array<i64: 16, 3>}, {transform_indices = @transform_3, window_bounds = array<i64: 16, 128>}, {transform_indices = @transform_4, window_bounds = array<i64: 16, 128>}]} {
    %c0 = arith.constant 0 : index
    %c0_0 = arith.constant 0 : index
    %0 = vector.load %arg1[%c0, %c0_0] : memref<16x384xbf16, #tpu.memory_space<vmem>>, vector<16x384xbf16>
    %c0_1 = arith.constant 0 : index
    %c0_2 = arith.constant 0 : index
    %1 = vector.load %arg2[%c0_1, %c0_2] : memref<384x128xbf16, #tpu.memory_space<vmem>>, vector<384x128xbf16>
    %cst = arith.constant dense<0.000000e+00> : vector<16x128xf32>
    %2 = tpu.matmul %0, %1, %cst {dimension_numbers = #tpu.dot_dimension_numbers<[1], [0], [0], [1], [0, 0, 1, 1], [], []>} : vector<16x384xbf16>, vector<384x128xbf16>, vector<16x128xf32> -> vector<16x128xf32>
    %c0_3 = arith.constant 0 : index
    %c0_4 = arith.constant 0 : index
    %3 = vector.load %arg3[%c0_3, %c0_4] : memref<16x3xf32, #tpu.memory_space<vmem>>, vector<16x3xf32>
    %4 = vector.extract_strided_slice %3 {offsets = [0, 0], sizes = [16, 1], strides = [1, 1]} : vector<16x3xf32> to vector<16x1xf32>
    %5 = vector.broadcast %4 : vector<16x1xf32> to vector<16x128xf32>
    %6 = arith.addf %2, %5 : vector<16x128xf32>
    %cst_5 = arith.constant 0.000000e+00 : f32
    %7 = vector.broadcast %cst_5 : f32 to vector<16x128xf32>
    %8 = arith.cmpf oge, %6, %7 : vector<16x128xf32>
    %cst_6 = arith.constant 2.000000e-02 : f32
    %9 = vector.broadcast %cst_6 : f32 to vector<16x128xf32>
    %10 = arith.mulf %9, %6 : vector<16x128xf32>
    %11 = arith.select %8, %6, %10 : vector<16x128xi1>, vector<16x128xf32>
    %12 = vector.extract_strided_slice %3 {offsets = [0, 1], sizes = [16, 1], strides = [1, 1]} : vector<16x3xf32> to vector<16x1xf32>
    %13 = vector.broadcast %12 : vector<16x1xf32> to vector<16x128xf32>
    %14 = arith.mulf %11, %13 : vector<16x128xf32>
    %15 = vector.extract_strided_slice %3 {offsets = [0, 2], sizes = [16, 1], strides = [1, 1]} : vector<16x3xf32> to vector<16x1xf32>
    %16 = vector.broadcast %15 : vector<16x1xf32> to vector<16x128xf32>
    %17 = arith.addf %14, %16 : vector<16x128xf32>
    %c0_7 = arith.constant 0 : index
    %c0_8 = arith.constant 0 : index
    %18 = vector.load %arg4[%c0_7, %c0_8] : memref<16x128xbf16, #tpu.memory_space<vmem>>, vector<16x128xbf16>
    %19 = arith.extf %18 : vector<16x128xbf16> to vector<16x128xf32>
    %20 = arith.addf %17, %19 : vector<16x128xf32>
    %21 = arith.truncf %20 : vector<16x128xf32> to vector<16x128xbf16>
    %c0_9 = arith.constant 0 : index
    %c0_10 = arith.constant 0 : index
    %22 = vector.load %arg5[%c0_9, %c0_10] : memref<16x128xbf16, #tpu.memory_space<vmem>>, vector<16x128xbf16>
    tpu.vector_store %arg5[%c0_9, %c0_10], %21 {strides = array<i32>} : memref<16x128xbf16, #tpu.memory_space<vmem>>, vector<16x128xbf16>,
    return
  }
  func.func @transform_0(%arg0: i32) -> (i32, i32) {
    %c0_i32 = arith.constant 0 : i32
    %c0_i32_0 = arith.constant 0 : i32
    %c0_i32_1 = arith.constant 0 : i32
    return %c0_i32, %c0_i32_0 : i32, i32
  }
  func.func @transform_1(%arg0: i32) -> (i32, i32) {
    %c0_i32 = arith.constant 0 : i32
    %c0_i32_0 = arith.constant 0 : i32
    return %c0_i32, %arg0 : i32, i32
  }
  func.func @transform_2(%arg0: i32) -> (i32, i32) {
    %c0_i32 = arith.constant 0 : i32
    %c0_i32_0 = arith.constant 0 : i32
    %c0_i32_1 = arith.constant 0 : i32
    return %c0_i32, %c0_i32_0 : i32, i32
  }
  func.func @transform_3(%arg0: i32) -> (i32, i32) {
    %c0_i32 = arith.constant 0 : i32
    %c0_i32_0 = arith.constant 0 : i32
    return %c0_i32, %arg0 : i32, i32
  }
  func.func @transform_4(%arg0: i32) -> (i32, i32) {
    %c0_i32 = arith.constant 0 : i32
    %c0_i32_0 = arith.constant 0 : i32
    return %c0_i32, %arg0 : i32, i32
  }
}

module attributes {stable_mosaic.version = 11 : i64} {
  func.func @kernel(%arg0: i32, %arg1: memref<64x128xbf16, #tpu.memory_space<vmem>>, %arg2: memref<128x128xbf16, #tpu.memory_space<vmem>>, %arg3: memref<64x3xf32, #tpu.memory_space<vmem>>, %arg4: memref<64x128xbf16, #tpu.memory_space<vmem>>) attributes {dimension_semantics = [#tpu.dimension_semantics<parallel>], iteration_bounds = array<i64: 1>, scalar_prefetch = 0 : i64, scratch_operands = 0 : i64, tpu.core_type = #tpu.core_type<tc>, window_params = [{pipeline_mode = #tpu.pipeline_mode<synchronous>, transform_indices = @transform_0, window_bounds = array<i64: 64, 128>}, {transform_indices = @transform_1, window_bounds = array<i64: 128, 128>}, {pipeline_mode = #tpu.pipeline_mode<synchronous>, transform_indices = @transform_2, window_bounds = array<i64: 64, 3>}, {transform_indices = @transform_3, window_bounds = array<i64: 64, 128>}]} {
    %c0 = arith.constant 0 : index
    %c0_0 = arith.constant 0 : index
    %0 = vector.load %arg1[%c0, %c0_0] : memref<64x128xbf16, #tpu.memory_space<vmem>>, vector<64x128xbf16>
    %c0_1 = arith.constant 0 : index
    %c0_2 = arith.constant 0 : index
    %1 = vector.load %arg2[%c0_1, %c0_2] : memref<128x128xbf16, #tpu.memory_space<vmem>>, vector<128x128xbf16>
    %cst = arith.constant dense<0.000000e+00> : vector<64x128xf32>
    %2 = tpu.matmul %0, %1, %cst {dimension_numbers = #tpu.dot_dimension_numbers<[1], [0], [0], [1], [0, 0, 1, 1], [], []>} : vector<64x128xbf16>, vector<128x128xbf16>, vector<64x128xf32> -> vector<64x128xf32>
    %c0_3 = arith.constant 0 : index
    %c0_4 = arith.constant 0 : index
    %3 = vector.load %arg3[%c0_3, %c0_4] : memref<64x3xf32, #tpu.memory_space<vmem>>, vector<64x3xf32>
    %4 = vector.extract_strided_slice %3 {offsets = [0, 0], sizes = [64, 1], strides = [1, 1]} : vector<64x3xf32> to vector<64x1xf32>
    %5 = vector.broadcast %4 : vector<64x1xf32> to vector<64x128xf32>
    %6 = arith.addf %2, %5 : vector<64x128xf32>
    %cst_5 = arith.constant 0.000000e+00 : f32
    %7 = vector.broadcast %cst_5 : f32 to vector<64x128xf32>
    %8 = arith.cmpf oge, %6, %7 : vector<64x128xf32>
    %cst_6 = arith.constant 2.000000e-02 : f32
    %9 = vector.broadcast %cst_6 : f32 to vector<64x128xf32>
    %10 = arith.mulf %9, %6 : vector<64x128xf32>
    %11 = arith.select %8, %6, %10 : vector<64x128xi1>, vector<64x128xf32>
    %12 = vector.extract_strided_slice %3 {offsets = [0, 1], sizes = [64, 1], strides = [1, 1]} : vector<64x3xf32> to vector<64x1xf32>
    %13 = vector.broadcast %12 : vector<64x1xf32> to vector<64x128xf32>
    %14 = arith.mulf %11, %13 : vector<64x128xf32>
    %15 = vector.extract_strided_slice %3 {offsets = [0, 2], sizes = [64, 1], strides = [1, 1]} : vector<64x3xf32> to vector<64x1xf32>
    %16 = vector.broadcast %15 : vector<64x1xf32> to vector<64x128xf32>
    %17 = arith.addf %14, %16 : vector<64x128xf32>
    %18 = arith.truncf %17 : vector<64x128xf32> to vector<64x128xbf16>
    %c0_7 = arith.constant 0 : index
    %c0_8 = arith.constant 0 : index
    %19 = vector.load %arg4[%c0_7, %c0_8] : memref<64x128xbf16, #tpu.memory_space<vmem>>, vector<64x128xbf16>
    tpu.vector_store %arg4[%c0_7, %c0_8], %18 {strides = array<i32>} : memref<64x128xbf16, #tpu.memory_space<vmem>>, vector<64x128xbf16>,
    return
  }
  func.func @transform_0(%arg0: i32) -> (i32, i32) {
    %c0_i32 = arith.constant 0 : i32
    %c0_i32_0 = arith.constant 0 : i32
    %c0_i32_1 = arith.constant 0 : i32
    return %c0_i32, %c0_i32_0 : i32, i32
  }
  func.func @transform_1(%arg0: i32) -> (i32, i32) {
    %c0_i32 = arith.constant 0 : i32
    %c0_i32_0 = arith.constant 0 : i32
    return %c0_i32, %arg0 : i32, i32
  }
  func.func @transform_2(%arg0: i32) -> (i32, i32) {
    %c0_i32 = arith.constant 0 : i32
    %c0_i32_0 = arith.constant 0 : i32
    %c0_i32_1 = arith.constant 0 : i32
    return %c0_i32, %c0_i32_0 : i32, i32
  }
  func.func @transform_3(%arg0: i32) -> (i32, i32) {
    %c0_i32 = arith.constant 0 : i32
    %c0_i32_0 = arith.constant 0 : i32
    return %c0_i32, %arg0 : i32, i32
  }
}

module attributes {stable_mosaic.version = 11 : i64} {
  func.func @kernel(%arg0: i32, %arg1: memref<16x256xbf16, #tpu.memory_space<vmem>>, %arg2: memref<256x128xbf16, #tpu.memory_space<vmem>>, %arg3: memref<16x3xf32, #tpu.memory_space<vmem>>, %arg4: memref<16x128xbf16, #tpu.memory_space<vmem>>, %arg5: memref<16x128xbf16, #tpu.memory_space<vmem>>) attributes {dimension_semantics = [#tpu.dimension_semantics<parallel>], iteration_bounds = array<i64: 1>, scalar_prefetch = 0 : i64, scratch_operands = 0 : i64, tpu.core_type = #tpu.core_type<tc>, window_params = [{pipeline_mode = #tpu.pipeline_mode<synchronous>, transform_indices = @transform_0, window_bounds = array<i64: 16, 256>}, {transform_indices = @transform_1, window_bounds = array<i64: 256, 128>}, {pipeline_mode = #tpu.pipeline_mode<synchronous>, transform_indices = @transform_2, window_bounds = array<i64: 16, 3>}, {transform_indices = @transform_3, window_bounds = array<i64: 16, 128>}, {transform_indices = @transform_4, window_bounds = array<i64: 16, 128>}]} {
    %c0 = arith.constant 0 : index
    %c0_0 = arith.constant 0 : index
    %0 = vector.load %arg1[%c0, %c0_0] : memref<16x256xbf16, #tpu.memory_space<vmem>>, vector<16x256xbf16>
    %c0_1 = arith.constant 0 : index
    %c0_2 = arith.constant 0 : index
    %1 = vector.load %arg2[%c0_1, %c0_2] : memref<256x128xbf16, #tpu.memory_space<vmem>>, vector<256x128xbf16>
    %cst = arith.constant dense<0.000000e+00> : vector<16x128xf32>
    %2 = tpu.matmul %0, %1, %cst {dimension_numbers = #tpu.dot_dimension_numbers<[1], [0], [0], [1], [0, 0, 1, 1], [], []>} : vector<16x256xbf16>, vector<256x128xbf16>, vector<16x128xf32> -> vector<16x128xf32>
    %c0_3 = arith.constant 0 : index
    %c0_4 = arith.constant 0 : index
    %3 = vector.load %arg3[%c0_3, %c0_4] : memref<16x3xf32, #tpu.memory_space<vmem>>, vector<16x3xf32>
    %4 = vector.extract_strided_slice %3 {offsets = [0, 0], sizes = [16, 1], strides = [1, 1]} : vector<16x3xf32> to vector<16x1xf32>
    %5 = vector.broadcast %4 : vector<16x1xf32> to vector<16x128xf32>
    %6 = arith.addf %2, %5 : vector<16x128xf32>
    %cst_5 = arith.constant 0.000000e+00 : f32
    %7 = vector.broadcast %cst_5 : f32 to vector<16x128xf32>
    %8 = arith.cmpf oge, %6, %7 : vector<16x128xf32>
    %cst_6 = arith.constant 2.000000e-02 : f32
    %9 = vector.broadcast %cst_6 : f32 to vector<16x128xf32>
    %10 = arith.mulf %9, %6 : vector<16x128xf32>
    %11 = arith.select %8, %6, %10 : vector<16x128xi1>, vector<16x128xf32>
    %12 = vector.extract_strided_slice %3 {offsets = [0, 1], sizes = [16, 1], strides = [1, 1]} : vector<16x3xf32> to vector<16x1xf32>
    %13 = vector.broadcast %12 : vector<16x1xf32> to vector<16x128xf32>
    %14 = arith.mulf %11, %13 : vector<16x128xf32>
    %15 = vector.extract_strided_slice %3 {offsets = [0, 2], sizes = [16, 1], strides = [1, 1]} : vector<16x3xf32> to vector<16x1xf32>
    %16 = vector.broadcast %15 : vector<16x1xf32> to vector<16x128xf32>
    %17 = arith.addf %14, %16 : vector<16x128xf32>
    %c0_7 = arith.constant 0 : index
    %c0_8 = arith.constant 0 : index
    %18 = vector.load %arg4[%c0_7, %c0_8] : memref<16x128xbf16, #tpu.memory_space<vmem>>, vector<16x128xbf16>
    %19 = arith.extf %18 : vector<16x128xbf16> to vector<16x128xf32>
    %20 = arith.addf %17, %19 : vector<16x128xf32>
    %21 = arith.truncf %20 : vector<16x128xf32> to vector<16x128xbf16>
    %c0_9 = arith.constant 0 : index
    %c0_10 = arith.constant 0 : index
    %22 = vector.load %arg5[%c0_9, %c0_10] : memref<16x128xbf16, #tpu.memory_space<vmem>>, vector<16x128xbf16>
    tpu.vector_store %arg5[%c0_9, %c0_10], %21 {strides = array<i32>} : memref<16x128xbf16, #tpu.memory_space<vmem>>, vector<16x128xbf16>,
    return
  }
  func.func @transform_0(%arg0: i32) -> (i32, i32) {
    %c0_i32 = arith.constant 0 : i32
    %c0_i32_0 = arith.constant 0 : i32
    %c0_i32_1 = arith.constant 0 : i32
    return %c0_i32, %c0_i32_0 : i32, i32
  }
  func.func @transform_1(%arg0: i32) -> (i32, i32) {
    %c0_i32 = arith.constant 0 : i32
    %c0_i32_0 = arith.constant 0 : i32
    return %c0_i32, %arg0 : i32, i32
  }
  func.func @transform_2(%arg0: i32) -> (i32, i32) {
    %c0_i32 = arith.constant 0 : i32
    %c0_i32_0 = arith.constant 0 : i32
    %c0_i32_1 = arith.constant 0 : i32
    return %c0_i32, %c0_i32_0 : i32, i32
  }
  func.func @transform_3(%arg0: i32) -> (i32, i32) {
    %c0_i32 = arith.constant 0 : i32
    %c0_i32_0 = arith.constant 0 : i32
    return %c0_i32, %arg0 : i32, i32
  }
  func.func @transform_4(%arg0: i32) -> (i32, i32) {
    %c0_i32 = arith.constant 0 : i32
    %c0_i32_0 = arith.constant 0 : i32
    return %c0_i32, %arg0 : i32, i32
  }
}

module attributes {stable_mosaic.version = 11 : i64} {
  func.func @kernel(%arg0: i32, %arg1: memref<32x128xbf16, #tpu.memory_space<vmem>>, %arg2: memref<128x256xbf16, #tpu.memory_space<vmem>>, %arg3: memref<32x3xf32, #tpu.memory_space<vmem>>, %arg4: memref<32x256xbf16, #tpu.memory_space<vmem>>) attributes {dimension_semantics = [#tpu.dimension_semantics<parallel>], iteration_bounds = array<i64: 1>, scalar_prefetch = 0 : i64, scratch_operands = 0 : i64, tpu.core_type = #tpu.core_type<tc>, window_params = [{pipeline_mode = #tpu.pipeline_mode<synchronous>, transform_indices = @transform_0, window_bounds = array<i64: 32, 128>}, {transform_indices = @transform_1, window_bounds = array<i64: 128, 256>}, {pipeline_mode = #tpu.pipeline_mode<synchronous>, transform_indices = @transform_2, window_bounds = array<i64: 32, 3>}, {transform_indices = @transform_3, window_bounds = array<i64: 32, 256>}]} {
    %c0 = arith.constant 0 : index
    %c0_0 = arith.constant 0 : index
    %0 = vector.load %arg1[%c0, %c0_0] : memref<32x128xbf16, #tpu.memory_space<vmem>>, vector<32x128xbf16>
    %c0_1 = arith.constant 0 : index
    %c0_2 = arith.constant 0 : index
    %1 = vector.load %arg2[%c0_1, %c0_2] : memref<128x256xbf16, #tpu.memory_space<vmem>>, vector<128x256xbf16>
    %cst = arith.constant dense<0.000000e+00> : vector<32x256xf32>
    %2 = tpu.matmul %0, %1, %cst {dimension_numbers = #tpu.dot_dimension_numbers<[1], [0], [0], [1], [0, 0, 1, 1], [], []>} : vector<32x128xbf16>, vector<128x256xbf16>, vector<32x256xf32> -> vector<32x256xf32>
    %c0_3 = arith.constant 0 : index
    %c0_4 = arith.constant 0 : index
    %3 = vector.load %arg3[%c0_3, %c0_4] : memref<32x3xf32, #tpu.memory_space<vmem>>, vector<32x3xf32>
    %4 = vector.extract_strided_slice %3 {offsets = [0, 0], sizes = [32, 1], strides = [1, 1]} : vector<32x3xf32> to vector<32x1xf32>
    %5 = vector.broadcast %4 : vector<32x1xf32> to vector<32x256xf32>
    %6 = arith.addf %2, %5 : vector<32x256xf32>
    %cst_5 = arith.constant 0.000000e+00 : f32
    %7 = vector.broadcast %cst_5 : f32 to vector<32x256xf32>
    %8 = arith.cmpf oge, %6, %7 : vector<32x256xf32>
    %cst_6 = arith.constant 2.000000e-02 : f32
    %9 = vector.broadcast %cst_6 : f32 to vector<32x256xf32>
    %10 = arith.mulf %9, %6 : vector<32x256xf32>
    %11 = arith.select %8, %6, %10 : vector<32x256xi1>, vector<32x256xf32>
    %12 = vector.extract_strided_slice %3 {offsets = [0, 1], sizes = [32, 1], strides = [1, 1]} : vector<32x3xf32> to vector<32x1xf32>
    %13 = vector.broadcast %12 : vector<32x1xf32> to vector<32x256xf32>
    %14 = arith.mulf %11, %13 : vector<32x256xf32>
    %15 = vector.extract_strided_slice %3 {offsets = [0, 2], sizes = [32, 1], strides = [1, 1]} : vector<32x3xf32> to vector<32x1xf32>
    %16 = vector.broadcast %15 : vector<32x1xf32> to vector<32x256xf32>
    %17 = arith.addf %14, %16 : vector<32x256xf32>
    %18 = arith.truncf %17 : vector<32x256xf32> to vector<32x256xbf16>
    %c0_7 = arith.constant 0 : index
    %c0_8 = arith.constant 0 : index
    %19 = vector.load %arg4[%c0_7, %c0_8] : memref<32x256xbf16, #tpu.memory_space<vmem>>, vector<32x256xbf16>
    tpu.vector_store %arg4[%c0_7, %c0_8], %18 {strides = array<i32>} : memref<32x256xbf16, #tpu.memory_space<vmem>>, vector<32x256xbf16>,
    return
  }
  func.func @transform_0(%arg0: i32) -> (i32, i32) {
    %c0_i32 = arith.constant 0 : i32
    %c0_i32_0 = arith.constant 0 : i32
    %c0_i32_1 = arith.constant 0 : i32
    return %c0_i32, %c0_i32_0 : i32, i32
  }
  func.func @transform_1(%arg0: i32) -> (i32, i32) {
    %c0_i32 = arith.constant 0 : i32
    %c0_i32_0 = arith.constant 0 : i32
    return %c0_i32, %arg0 : i32, i32
  }
  func.func @transform_2(%arg0: i32) -> (i32, i32) {
    %c0_i32 = arith.constant 0 : i32
    %c0_i32_0 = arith.constant 0 : i32
    %c0_i32_1 = arith.constant 0 : i32
    return %c0_i32, %c0_i32_0 : i32, i32
  }
  func.func @transform_3(%arg0: i32) -> (i32, i32) {
    %c0_i32 = arith.constant 0 : i32
    %c0_i32_0 = arith.constant 0 : i32
    return %c0_i32, %arg0 : i32, i32
  }
}

module attributes {stable_mosaic.version = 11 : i64} {
  func.func @kernel(%arg0: i32, %arg1: memref<16x128xbf16, #tpu.memory_space<vmem>>, %arg2: memref<128x512xbf16, #tpu.memory_space<vmem>>, %arg3: memref<16x3xf32, #tpu.memory_space<vmem>>, %arg4: memref<16x512xbf16, #tpu.memory_space<vmem>>, %arg5: memref<16x512xbf16, #tpu.memory_space<vmem>>) attributes {dimension_semantics = [#tpu.dimension_semantics<parallel>], iteration_bounds = array<i64: 2>, scalar_prefetch = 0 : i64, scratch_operands = 0 : i64, tpu.core_type = #tpu.core_type<tc>, window_params = [{pipeline_mode = #tpu.pipeline_mode<synchronous>, transform_indices = @transform_0, window_bounds = array<i64: 16, 128>}, {transform_indices = @transform_1, window_bounds = array<i64: 128, 512>}, {pipeline_mode = #tpu.pipeline_mode<synchronous>, transform_indices = @transform_2, window_bounds = array<i64: 16, 3>}, {transform_indices = @transform_3, window_bounds = array<i64: 16, 512>}, {transform_indices = @transform_4, window_bounds = array<i64: 16, 512>}]} {
    %c0 = arith.constant 0 : index
    %c0_0 = arith.constant 0 : index
    %0 = vector.load %arg1[%c0, %c0_0] : memref<16x128xbf16, #tpu.memory_space<vmem>>, vector<16x128xbf16>
    %c0_1 = arith.constant 0 : index
    %c0_2 = arith.constant 0 : index
    %1 = vector.load %arg2[%c0_1, %c0_2] : memref<128x512xbf16, #tpu.memory_space<vmem>>, vector<128x512xbf16>
    %cst = arith.constant dense<0.000000e+00> : vector<16x512xf32>
    %2 = tpu.matmul %0, %1, %cst {dimension_numbers = #tpu.dot_dimension_numbers<[1], [0], [0], [1], [0, 0, 1, 1], [], []>} : vector<16x128xbf16>, vector<128x512xbf16>, vector<16x512xf32> -> vector<16x512xf32>
    %c0_3 = arith.constant 0 : index
    %c0_4 = arith.constant 0 : index
    %3 = vector.load %arg3[%c0_3, %c0_4] : memref<16x3xf32, #tpu.memory_space<vmem>>, vector<16x3xf32>
    %4 = vector.extract_strided_slice %3 {offsets = [0, 0], sizes = [16, 1], strides = [1, 1]} : vector<16x3xf32> to vector<16x1xf32>
    %5 = vector.broadcast %4 : vector<16x1xf32> to vector<16x512xf32>
    %6 = arith.addf %2, %5 : vector<16x512xf32>
    %cst_5 = arith.constant 0.000000e+00 : f32
    %7 = vector.broadcast %cst_5 : f32 to vector<16x512xf32>
    %8 = arith.cmpf oge, %6, %7 : vector<16x512xf32>
    %cst_6 = arith.constant 2.000000e-02 : f32
    %9 = vector.broadcast %cst_6 : f32 to vector<16x512xf32>
    %10 = arith.mulf %9, %6 : vector<16x512xf32>
    %11 = arith.select %8, %6, %10 : vector<16x512xi1>, vector<16x512xf32>
    %12 = vector.extract_strided_slice %3 {offsets = [0, 1], sizes = [16, 1], strides = [1, 1]} : vector<16x3xf32> to vector<16x1xf32>
    %13 = vector.broadcast %12 : vector<16x1xf32> to vector<16x512xf32>
    %14 = arith.mulf %11, %13 : vector<16x512xf32>
    %15 = vector.extract_strided_slice %3 {offsets = [0, 2], sizes = [16, 1], strides = [1, 1]} : vector<16x3xf32> to vector<16x1xf32>
    %16 = vector.broadcast %15 : vector<16x1xf32> to vector<16x512xf32>
    %17 = arith.addf %14, %16 : vector<16x512xf32>
    %c0_7 = arith.constant 0 : index
    %c0_8 = arith.constant 0 : index
    %18 = vector.load %arg4[%c0_7, %c0_8] : memref<16x512xbf16, #tpu.memory_space<vmem>>, vector<16x512xbf16>
    %19 = arith.extf %18 : vector<16x512xbf16> to vector<16x512xf32>
    %20 = arith.addf %17, %19 : vector<16x512xf32>
    %21 = arith.truncf %20 : vector<16x512xf32> to vector<16x512xbf16>
    %c0_9 = arith.constant 0 : index
    %c0_10 = arith.constant 0 : index
    %22 = vector.load %arg5[%c0_9, %c0_10] : memref<16x512xbf16, #tpu.memory_space<vmem>>, vector<16x512xbf16>
    tpu.vector_store %arg5[%c0_9, %c0_10], %21 {strides = array<i32>} : memref<16x512xbf16, #tpu.memory_space<vmem>>, vector<16x512xbf16>,
    return
  }
  func.func @transform_0(%arg0: i32) -> (i32, i32) {
    %c0_i32 = arith.constant 0 : i32
    %c0_i32_0 = arith.constant 0 : i32
    %c0_i32_1 = arith.constant 0 : i32
    return %c0_i32, %c0_i32_0 : i32, i32
  }
  func.func @transform_1(%arg0: i32) -> (i32, i32) {
    %c0_i32 = arith.constant 0 : i32
    %c0_i32_0 = arith.constant 0 : i32
    return %c0_i32, %arg0 : i32, i32
  }
  func.func @transform_2(%arg0: i32) -> (i32, i32) {
    %c0_i32 = arith.constant 0 : i32
    %c0_i32_0 = arith.constant 0 : i32
    %c0_i32_1 = arith.constant 0 : i32
    return %c0_i32, %c0_i32_0 : i32, i32
  }
  func.func @transform_3(%arg0: i32) -> (i32, i32) {
    %c0_i32 = arith.constant 0 : i32
    %c0_i32_0 = arith.constant 0 : i32
    return %c0_i32, %arg0 : i32, i32
  }
  func.func @transform_4(%arg0: i32) -> (i32, i32) {
    %c0_i32 = arith.constant 0 : i32
    %c0_i32_0 = arith.constant 0 : i32
    return %c0_i32, %arg0 : i32, i32
  }
}

module attributes {stable_mosaic.version = 11 : i64} {
  func.func @kernel(%arg0: i32, %arg1: memref<16x128xbf16, #tpu.memory_space<vmem>>, %arg2: memref<128x512xbf16, #tpu.memory_space<vmem>>, %arg3: memref<16x3xf32, #tpu.memory_space<vmem>>, %arg4: memref<16x512xbf16, #tpu.memory_space<vmem>>) attributes {dimension_semantics = [#tpu.dimension_semantics<parallel>], iteration_bounds = array<i64: 3>, scalar_prefetch = 0 : i64, scratch_operands = 0 : i64, tpu.core_type = #tpu.core_type<tc>, window_params = [{pipeline_mode = #tpu.pipeline_mode<synchronous>, transform_indices = @transform_0, window_bounds = array<i64: 16, 128>}, {transform_indices = @transform_1, window_bounds = array<i64: 128, 512>}, {pipeline_mode = #tpu.pipeline_mode<synchronous>, transform_indices = @transform_2, window_bounds = array<i64: 16, 3>}, {transform_indices = @transform_3, window_bounds = array<i64: 16, 512>}]} {
    %c0 = arith.constant 0 : index
    %c0_0 = arith.constant 0 : index
    %0 = vector.load %arg1[%c0, %c0_0] : memref<16x128xbf16, #tpu.memory_space<vmem>>, vector<16x128xbf16>
    %c0_1 = arith.constant 0 : index
    %c0_2 = arith.constant 0 : index
    %1 = vector.load %arg2[%c0_1, %c0_2] : memref<128x512xbf16, #tpu.memory_space<vmem>>, vector<128x512xbf16>
    %cst = arith.constant dense<0.000000e+00> : vector<16x512xf32>
    %2 = tpu.matmul %0, %1, %cst {dimension_numbers = #tpu.dot_dimension_numbers<[1], [0], [0], [1], [0, 0, 1, 1], [], []>} : vector<16x128xbf16>, vector<128x512xbf16>, vector<16x512xf32> -> vector<16x512xf32>
    %c0_3 = arith.constant 0 : index
    %c0_4 = arith.constant 0 : index
    %3 = vector.load %arg3[%c0_3, %c0_4] : memref<16x3xf32, #tpu.memory_space<vmem>>, vector<16x3xf32>
    %4 = vector.extract_strided_slice %3 {offsets = [0, 0], sizes = [16, 1], strides = [1, 1]} : vector<16x3xf32> to vector<16x1xf32>
    %5 = vector.broadcast %4 : vector<16x1xf32> to vector<16x512xf32>
    %6 = arith.addf %2, %5 : vector<16x512xf32>
    %cst_5 = arith.constant 0.000000e+00 : f32
    %7 = vector.broadcast %cst_5 : f32 to vector<16x512xf32>
    %8 = arith.cmpf oge, %6, %7 : vector<16x512xf32>
    %cst_6 = arith.constant 2.000000e-02 : f32
    %9 = vector.broadcast %cst_6 : f32 to vector<16x512xf32>
    %10 = arith.mulf %9, %6 : vector<16x512xf32>
    %11 = arith.select %8, %6, %10 : vector<16x512xi1>, vector<16x512xf32>
    %12 = vector.extract_strided_slice %3 {offsets = [0, 1], sizes = [16, 1], strides = [1, 1]} : vector<16x3xf32> to vector<16x1xf32>
    %13 = vector.broadcast %12 : vector<16x1xf32> to vector<16x512xf32>
    %14 = arith.mulf %11, %13 : vector<16x512xf32>
    %15 = vector.extract_strided_slice %3 {offsets = [0, 2], sizes = [16, 1], strides = [1, 1]} : vector<16x3xf32> to vector<16x1xf32>
    %16 = vector.broadcast %15 : vector<16x1xf32> to vector<16x512xf32>
    %17 = arith.addf %14, %16 : vector<16x512xf32>
    %18 = arith.truncf %17 : vector<16x512xf32> to vector<16x512xbf16>
    %c0_7 = arith.constant 0 : index
    %c0_8 = arith.constant 0 : index
    %19 = vector.load %arg4[%c0_7, %c0_8] : memref<16x512xbf16, #tpu.memory_space<vmem>>, vector<16x512xbf16>
    tpu.vector_store %arg4[%c0_7, %c0_8], %18 {strides = array<i32>} : memref<16x512xbf16, #tpu.memory_space<vmem>>, vector<16x512xbf16>,
    return
  }
  func.func @transform_0(%arg0: i32) -> (i32, i32) {
    %c0_i32 = arith.constant 0 : i32
    %c0_i32_0 = arith.constant 0 : i32
    %c0_i32_1 = arith.constant 0 : i32
    return %c0_i32, %c0_i32_0 : i32, i32
  }
  func.func @transform_1(%arg0: i32) -> (i32, i32) {
    %c0_i32 = arith.constant 0 : i32
    %c0_i32_0 = arith.constant 0 : i32
    return %c0_i32, %arg0 : i32, i32
  }
  func.func @transform_2(%arg0: i32) -> (i32, i32) {
    %c0_i32 = arith.constant 0 : i32
    %c0_i32_0 = arith.constant 0 : i32
    %c0_i32_1 = arith.constant 0 : i32
    return %c0_i32, %c0_i32_0 : i32, i32
  }
  func.func @transform_3(%arg0: i32) -> (i32, i32) {
    %c0_i32 = arith.constant 0 : i32
    %c0_i32_0 = arith.constant 0 : i32
    return %c0_i32, %arg0 : i32, i32
  }
}

module attributes {stable_mosaic.version = 11 : i64} {
  func.func @kernel(%arg0: i32, %arg1: memref<16x128xbf16, #tpu.memory_space<vmem>>, %arg2: memref<128x512xbf16, #tpu.memory_space<vmem>>, %arg3: memref<16x3xf32, #tpu.memory_space<vmem>>, %arg4: memref<16x512xbf16, #tpu.memory_space<vmem>>) attributes {dimension_semantics = [#tpu.dimension_semantics<parallel>], iteration_bounds = array<i64: 16>, scalar_prefetch = 0 : i64, scratch_operands = 0 : i64, tpu.core_type = #tpu.core_type<tc>, window_params = [{pipeline_mode = #tpu.pipeline_mode<synchronous>, transform_indices = @transform_0, window_bounds = array<i64: 16, 128>}, {transform_indices = @transform_1, window_bounds = array<i64: 128, 512>}, {pipeline_mode = #tpu.pipeline_mode<synchronous>, transform_indices = @transform_2, window_bounds = array<i64: 16, 3>}, {transform_indices = @transform_3, window_bounds = array<i64: 16, 512>}]} {
    %c0 = arith.constant 0 : index
    %c0_0 = arith.constant 0 : index
    %0 = vector.load %arg1[%c0, %c0_0] : memref<16x128xbf16, #tpu.memory_space<vmem>>, vector<16x128xbf16>
    %c0_1 = arith.constant 0 : index
    %c0_2 = arith.constant 0 : index
    %1 = vector.load %arg2[%c0_1, %c0_2] : memref<128x512xbf16, #tpu.memory_space<vmem>>, vector<128x512xbf16>
    %cst = arith.constant dense<0.000000e+00> : vector<16x512xf32>
    %2 = tpu.matmul %0, %1, %cst {dimension_numbers = #tpu.dot_dimension_numbers<[1], [0], [0], [1], [0, 0, 1, 1], [], []>} : vector<16x128xbf16>, vector<128x512xbf16>, vector<16x512xf32> -> vector<16x512xf32>
    %c0_3 = arith.constant 0 : index
    %c0_4 = arith.constant 0 : index
    %3 = vector.load %arg3[%c0_3, %c0_4] : memref<16x3xf32, #tpu.memory_space<vmem>>, vector<16x3xf32>
    %4 = vector.extract_strided_slice %3 {offsets = [0, 0], sizes = [16, 1], strides = [1, 1]} : vector<16x3xf32> to vector<16x1xf32>
    %5 = vector.broadcast %4 : vector<16x1xf32> to vector<16x512xf32>
    %6 = arith.addf %2, %5 : vector<16x512xf32>
    %cst_5 = arith.constant 0.000000e+00 : f32
    %7 = vector.broadcast %cst_5 : f32 to vector<16x512xf32>
    %8 = arith.cmpf oge, %6, %7 : vector<16x512xf32>
    %cst_6 = arith.constant 2.000000e-02 : f32
    %9 = vector.broadcast %cst_6 : f32 to vector<16x512xf32>
    %10 = arith.mulf %9, %6 : vector<16x512xf32>
    %11 = arith.select %8, %6, %10 : vector<16x512xi1>, vector<16x512xf32>
    %12 = vector.extract_strided_slice %3 {offsets = [0, 1], sizes = [16, 1], strides = [1, 1]} : vector<16x3xf32> to vector<16x1xf32>
    %13 = vector.broadcast %12 : vector<16x1xf32> to vector<16x512xf32>
    %14 = arith.mulf %11, %13 : vector<16x512xf32>
    %15 = vector.extract_strided_slice %3 {offsets = [0, 2], sizes = [16, 1], strides = [1, 1]} : vector<16x3xf32> to vector<16x1xf32>
    %16 = vector.broadcast %15 : vector<16x1xf32> to vector<16x512xf32>
    %17 = arith.addf %14, %16 : vector<16x512xf32>
    %18 = arith.truncf %17 : vector<16x512xf32> to vector<16x512xbf16>
    %c0_7 = arith.constant 0 : index
    %c0_8 = arith.constant 0 : index
    %19 = vector.load %arg4[%c0_7, %c0_8] : memref<16x512xbf16, #tpu.memory_space<vmem>>, vector<16x512xbf16>
    tpu.vector_store %arg4[%c0_7, %c0_8], %18 {strides = array<i32>} : memref<16x512xbf16, #tpu.memory_space<vmem>>, vector<16x512xbf16>,
    return
  }
  func.func @transform_0(%arg0: i32) -> (i32, i32) {
    %c0_i32 = arith.constant 0 : i32
    %c0_i32_0 = arith.constant 0 : i32
    %c0_i32_1 = arith.constant 0 : i32
    return %c0_i32, %c0_i32_0 : i32, i32
  }
  func.func @transform_1(%arg0: i32) -> (i32, i32) {
    %c0_i32 = arith.constant 0 : i32
    %c0_i32_0 = arith.constant 0 : i32
    return %c0_i32, %arg0 : i32, i32
  }
  func.func @transform_2(%arg0: i32) -> (i32, i32) {
    %c0_i32 = arith.constant 0 : i32
    %c0_i32_0 = arith.constant 0 : i32
    %c0_i32_1 = arith.constant 0 : i32
    return %c0_i32, %c0_i32_0 : i32, i32
  }
  func.func @transform_3(%arg0: i32) -> (i32, i32) {
    %c0_i32 = arith.constant 0 : i32
    %c0_i32_0 = arith.constant 0 : i32
    return %c0_i32, %arg0 : i32, i32
  }
}

module attributes {stable_mosaic.version = 11 : i64} {
  func.func @kernel(%arg0: i32, %arg1: memref<16x128xbf16, #tpu.memory_space<vmem>>, %arg2: memref<128x512xbf16, #tpu.memory_space<vmem>>, %arg3: memref<16x3xf32, #tpu.memory_space<vmem>>, %arg4: memref<16x512xf32, #tpu.memory_space<vmem>>) attributes {dimension_semantics = [#tpu.dimension_semantics<parallel>], iteration_bounds = array<i64: 16>, scalar_prefetch = 0 : i64, scratch_operands = 0 : i64, tpu.core_type = #tpu.core_type<tc>, window_params = [{pipeline_mode = #tpu.pipeline_mode<synchronous>, transform_indices = @transform_0, window_bounds = array<i64: 16, 128>}, {transform_indices = @transform_1, window_bounds = array<i64: 128, 512>}, {pipeline_mode = #tpu.pipeline_mode<synchronous>, transform_indices = @transform_2, window_bounds = array<i64: 16, 3>}, {transform_indices = @transform_3, window_bounds = array<i64: 16, 512>}]} {
    %c0 = arith.constant 0 : index
    %c0_0 = arith.constant 0 : index
    %0 = vector.load %arg1[%c0, %c0_0] : memref<16x128xbf16, #tpu.memory_space<vmem>>, vector<16x128xbf16>
    %c0_1 = arith.constant 0 : index
    %c0_2 = arith.constant 0 : index
    %1 = vector.load %arg2[%c0_1, %c0_2] : memref<128x512xbf16, #tpu.memory_space<vmem>>, vector<128x512xbf16>
    %cst = arith.constant dense<0.000000e+00> : vector<16x512xf32>
    %2 = tpu.matmul %0, %1, %cst {dimension_numbers = #tpu.dot_dimension_numbers<[1], [0], [0], [1], [0, 0, 1, 1], [], []>} : vector<16x128xbf16>, vector<128x512xbf16>, vector<16x512xf32> -> vector<16x512xf32>
    %c0_3 = arith.constant 0 : index
    %c0_4 = arith.constant 0 : index
    %3 = vector.load %arg3[%c0_3, %c0_4] : memref<16x3xf32, #tpu.memory_space<vmem>>, vector<16x3xf32>
    %4 = vector.extract_strided_slice %3 {offsets = [0, 0], sizes = [16, 1], strides = [1, 1]} : vector<16x3xf32> to vector<16x1xf32>
    %5 = vector.broadcast %4 : vector<16x1xf32> to vector<16x512xf32>
    %6 = arith.addf %2, %5 : vector<16x512xf32>
    %7 = arith.negf %6 : vector<16x512xf32>
    %8 = math.exp %7 : vector<16x512xf32>
    %cst_5 = arith.constant 1.000000e+00 : f32
    %9 = vector.broadcast %cst_5 : f32 to vector<16x512xf32>
    %10 = arith.addf %9, %8 : vector<16x512xf32>
    %11 = arith.divf %9, %10 : vector<16x512xf32>
    %12 = vector.extract_strided_slice %3 {offsets = [0, 1], sizes = [16, 1], strides = [1, 1]} : vector<16x3xf32> to vector<16x1xf32>
    %13 = vector.broadcast %12 : vector<16x1xf32> to vector<16x512xf32>
    %14 = arith.mulf %11, %13 : vector<16x512xf32>
    %15 = vector.extract_strided_slice %3 {offsets = [0, 2], sizes = [16, 1], strides = [1, 1]} : vector<16x3xf32> to vector<16x1xf32>
    %16 = vector.broadcast %15 : vector<16x1xf32> to vector<16x512xf32>
    %17 = arith.addf %14, %16 : vector<16x512xf32>
    %c0_6 = arith.constant 0 : index
    %c0_7 = arith.constant 0 : index
    %18 = vector.load %arg4[%c0_6, %c0_7] : memref<16x512xf32, #tpu.memory_space<vmem>>, vector<16x512xf32>
    tpu.vector_store %arg4[%c0_6, %c0_7], %17 {strides = array<i32>} : memref<16x512xf32, #tpu.memory_space<vmem>>, vector<16x512xf32>,
    return
  }
  func.func @transform_0(%arg0: i32) -> (i32, i32) {
    %c0_i32 = arith.constant 0 : i32
    %c0_i32_0 = arith.constant 0 : i32
    %c0_i32_1 = arith.constant 0 : i32
    return %c0_i32, %c0_i32_0 : i32, i32
  }
  func.func @transform_1(%arg0: i32) -> (i32, i32) {
    %c0_i32 = arith.constant 0 : i32
    %c0_i32_0 = arith.constant 0 : i32
    return %c0_i32, %arg0 : i32, i32
  }
  func.func @transform_2(%arg0: i32) -> (i32, i32) {
    %c0_i32 = arith.constant 0 : i32
    %c0_i32_0 = arith.constant 0 : i32
    %c0_i32_1 = arith.constant 0 : i32
    return %c0_i32, %c0_i32_0 : i32, i32
  }
  func.func @transform_3(%arg0: i32) -> (i32, i32) {
    %c0_i32 = arith.constant 0 : i32
    %c0_i32_0 = arith.constant 0 : i32
    return %c0_i32, %arg0 : i32, i32
  }
}

</mosaic_0001>

<bundles_post_ra>
// kernel: nowcasting_forward.24
= control target key start
LH: loop header
LB: loop body
LE: loop exit
PB: predicated region body
PF: predicated region fallthrough
CT: control target
= control target key end

     0   :  { %s930_s12 = smov 0   ;;  %s932_s13 = smov 0   ;;  %s1147_s0 = inlined_call_operand.vmem [shape: bf16[16,128], index: 0, kind: input, shape index: {}]   ;;  %s1148_s1 = inlined_call_operand.vmem [shape: bf16[128,1024], index: 1, kind: input, shape index: {}]   ;;  %s1149_s2 = inlined_call_operand.vmem [shape: f32[16,3], index: 2, kind: input, shape index: {}]   ;;  %s1150_s3 = inlined_call_operand.vmem [shape: bf16[16,1024], index: 3, kind: output, shape index: {}]  }
   0x1   :  { %s934_s14 = smov 0  }
   0x2 LB: > { %s670_s15 = sadd.s32 4294967295, %s905_s14   ;;  %s947_s16 = sadd.s32 1, %s905_s14   ;;  %s905_s14 = sphi %s934_s14, %s1154_s14   ;;  %s901_s13 = sphi %s932_s13, %s1153_s13   ;;  %s897_s12 = sphi %s930_s12, %s1152_s12  }
   0x3   : > { %s38_s17 = ssub.s32 %s905_s14, %s947_s16  ;;  %s41_s18 = sadd.s32 1, %s901_s13 }
   0x4   : > { %p39_p0 = scmp.eq.s32.totalorder %s38_s17, 0  ;;  %p48_p1 = scmp.ne.s32.totalorder %s901_s13, %s897_s12 }
   0x5   : > { %p49_p2 = scmp.eq.s32.totalorder %s905_s14, 0  ;;  %p99_p3 = scmp.eq.s32.totalorder %s670_s15, 1 }
   0x6   : > { %s958_s19 = scalar_select %p39_p0, %s901_s13, %s41_s18  }
   0x7   : > { %p50_p4 = por %p49_p2, %p48_p1  ;;  %p960_p5 = por %p99_p3, %p48_p1 }
   0x8   : > { %p673_p6 = scmp.ge.s32.totalorder %s905_s14, 2 }
   0xa   : > { %127 = sbr.rel (%p673_p6) target bundleno = 51 (0x33), region = 24 }
   0xf   : > { %130 = sbr.rel (!%p50_p4) target bundleno = 51 (0x33), region = 28  ;;  %s132_s21 = sand.u32 (%p50_p4), 1, %s901_s13  }
  0x10   : > { %s817_s22 = sshll.u32 (%p50_p4), %s905_s14, 4  ;;  %s674_s23 = sshll.u32 (%p50_p4), %s132_s21, 8 }
  0x11   : > { %s970_s26 = scalar_lea.vmem (%p50_p4), %s1148_s1, %s817_s22  ;;  %s975_s27 = scalar_lea.vmem (%p50_p4), [#allocation2], %s674_s23 }
  0x12   : > { %v150_v0 = vld [vmem:[%s970_s26] sm:$0xff] (%p50_p4)  ;;  %v152_v1 = vld [vmem:[%s970_s26 + $0x8] sm:$0xff] (%p50_p4) }
  0x13   : > { %v154_v2 = vld [vmem:[%s970_s26 + $0x20] sm:$0xff] (%p50_p4)  ;;  %151 = vst [vmem:[%s975_s27] sm:$0xff] (%p50_p4), %v150_v0  ;;  %v156_v3 = vld [vmem:[%s970_s26 + $0x28] sm:$0xff] (%p50_p4) }
  0x14   : > { %153 = vst [vmem:[%s975_s27 + $0x8] sm:$0xff] %v152_v1  ;;  %v158_v4 = vld [vmem:[%s970_s26 + $0x40] sm:$0xff]  ;;  %v160_v5 = vld [vmem:[%s970_s26 + $0x48] sm:$0xff] }
  0x15   : > { %155 = vst [vmem:[%s975_s27 + $0x10] sm:$0xff] %v154_v2  ;;  %v162_v6 = vld [vmem:[%s970_s26 + $0x60] sm:$0xff]  ;;  %v164_v7 = vld [vmem:[%s970_s26 + $0x68] sm:$0xff] }
  0x16   : > { %157 = vst [vmem:[%s975_s27 + $0x18] sm:$0xff] %v156_v3  ;;  %v166_v8 = vld [vmem:[%s970_s26 + $0x80] sm:$0xff]  ;;  %v168_v9 = vld [vmem:[%s970_s26 + $0x88] sm:$0xff] }
  0x17   : > { %159 = vst [vmem:[%s975_s27 + $0x20] sm:$0xff] %v158_v4  ;;  %v170_v10 = vld [vmem:[%s970_s26 + $0xa0] sm:$0xff]  ;;  %v172_v11 = vld [vmem:[%s970_s26 + $0xa8] sm:$0xff] }
  0x18   : > { %161 = vst [vmem:[%s975_s27 + $0x28] sm:$0xff] %v160_v5  ;;  %v174_v12 = vld [vmem:[%s970_s26 + $0xc0] sm:$0xff]  ;;  %v176_v13 = vld [vmem:[%s970_s26 + $0xc8] sm:$0xff] }
  0x19   : > { %163 = vst [vmem:[%s975_s27 + $0x30] sm:$0xff] %v162_v6  ;;  %v178_v14 = vld [vmem:[%s970_s26 + $0xe0] sm:$0xff]  ;;  %v180_v15 = vld [vmem:[%s970_s26 + $0xe8] sm:$0xff] }
  0x1a   : > { %165 = vst [vmem:[%s975_s27 + $0x38] sm:$0xff] %v164_v7  ;;  %v182_v16 = vld [vmem:[%s970_s26 + $0x100] sm:$0xff]  ;;  %v184_v17 = vld [vmem:[%s970_s26 + $0x108] sm:$0xff] }
  0x1b   : > { %167 = vst [vmem:[%s975_s27 + $0x40] sm:$0xff] %v166_v8  ;;  %v186_v18 = vld [vmem:[%s970_s26 + $0x120] sm:$0xff]  ;;  %v188_v19 = vld [vmem:[%s970_s26 + $0x128] sm:$0xff] }
  0x1c   : > { %169 = vst [vmem:[%s975_s27 + $0x48] sm:$0xff] %v168_v9  ;;  %v190_v20 = vld [vmem:[%s970_s26 + $0x140] sm:$0xff]  ;;  %v192_v21 = vld [vmem:[%s970_s26 + $0x148] sm:$0xff] }
  0x1d   : > { %171 = vst [vmem:[%s975_s27 + $0x50] sm:$0xff] %v170_v10  ;;  %v194_v22 = vld [vmem:[%s970_s26 + $0x160] sm:$0xff]  ;;  %v196_v23 = vld [vmem:[%s970_s26 + $0x168] sm:$0xff] }
  0x1e   : > { %173 = vst [vmem:[%s975_s27 + $0x58] sm:$0xff] %v172_v11  ;;  %v198_v24 = vld [vmem:[%s970_s26 + $0x180] sm:$0xff]  ;;  %v200_v25 = vld [vmem:[%s970_s26 + $0x188] sm:$0xff] }
  0x1f   : > { %175 = vst [vmem:[%s975_s27 + $0x60] sm:$0xff] %v174_v12  ;;  %v202_v26 = vld [vmem:[%s970_s26 + $0x1a0] sm:$0xff]  ;;  %v204_v27 = vld [vmem:[%s970_s26 + $0x1a8] sm:$0xff] }
  0x20   : > { %177 = vst [vmem:[%s975_s27 + $0x68] sm:$0xff] %v176_v13  ;;  %v206_v28 = vld [vmem:[%s970_s26 + $0x1c0] sm:$0xff]  ;;  %v208_v29 = vld [vmem:[%s970_s26 + $0x1c8] sm:$0xff] }
  0x21   : > { %179 = vst [vmem:[%s975_s27 + $0x70] sm:$0xff] %v178_v14  ;;  %v210_v30 = vld [vmem:[%s970_s26 + $0x1e0] sm:$0xff]  ;;  %v212_v31 = vld [vmem:[%s970_s26 + $0x1e8] sm:$0xff] }
  0x22   : > { %181 = vst [vmem:[%s975_s27 + $0x78] sm:$0xff] %v180_v15 }
  0x23   : > { %183 = vst [vmem:[%s975_s27 + $0x80] sm:$0xff] %v182_v16 }
  0x24   : > { %185 = vst [vmem:[%s975_s27 + $0x88] sm:$0xff] %v184_v17 }
  0x25   : > { %187 = vst [vmem:[%s975_s27 + $0x90] sm:$0xff] %v186_v18 }
  0x26   : > { %189 = vst [vmem:[%s975_s27 + $0x98] sm:$0xff] %v188_v19 }
  0x27   : > { %191 = vst [vmem:[%s975_s27 + $0xa0] sm:$0xff] %v190_v20 }
  0x28   : > { %193 = vst [vmem:[%s975_s27 + $0xa8] sm:$0xff] %v192_v21 }
  0x29   : > { %195 = vst [vmem:[%s975_s27 + $0xb0] sm:$0xff] %v194_v22 }
  0x2a   : > { %197 = vst [vmem:[%s975_s27 + $0xb8] sm:$0xff] %v196_v23 }
  0x2b   : > { %199 = vst [vmem:[%s975_s27 + $0xc0] sm:$0xff] %v198_v24 }
  0x2c   : > { %201 = vst [vmem:[%s975_s27 + $0xc8] sm:$0xff] %v200_v25 }
  0x2d   : > { %203 = vst [vmem:[%s975_s27 + $0xd0] sm:$0xff] %v202_v26 }
  0x2e   : > { %205 = vst [vmem:[%s975_s27 + $0xd8] sm:$0xff] %v204_v27 }
  0x2f   : > { %207 = vst [vmem:[%s975_s27 + $0xe0] sm:$0xff] %v206_v28 }
  0x30   : > { %209 = vst [vmem:[%s975_s27 + $0xe8] sm:$0xff] %v208_v29 }
  0x31   : > { %211 = vst [vmem:[%s975_s27 + $0xf0] sm:$0xff] %v210_v30 }
  0x32   : > { %213 = vst [vmem:[%s975_s27 + $0xf8] sm:$0xff] %v212_v31 }
  0x33 PF: > { %p677_p7 = scmp.ge.s32.totalorder %s905_s14, 1  ;;  %p218_p8 = scmp.lt.s32.totalorder %s905_s14, 3 }
  0x35   : > { %p219_p9 = pnand %p677_p7, %p218_p8 }
  0x36   : > { %s225_s28 = sand.u32 (!%p219_p9), 1, %s897_s12  }
  0x37   : > { %222 = sbr.rel (%p219_p9) target bundleno = 256 (0x100), region = 51  ;;  %s678_s29 = sshll.u32 (!%p219_p9), %s225_s28, 8 }
  0x38   : > { %s1043_s30 = scalar_lea.vmem (!%p219_p9), [#allocation2], %s678_s29  ;;  %s679_s10 = sshll.u32 (!%p219_p9), %s225_s28, 5 }
  0x39   : > { %s1120_s11 = scalar_lea.vmem (!%p219_p9), [#allocation3], %s679_s10 }
  0x3c   : > { %v798_v32 = vld [vmem:[%s1043_s30 + $0xe0] sm:$0xf]  ;;  %v849_v33 = vld [vmem:[%s1043_s30 + $0xec] sm:$0xf0]  ;;  %v847_v34 = vld [vmem:[%s1043_s30 + $0xe4] sm:$0xf] }
  0x3d   : > { %v799_v35 = vor.u32 %v849_v33, %v798_v32  ;;  %v800_v36 = vld [vmem:[%s1043_s30 + $0xf0] sm:$0xf0]  ;;  %v806_v37 = vld [vmem:[%s1043_s30 + $0xe8] sm:$0xf]  ;;  %v850_v38 = vld [vmem:[%s1043_s30 + $0xf4] sm:$0xf0] }
  0x3e   : > { %v803_v39 = vor.u32 %v847_v34, %v800_v36  ;;  %v807_v40 = vor.u32 %v850_v38, %v806_v37  ;;  %v848_v41 = vld [vmem:[%s1043_s30 + $0xec] sm:$0xf]  ;;  %v808_v42 = vld [vmem:[%s1043_s30 + $0xf8] sm:$0xf0]  ;;  %v782_v43 = vld [vmem:[%s1043_s30 + $0xc0] sm:$0xf] }
  0x3f   : > { %461 = vmatpush.bf16.msra.mxu0 %v799_v35  ;;  %v811_v44 = vor.u32 %v848_v41, %v808_v42  ;;  %v845_v45 = vld [vmem:[%s1043_s30 + $0xcc] sm:$0xf0]  ;;  %v843_v46 = vld [vmem:[%s1043_s30 + $0xc4] sm:$0xf]  ;;  %v784_v47 = vld [vmem:[%s1043_s30 + $0xd0] sm:$0xf0] }
  0x40   : > { %475 = vmatpush.bf16.msra.mxu1 %v803_v39  ;;  %489 = vmatpush.bf16.msra.mxu2 %v807_v40  ;;  %v783_v48 = vor.u32 %v845_v45, %v782_v43  ;;  %v787_v49 = vor.u32 %v843_v46, %v784_v47  ;;  %v790_v50 = vld [vmem:[%s1043_s30 + $0xc8] sm:$0xf]  ;;  %v846_v51 = vld [vmem:[%s1043_s30 + $0xd4] sm:$0xf0]  ;;  %v844_v52 = vld [vmem:[%s1043_s30 + $0xcc] sm:$0xf] }
  0x41   : > { %503 = vmatpush.bf16.msra.mxu3 %v811_v44  ;;  %v791_v53 = vor.u32 %v846_v51, %v790_v50  ;;  %v792_v54 = vld [vmem:[%s1043_s30 + $0xd8] sm:$0xf0]  ;;  %v766_v55 = vld [vmem:[%s1043_s30 + $0xa0] sm:$0xf]  ;;  %v841_v56 = vld [vmem:[%s1043_s30 + $0xac] sm:$0xf0] }
  0x42   : > { %v795_v57 = vor.u32 %v844_v52, %v792_v54  ;;  %v839_v58 = vld [vmem:[%s1043_s30 + $0xa4] sm:$0xf]  ;;  %v768_v59 = vld [vmem:[%s1043_s30 + $0xb0] sm:$0xf0]  ;;  %v774_v60 = vld [vmem:[%s1043_s30 + $0xa8] sm:$0xf]  ;;  %v767_v61 = vor.u32 %v841_v56, %v766_v55 }
  0x43   : > { %462 = vmatpush.bf16.msra.mxu0 %v783_v48  ;;  %v842_v62 = vld [vmem:[%s1043_s30 + $0xb4] sm:$0xf0]  ;;  %v840_v63 = vld [vmem:[%s1043_s30 + $0xac] sm:$0xf]  ;;  %v776_v0 = vld [vmem:[%s1043_s30 + $0xb8] sm:$0xf0]  ;;  %v771_v1 = vor.u32 %v839_v58, %v768_v59 }
  0x44   : > { %476 = vmatpush.bf16.msra.mxu1 %v787_v49  ;;  %490 = vmatpush.bf16.msra.mxu2 %v791_v53  ;;  %v775_v2 = vor.u32 %v842_v62, %v774_v60  ;;  %v750_v3 = vld [vmem:[%s1043_s30 + $0x80] sm:$0xf]  ;;  %v837_v4 = vld [vmem:[%s1043_s30 + $0x8c] sm:$0xf0]  ;;  %v835_v5 = vld [vmem:[%s1043_s30 + $0x84] sm:$0xf]  ;;  %v779_v6 = vor.u32 %v840_v63, %v776_v0 }
  0x45   : > { %504 = vmatpush.bf16.msra.mxu3 %v795_v57  ;;  %v752_v7 = vld [vmem:[%s1043_s30 + $0x90] sm:$0xf0]  ;;  %v758_v8 = vld [vmem:[%s1043_s30 + $0x88] sm:$0xf]  ;;  %v838_v9 = vld [vmem:[%s1043_s30 + $0x94] sm:$0xf0]  ;;  %v751_v12 = vor.u32 %v837_v4, %v750_v3 }
  0x46   : > { %v836_v10 = vld [vmem:[%s1043_s30 + $0x8c] sm:$0xf]  ;;  %v760_v11 = vld [vmem:[%s1043_s30 + $0x98] sm:$0xf0]  ;;  %v755_v13 = vor.u32 %v835_v5, %v752_v7  ;;  %v759_v14 = vor.u32 %v838_v9, %v758_v8  ;;  %v734_v15 = vld [vmem:[%s1043_s30 + $0x60] sm:$0xf] }
  0x47   : > { %463 = vmatpush.bf16.msra.mxu0 %v767_v61  ;;  %v833_v16 = vld [vmem:[%s1043_s30 + $0x6c] sm:$0xf0]  ;;  %v831_v17 = vld [vmem:[%s1043_s30 + $0x64] sm:$0xf]  ;;  %v763_v18 = vor.u32 %v836_v10, %v760_v11  ;;  %v736_v19 = vld [vmem:[%s1043_s30 + $0x70] sm:$0xf0] }
  0x48   : > { %477 = vmatpush.bf16.msra.mxu1 %v771_v1  ;;  %491 = vmatpush.bf16.msra.mxu2 %v775_v2  ;;  %v742_v20 = vld [vmem:[%s1043_s30 + $0x68] sm:$0xf]  ;;  %v834_v21 = vld [vmem:[%s1043_s30 + $0x74] sm:$0xf0]  ;;  %v832_v22 = vld [vmem:[%s1043_s30 + $0x6c] sm:$0xf]  ;;  %v735_v24 = vor.u32 %v833_v16, %v734_v15  ;;  %v739_v25 = vor.u32 %v831_v17, %v736_v19 }
  0x49   : > { %505 = vmatpush.bf16.msra.mxu3 %v779_v6  ;;  %v744_v23 = vld [vmem:[%s1043_s30 + $0x78] sm:$0xf0]  ;;  %v743_v26 = vor.u32 %v834_v21, %v742_v20  ;;  %v718_v27 = vld [vmem:[%s1043_s30 + $0x40] sm:$0xf]  ;;  %v829_v28 = vld [vmem:[%s1043_s30 + $0x4c] sm:$0xf0] }
  0x4a   : > { %v827_v29 = vld [vmem:[%s1043_s30 + $0x44] sm:$0xf]  ;;  %v747_v30 = vor.u32 %v832_v22, %v744_v23  ;;  %v720_v31 = vld [vmem:[%s1043_s30 + $0x50] sm:$0xf0]  ;;  %v726_v32 = vld [vmem:[%s1043_s30 + $0x48] sm:$0xf]  ;;  %v719_v36 = vor.u32 %v829_v28, %v718_v27 }
  0x4b   : > { %464 = vmatpush.bf16.msra.mxu0 %v751_v12  ;;  %v830_v33 = vld [vmem:[%s1043_s30 + $0x54] sm:$0xf0]  ;;  %v828_v34 = vld [vmem:[%s1043_s30 + $0x4c] sm:$0xf]  ;;  %v728_v35 = vld [vmem:[%s1043_s30 + $0x58] sm:$0xf0]  ;;  %v723_v39 = vor.u32 %v827_v29, %v720_v31 }
  0x4c   : > { %478 = vmatpush.bf16.msra.mxu1 %v755_v13  ;;  %492 = vmatpush.bf16.msra.mxu2 %v759_v14  ;;  %v702_v37 = vld [vmem:[%s1043_s30 + $0x20] sm:$0xf]  ;;  %v825_v38 = vld [vmem:[%s1043_s30 + $0x2c] sm:$0xf0]  ;;  %v727_v40 = vor.u32 %v830_v33, %v726_v32  ;;  %v823_v41 = vld [vmem:[%s1043_s30 + $0x24] sm:$0xf]  ;;  %v731_v44 = vor.u32 %v828_v34, %v728_v35 }
  0x4d   : > { %506 = vmatpush.bf16.msra.mxu3 %v763_v18  ;;  %v704_v42 = vld [vmem:[%s1043_s30 + $0x30] sm:$0xf0]  ;;  %v710_v43 = vld [vmem:[%s1043_s30 + $0x28] sm:$0xf]  ;;  %v826_v45 = vld [vmem:[%s1043_s30 + $0x34] sm:$0xf0]  ;;  %v703_v51 = vor.u32 %v825_v38, %v702_v37 }
  0x4e   : > { %v283_v46 = vld [vmem:[%s1149_s2] sm:$0xff]  ;;  %v824_v47 = vld [vmem:[%s1043_s30 + $0x2c] sm:$0xf]  ;;  %v712_v48 = vld [vmem:[%s1043_s30 + $0x38] sm:$0xf0]  ;;  %v907_v49 = vmov 0   ;;  %v707_v52 = vor.u32 %v823_v41, %v704_v42  ;;  %v711_v53 = vor.u32 %v826_v45, %v710_v43 }
  0x4f   : > { %465 = vmatpush.bf16.msra.mxu0 %v735_v24  ;;  %879 = vset.pattern.permute.xlu0 %v907_v49  ;;  %v908_v50 = vmov 1   ;;  %v686_v54 = vld [vmem:[%s1043_s30] sm:$0xf]  ;;  %v821_v55 = vld [vmem:[%s1043_s30 + $0xc] sm:$0xf0]  ;;  %v715_v57 = vor.u32 %v824_v47, %v712_v48  ;;  %v909_v63 = vmov 2  }
  0x50   : > { %479 = vmatpush.bf16.msra.mxu1 %v739_v25  ;;  %493 = vmatpush.bf16.msra.mxu2 %v743_v26  ;;  %v819_v56 = vld [vmem:[%s1043_s30 + $0x4] sm:$0xf]  ;;  %v688_v58 = vld [vmem:[%s1043_s30 + $0x10] sm:$0xf0]  ;;  %v694_v59 = vld [vmem:[%s1043_s30 + $0x8] sm:$0xf]  ;;  %v687_v0 = vor.u32 %v821_v55, %v686_v54 }
  0x51   : > { %507 = vmatpush.bf16.msra.mxu3 %v747_v30  ;;  %880 = vset.pattern.permute.xlu1 %v908_v50  ;;  %v822_v60 = vld [vmem:[%s1043_s30 + $0x14] sm:$0xf0]  ;;  %v820_v61 = vld [vmem:[%s1043_s30 + $0xc] sm:$0xf]  ;;  %v696_v62 = vld [vmem:[%s1043_s30 + $0x18] sm:$0xf0]  ;;  %v691_v1 = vor.u32 %v819_v56, %v688_v58 }
  0x52   : > { %287 = vperm.xlu0 %879, %v283_v46   ;;  %542 = vperm.xlu1 %880, %v283_v46   ;;  %v695_v2 = vor.u32 %v822_v60, %v694_v59  ;;  %v284_v3 = vld [vmem:[%s1149_s2 + $0x8] sm:$0xff]  ;;  %v699_v4 = vor.u32 %v820_v61, %v696_v62  ;;  %v818_v5 = vld [vmem:[%s1147_s0] sm:$0xff]  ;;  %s851_s12 = sshll.u32 (%p960_p5), %s670_s15, 4 }
  0x53   : > { %466 = vmatpush.bf16.msra.mxu0 %v719_v36  ;;  %881 = vset.pattern.permute.xlu2 %v909_v63  ;;  %s590_s21 = scalar_lea.vmem (%p960_p5), %s1150_s3, %s851_s12 }
  0x54   : > { %480 = vmatpush.bf16.msra.mxu1 %v723_v39  ;;  %494 = vmatpush.bf16.msra.mxu2 %v727_v40 }
  0x55   : > { %508 = vmatpush.bf16.msra.mxu3 %v731_v44  ;;  %558 = vperm.xlu2 %881, %v283_v46  }
  0x57   : > { %467 = vmatpush.bf16.msra.mxu0 %v703_v51 }
  0x58   : > { %481 = vmatpush.bf16.msra.mxu1 %v707_v52  ;;  %495 = vmatpush.bf16.msra.mxu2 %v711_v53 }
  0x59   : > { %509 = vmatpush.bf16.msra.mxu3 %v715_v57 }
  0x5a   : > { %292 = vperm.xlu0 %879, %v284_v3   ;;  %546 = vperm.xlu1 %880, %v284_v3  }
  0x5b   : > { %468 = vmatpush.bf16.msra.mxu0 %v687_v0 }
  0x5c   : > { %482 = vmatpush.bf16.msra.mxu1 %v691_v1  ;;  %496 = vmatpush.bf16.msra.mxu2 %v695_v2 }
  0x5d   : > { %510 = vmatpush.bf16.msra.mxu3 %v699_v4  ;;  %562 = vperm.xlu2 %881, %v284_v3  }
  0x5e   : > { %469 = vmatmul.bf16.vlgmr.msra.gmra.mxu0 %v818_v5 }
  0x5f   : > { %483 = vmatmul.bf16.vlgmr.msra.gmra.mxu1 %v818_v5  ;;  %497 = vmatmul.bf16.vlgmr.msra.gmra.mxu2 %v818_v5 }
  0x60   : > { %511 = vmatmul.bf16.vlgmr.msra.gmra.mxu3 %v818_v5 }
  0x62   : > { %882 = vset.pattern.permute.xlu0 %v909_v63 }
  0xaf   : > { %v559_v17 = vpop.permute.xlu2 %558 }
  0xb7   : > { %v563_v47 = vpop.permute.xlu2 %562 }
  0xc4   : > { %v288_v6 = vpop.permute.xlu0 %287  ;;  %v543_v13 = vpop.permute.xlu1 %542 }
  0xcc   : > { %v293_v19 = vpop.permute.xlu0 %292  ;;  %v547_v39 = vpop.permute.xlu1 %546 }
  0xdb   : > { %v470_v7 = vpop.f32.mrf.mxu0 }
  0xdc   : > { %v471_v8 = vadd.f32 %v470_v7, %v288_v6  ;;  %v484_v9 = vpop.f32.mrf.mxu1 }
  0xdd   : > { %v485_v10 = vadd.f32 %v484_v9, %v288_v6 }
  0xde   : > { %vm517_vm0 = vcmp.ge.f32.partialorder %v471_v8, 0.0  ;;  %v525_v11 = vmul.f32 0.02, %v471_v8 }
  0xdf   : > { %vm518_vm1 = vcmp.ge.f32.partialorder %v485_v10, 0.0  ;;  %v526_v12 = vmul.f32 0.02, %v485_v10 }
  0xe0   : > { %v533_v14 = vsel %vm517_vm0, %v471_v8, %v525_v11 }
  0xe1   : > { %v534_v15 = vsel %vm518_vm1, %v485_v10, %v526_v12  ;;  %v549_v16 = vmul.f32 %v543_v13, %v533_v14 }
  0xe2   : > { %v550_v18 = vmul.f32 %v543_v13, %v534_v15  ;;  %v498_v20 = vpop.f32.mrf.mxu2 }
  0xe3   : > { %v565_v21 = vadd.f32 %v559_v17, %v549_v16  ;;  %v499_v22 = vadd.f32 %v498_v20, %v288_v6  ;;  %v512_v23 = vpop.f32.mrf.mxu3  ;;  %v472_v24 = vpop.f32.mrf.mxu0 }
  0xe4   : > { %v566_v25 = vadd.f32 %v559_v17, %v550_v18  ;;  %v513_v26 = vadd.f32 %v512_v23, %v288_v6  ;;  %v473_v27 = vadd.f32 %v472_v24, %v293_v19  ;;  %v486_v28 = vpop.f32.mrf.mxu1 }
  0xe5   : > { %vm519_vm2 = vcmp.ge.f32.partialorder %v499_v22, 0.0  ;;  %v527_v29 = vmul.f32 0.02, %v499_v22  ;;  %v487_v30 = vadd.f32 %v486_v28, %v293_v19 }
  0xe6   : > { %v573_v31 = vpack.c.bf16 %v566_v25, %v565_v21  ;;  %vm520_vm3 = vcmp.ge.f32.partialorder %v513_v26, 0.0  ;;  %v528_v32 = vmul.f32 0.02, %v513_v26  ;;  %vm521_vm4 = vcmp.ge.f32.partialorder %v473_v27, 0.0 }
  0xe7   : > { %v535_v33 = vsel %vm519_vm2, %v499_v22, %v527_v29  ;;  %v529_v34 = vmul.f32 0.02, %v473_v27  ;;  %vm522_vm5 = vcmp.ge.f32.partialorder %v487_v30, 0.0  ;;  %v530_v35 = vmul.f32 0.02, %v487_v30 }
  0xe8   : > { %577 = vst [vmem:[%s1120_s11] sm:$0xff] %v573_v31  ;;  %v551_v36 = vmul.f32 %v543_v13, %v535_v33  ;;  %v536_v37 = vsel %vm520_vm3, %v513_v26, %v528_v32 }
  0xe9   : > { %v552_v38 = vmul.f32 %v543_v13, %v536_v37  ;;  %v537_v40 = vsel %vm521_vm4, %v473_v27, %v529_v34  ;;  %v538_v41 = vsel %vm522_vm5, %v487_v30, %v530_v35 }
  0xea   : > { %v567_v42 = vadd.f32 %v559_v17, %v551_v36  ;;  %v553_v43 = vmul.f32 %v547_v39, %v537_v40  ;;  %v554_v44 = vmul.f32 %v547_v39, %v538_v41  ;;  %v500_v45 = vpop.f32.mrf.mxu2 }
  0xeb   : > { %v568_v46 = vadd.f32 %v559_v17, %v552_v38  ;;  %v501_v48 = vadd.f32 %v500_v45, %v293_v19  ;;  %v514_v49 = vpop.f32.mrf.mxu3 }
  0xec   : > { %v569_v50 = vadd.f32 %v563_v47, %v553_v43  ;;  %v570_v51 = vadd.f32 %v563_v47, %v554_v44  ;;  %v515_v52 = vadd.f32 %v514_v49, %v293_v19 }
  0xed   : > { %v574_v53 = vpack.c.bf16 %v568_v46, %v567_v42  ;;  %vm523_vm6 = vcmp.ge.f32.partialorder %v501_v48, 0.0  ;;  %v531_v54 = vmul.f32 0.02, %v501_v48 }
  0xee   : > { %v575_v55 = vpack.c.bf16 %v570_v51, %v569_v50  ;;  %vm524_vm7 = vcmp.ge.f32.partialorder %v515_v52, 0.0  ;;  %v532_v56 = vmul.f32 0.02, %v515_v52 }
  0xef   : > { %578 = vst [vmem:[%s1120_s11 + $0x8] sm:$0xff] %v574_v53  ;;  %v539_v57 = vsel %vm523_vm6, %v501_v48, %v531_v54  ;;  %v603_v0 = vld [vmem:[%s1120_s11] sm:$0xff] (%p960_p5) }
  0xf0   : > { %579 = vst [vmem:[%s1120_s11 + $0x10] sm:$0xff] %v575_v55  ;;  %v555_v58 = vmul.f32 %v547_v39, %v539_v57  ;;  %v540_v59 = vsel %vm524_vm7, %v515_v52, %v532_v56 }
  0xf1   : > { %v556_v60 = vmul.f32 %v547_v39, %v540_v59  ;;  %604 = vst [vmem:[%s590_s21] sm:$0xff] (%p960_p5), %v603_v0 }
  0xf2   : > { %v571_v61 = vadd.f32 %v563_v47, %v555_v58 }
  0xf3   : > { %v572_v62 = vadd.f32 %v563_v47, %v556_v60  ;;  %587 = sbr.rel (!%p960_p5) target bundleno = 256 (0x100), region = 59 }
  0xf5   : > { %v576_v63 = vpack.c.bf16 %v572_v62, %v571_v61 }
  0xf6   : > { %v605_v1 = vld [vmem:[%s1120_s11 + $0x8] sm:$0xff] (%p960_p5) }
  0xf7   : > { %580 = vst [vmem:[%s1120_s11 + $0x18] sm:$0xff] %v576_v63  ;;  %v607_v2 = vld [vmem:[%s1120_s11 + $0x10] sm:$0xff] (%p960_p5) }
  0xf8   : > { %606 = vst [vmem:[%s590_s21 + $0x8] sm:$0xff] %v605_v1 }
  0xf9   : > { %608 = vst [vmem:[%s590_s21 + $0x20] sm:$0xff] %v607_v2 }
  0xfe   : > { %v609_v3 = vld [vmem:[%s1120_s11 + $0x18] sm:$0xff] }
  0xff   : > { %610 = vst [vmem:[%s590_s21 + $0x28] sm:$0xff] %v609_v3 }
 0x100 PF: > { %p10_p10 = scmp.ge.s32.totalorder %s947_s16, 4   ;;  %s1152_s12 = smov %s901_s13 }
 0x101   : > { %s1153_s13 = smov %s958_s19  ;;  %s1154_s14 = smov %s947_s16 }
 0x102   :  { %12 = sbr.rel (!%p10_p10) target bundleno = 2 (0x2), region = 113 }

// kernel: nowcasting_forward.27
= control target key start
LH: loop header
LB: loop body
LE: loop exit
PB: predicated region body
PF: predicated region fallthrough
CT: control target
= control target key end

     0   :  { %v330_v4 = vmov 0   ;;  %v331_v5 = vmov 1   ;;  %v332_v6 = vmov 2   ;;  %s422_s1 = inlined_call_operand.vmem [shape: bf16[256,128], index: 1, kind: input, shape index: {}]   ;;  %s423_s2 = inlined_call_operand.vmem [shape: f32[16,3], index: 2, kind: input, shape index: {}]   ;;  %s424_s0 = inlined_call_operand.vmem [shape: bf16[16,256], index: 0, kind: input, shape index: {}]   ;;  %s425_s3 = inlined_call_operand.vmem [shape: bf16[16,128], index: 3, kind: output, shape index: {}]  }
   0x1   :  { %v309_v0 = vld [vmem:[%s422_s1 + $0x38] sm:$0xff]  ;;  %v308_v2 = vld [vmem:[%s422_s1 + $0x30] sm:$0xff]  ;;  %326 = vset.pattern.permute.xlu0 %v330_v4  ;;  %327 = vset.pattern.permute.xlu1 %v331_v5  ;;  %v307_v7 = vld [vmem:[%s422_s1 + $0x28] sm:$0xff] }
   0x2   :  { %v317_v1 = vld [vmem:[%s422_s1 + $0x78] sm:$0xff]  ;;  %166 = vmatpush.bf16.msra.mxu0 %v309_v0  ;;  %v316_v3 = vld [vmem:[%s422_s1 + $0x70] sm:$0xff]  ;;  %328 = vset.pattern.permute.xlu2 %v332_v6  ;;  %v315_v8 = vld [vmem:[%s422_s1 + $0x68] sm:$0xff] }
   0x3   :  { %180 = vmatpush.bf16.msra.mxu1 %v317_v1  ;;  %v48_v9 = vld [vmem:[%s423_s2] sm:$0xff]  ;;  %v49_v12 = vld [vmem:[%s423_s2 + $0x8] sm:$0xff]  ;;  %v305_v13 = vld [vmem:[%s422_s1 + $0x18] sm:$0xff] }
   0x4   :  { %52 = vperm.xlu0 %326, %v48_v9   ;;  %201 = vperm.xlu1 %327, %v48_v9   ;;  %v306_v10 = vld [vmem:[%s422_s1 + $0x20] sm:$0xff]  ;;  %v313_v14 = vld [vmem:[%s422_s1 + $0x58] sm:$0xff]  ;;  %v304_v15 = vld [vmem:[%s422_s1 + $0x10] sm:$0xff] }
   0x5   :  { %211 = vperm.xlu2 %328, %v48_v9   ;;  %v314_v11 = vld [vmem:[%s422_s1 + $0x60] sm:$0xff]  ;;  %v312_v16 = vld [vmem:[%s422_s1 + $0x50] sm:$0xff]  ;;  %v303_v17 = vld [vmem:[%s422_s1 + $0x8] sm:$0xff] }
   0x6   :  { %167 = vmatpush.bf16.msra.mxu0 %v308_v2  ;;  %v311_v18 = vld [vmem:[%s422_s1 + $0x48] sm:$0xff]  ;;  %v302_v19 = vld [vmem:[%s422_s1] sm:$0xff] }
   0x7   :  { %181 = vmatpush.bf16.msra.mxu1 %v316_v3  ;;  %v310_v20 = vld [vmem:[%s422_s1 + $0x40] sm:$0xff]  ;;  %v301_v22 = vld [vmem:[%s424_s0 + $0x4] sm:$0xf0]  ;;  %v232_v24 = vld [vmem:[%s424_s0 + $0x8] sm:$0xf0] }
   0x8   :  { %v230_v21 = vld [vmem:[%s424_s0] sm:$0xf]  ;;  %v300_v23 = vld [vmem:[%s424_s0 + $0x4] sm:$0xf] }
   0x9   :  { %v231_v25 = vor.u32 %v301_v22, %v230_v21  ;;  %v235_v26 = vor.u32 %v300_v23, %v232_v24 }
   0xa   :  { %168 = vmatpush.bf16.msra.mxu0 %v307_v7 }
   0xb   :  { %182 = vmatpush.bf16.msra.mxu1 %v315_v8 }
   0xc   :  { %57 = vperm.xlu0 %326, %v49_v12   ;;  %205 = vperm.xlu1 %327, %v49_v12  }
   0xd   :  { %215 = vperm.xlu2 %328, %v49_v12  }
   0xe   :  { %169 = vmatpush.bf16.msra.mxu0 %v306_v10 }
   0xf   :  { %183 = vmatpush.bf16.msra.mxu1 %v314_v11 }
  0x12   :  { %170 = vmatpush.bf16.msra.mxu0 %v305_v13 }
  0x13   :  { %184 = vmatpush.bf16.msra.mxu1 %v313_v14 }
  0x14   :  { %329 = vset.pattern.permute.xlu0 %v332_v6 }
  0x16   :  { %171 = vmatpush.bf16.msra.mxu0 %v304_v15 }
  0x17   :  { %185 = vmatpush.bf16.msra.mxu1 %v312_v16 }
  0x1a   :  { %172 = vmatpush.bf16.msra.mxu0 %v303_v17 }
  0x1b   :  { %186 = vmatpush.bf16.msra.mxu1 %v311_v18 }
  0x1e   :  { %173 = vmatpush.bf16.msra.mxu0 %v302_v19 }
  0x1f   :  { %187 = vmatpush.bf16.msra.mxu1 %v310_v20 }
  0x21   :  { %174 = vmatmul.bf16.vlgmr.msra.gmra.mxu0 %v231_v25 }
  0x22   :  { %188 = vmatmul.bf16.vlgmr.msra.gmra.mxu1 %v235_v26 }
  0x5f   :  { %v212_v34 = vpop.permute.xlu2 %211 }
  0x67   :  { %v216_v46 = vpop.permute.xlu2 %215 }
  0x76   :  { %v53_v27 = vpop.permute.xlu0 %52  ;;  %v202_v32 = vpop.permute.xlu1 %201 }
  0x7e   :  { %v58_v35 = vpop.permute.xlu0 %57  ;;  %v206_v43 = vpop.permute.xlu1 %205 }
  0x9e   :  { %v175_v28 = vpop.f32.mrf.mxu0 }
  0x9f   :  { %v189_v29 = vpop.f32.mrf.mxu1  ;;  %v176_v30 = vadd.f32 %v175_v28, %v53_v27 }
  0xa1   :  { %v190_v31 = vadd.f32 %v189_v29, %v176_v30 }
  0xa3   :  { %v196_v33 = vmul.f32 0.02, %v190_v31  ;;  %vm194_vm0 = vcmp.ge.f32.partialorder %v190_v31, 0.0 }
  0xa5   :  { %v198_v39 = vsel %vm194_vm0, %v190_v31, %v196_v33 }
  0xa6   :  { %v177_v36 = vpop.f32.mrf.mxu0  ;;  %v208_v42 = vmul.f32 %v202_v32, %v198_v39 }
  0xa7   :  { %v178_v37 = vadd.f32 %v177_v36, %v58_v35  ;;  %v191_v38 = vpop.f32.mrf.mxu1 }
  0xa8   :  { %v218_v47 = vadd.f32 %v212_v34, %v208_v42 }
  0xa9   :  { %v192_v40 = vadd.f32 %v191_v38, %v178_v37 }
  0xab   :  { %vm195_vm1 = vcmp.ge.f32.partialorder %v192_v40, 0.0  ;;  %v197_v41 = vmul.f32 0.02, %v192_v40 }
  0xad   :  { %v199_v44 = vsel %vm195_vm1, %v192_v40, %v197_v41 }
  0xae   :  { %v209_v45 = vmul.f32 %v206_v43, %v199_v44 }
  0xb0   :  { %v219_v48 = vadd.f32 %v216_v46, %v209_v45 }
  0xb2   :  { %v321_v49 = vpack.c.bf16 %v219_v48, %v218_v47 }
  0xb4   :  { %322 = vst [vmem:[%s425_s3] sm:$0xff] %v321_v49  }

// kernel: nowcasting_forward.30
= control target key start
LH: loop header
LB: loop body
LE: loop exit
PB: predicated region body
PF: predicated region fallthrough
CT: control target
= control target key end

     0   :  { %v588_v8 = vmov 0   ;;  %v589_v9 = vmov 1   ;;  %v590_v10 = vmov 2   ;;  %s742_s1 = inlined_call_operand.vmem [shape: bf16[512,128], index: 1, kind: input, shape index: {}]   ;;  %s743_s2 = inlined_call_operand.vmem [shape: f32[16,3], index: 2, kind: input, shape index: {}]   ;;  %s744_s0 = inlined_call_operand.vmem [shape: bf16[16,512], index: 0, kind: input, shape index: {}]   ;;  %s745_s3 = inlined_call_operand.vmem [shape: bf16[16,128], index: 3, kind: output, shape index: {}]  }
   0x1   :  { %v551_v0 = vld [vmem:[%s742_s1 + $0x38] sm:$0xff]  ;;  %v550_v4 = vld [vmem:[%s742_s1 + $0x30] sm:$0xff]  ;;  %584 = vset.pattern.permute.xlu0 %v588_v8  ;;  %585 = vset.pattern.permute.xlu1 %v589_v9  ;;  %v549_v11 = vld [vmem:[%s742_s1 + $0x28] sm:$0xff] }
   0x2   :  { %v559_v1 = vld [vmem:[%s742_s1 + $0x78] sm:$0xff]  ;;  %306 = vmatpush.bf16.msra.mxu0 %v551_v0  ;;  %v558_v5 = vld [vmem:[%s742_s1 + $0x70] sm:$0xff]  ;;  %586 = vset.pattern.permute.xlu2 %v590_v10  ;;  %v557_v12 = vld [vmem:[%s742_s1 + $0x68] sm:$0xff] }
   0x3   :  { %v567_v2 = vld [vmem:[%s742_s1 + $0xb8] sm:$0xff]  ;;  %320 = vmatpush.bf16.msra.mxu1 %v559_v1  ;;  %v566_v6 = vld [vmem:[%s742_s1 + $0xb0] sm:$0xff]  ;;  %v565_v13 = vld [vmem:[%s742_s1 + $0xa8] sm:$0xff] }
   0x4   :  { %v575_v3 = vld [vmem:[%s742_s1 + $0xf8] sm:$0xff]  ;;  %334 = vmatpush.bf16.msra.mxu2 %v567_v2  ;;  %v574_v7 = vld [vmem:[%s742_s1 + $0xf0] sm:$0xff]  ;;  %v573_v14 = vld [vmem:[%s742_s1 + $0xe8] sm:$0xff] }
   0x5   :  { %348 = vmatpush.bf16.msra.mxu3 %v575_v3  ;;  %v548_v15 = vld [vmem:[%s742_s1 + $0x20] sm:$0xff]  ;;  %v547_v20 = vld [vmem:[%s742_s1 + $0x18] sm:$0xff]  ;;  %v546_v24 = vld [vmem:[%s742_s1 + $0x10] sm:$0xff] }
   0x6   :  { %307 = vmatpush.bf16.msra.mxu0 %v550_v4  ;;  %v556_v16 = vld [vmem:[%s742_s1 + $0x60] sm:$0xff]  ;;  %v555_v21 = vld [vmem:[%s742_s1 + $0x58] sm:$0xff]  ;;  %v554_v25 = vld [vmem:[%s742_s1 + $0x50] sm:$0xff] }
   0x7   :  { %321 = vmatpush.bf16.msra.mxu1 %v558_v5  ;;  %v564_v17 = vld [vmem:[%s742_s1 + $0xa0] sm:$0xff]  ;;  %v563_v22 = vld [vmem:[%s742_s1 + $0x98] sm:$0xff]  ;;  %v562_v26 = vld [vmem:[%s742_s1 + $0x90] sm:$0xff] }
   0x8   :  { %335 = vmatpush.bf16.msra.mxu2 %v566_v6  ;;  %v572_v18 = vld [vmem:[%s742_s1 + $0xe0] sm:$0xff]  ;;  %v571_v23 = vld [vmem:[%s742_s1 + $0xd8] sm:$0xff]  ;;  %v570_v27 = vld [vmem:[%s742_s1 + $0xd0] sm:$0xff] }
   0x9   :  { %349 = vmatpush.bf16.msra.mxu3 %v574_v7  ;;  %v82_v19 = vld [vmem:[%s743_s2] sm:$0xff]  ;;  %v83_v28 = vld [vmem:[%s743_s2 + $0x8] sm:$0xff]  ;;  %v542_v38 = vld [vmem:[%s744_s0 + $0xc] sm:$0xf0] }
   0xa   :  { %308 = vmatpush.bf16.msra.mxu0 %v549_v11  ;;  %86 = vperm.xlu0 %584, %v82_v19   ;;  %v545_v29 = vld [vmem:[%s742_s1 + $0x8] sm:$0xff]  ;;  %v544_v33 = vld [vmem:[%s742_s1] sm:$0xff]  ;;  %v400_v40 = vld [vmem:[%s744_s0 + $0x10] sm:$0xf0] }
   0xb   :  { %322 = vmatpush.bf16.msra.mxu1 %v557_v12  ;;  %369 = vperm.xlu1 %585, %v82_v19   ;;  %v553_v30 = vld [vmem:[%s742_s1 + $0x48] sm:$0xff]  ;;  %v552_v34 = vld [vmem:[%s742_s1 + $0x40] sm:$0xff]  ;;  %v543_v42 = vld [vmem:[%s744_s0 + $0x14] sm:$0xf0] }
   0xc   :  { %336 = vmatpush.bf16.msra.mxu2 %v565_v13  ;;  %379 = vperm.xlu2 %586, %v82_v19   ;;  %v561_v31 = vld [vmem:[%s742_s1 + $0x88] sm:$0xff]  ;;  %v560_v35 = vld [vmem:[%s742_s1 + $0x80] sm:$0xff]  ;;  %v408_v44 = vld [vmem:[%s744_s0 + $0x18] sm:$0xf0] }
   0xd   :  { %350 = vmatpush.bf16.msra.mxu3 %v573_v14  ;;  %v569_v32 = vld [vmem:[%s742_s1 + $0xc8] sm:$0xff]  ;;  %v568_v36 = vld [vmem:[%s742_s1 + $0xc0] sm:$0xff] }
   0xe   :  { %309 = vmatpush.bf16.msra.mxu0 %v548_v15  ;;  %v398_v37 = vld [vmem:[%s744_s0] sm:$0xf]  ;;  %v540_v39 = vld [vmem:[%s744_s0 + $0x4] sm:$0xf]  ;;  %v406_v41 = vld [vmem:[%s744_s0 + $0x8] sm:$0xf] }
   0xf   :  { %323 = vmatpush.bf16.msra.mxu1 %v556_v16  ;;  %v541_v43 = vld [vmem:[%s744_s0 + $0xc] sm:$0xf]  ;;  %v399_v45 = vor.u32 %v542_v38, %v398_v37  ;;  %v403_v46 = vor.u32 %v540_v39, %v400_v40  ;;  %v407_v47 = vor.u32 %v543_v42, %v406_v41 }
  0x10   :  { %337 = vmatpush.bf16.msra.mxu2 %v564_v17  ;;  %v411_v48 = vor.u32 %v541_v43, %v408_v44 }
  0x11   :  { %351 = vmatpush.bf16.msra.mxu3 %v572_v18 }
  0x12   :  { %310 = vmatpush.bf16.msra.mxu0 %v547_v20  ;;  %91 = vperm.xlu0 %584, %v83_v28  }
  0x13   :  { %324 = vmatpush.bf16.msra.mxu1 %v555_v21  ;;  %373 = vperm.xlu1 %585, %v83_v28  }
  0x14   :  { %338 = vmatpush.bf16.msra.mxu2 %v563_v22  ;;  %383 = vperm.xlu2 %586, %v83_v28  }
  0x15   :  { %352 = vmatpush.bf16.msra.mxu3 %v571_v23 }
  0x16   :  { %311 = vmatpush.bf16.msra.mxu0 %v546_v24 }
  0x17   :  { %325 = vmatpush.bf16.msra.mxu1 %v554_v25 }
  0x18   :  { %339 = vmatpush.bf16.msra.mxu2 %v562_v26 }
  0x19   :  { %353 = vmatpush.bf16.msra.mxu3 %v570_v27 }
  0x1a   :  { %312 = vmatpush.bf16.msra.mxu0 %v545_v29  ;;  %587 = vset.pattern.permute.xlu0 %v590_v10 }
  0x1b   :  { %326 = vmatpush.bf16.msra.mxu1 %v553_v30 }
  0x1c   :  { %340 = vmatpush.bf16.msra.mxu2 %v561_v31 }
  0x1d   :  { %354 = vmatpush.bf16.msra.mxu3 %v569_v32 }
  0x1e   :  { %313 = vmatpush.bf16.msra.mxu0 %v544_v33 }
  0x1f   :  { %327 = vmatpush.bf16.msra.mxu1 %v552_v34 }
  0x20   :  { %341 = vmatpush.bf16.msra.mxu2 %v560_v35 }
  0x21   :  { %355 = vmatpush.bf16.msra.mxu3 %v568_v36  ;;  %314 = vmatmul.bf16.vlgmr.msra.gmra.mxu0 %v399_v45 }
  0x22   :  { %328 = vmatmul.bf16.vlgmr.msra.gmra.mxu1 %v403_v46 }
  0x23   :  { %342 = vmatmul.bf16.vlgmr.msra.gmra.mxu2 %v407_v47 }
  0x24   :  { %356 = vmatmul.bf16.vlgmr.msra.gmra.mxu3 %v411_v48 }
  0x66   :  { %v380_v0 = vpop.permute.xlu2 %379 }
  0x6e   :  { %v384_v12 = vpop.permute.xlu2 %383 }
  0x7c   :  { %v87_v49 = vpop.permute.xlu0 %86 }
  0x7d   :  { %v370_v61 = vpop.permute.xlu1 %369 }
  0x84   :  { %v92_v58 = vpop.permute.xlu0 %91 }
  0x85   :  { %v374_v9 = vpop.permute.xlu1 %373 }
  0x9e   :  { %v315_v50 = vpop.f32.mrf.mxu0 }
  0x9f   :  { %v316_v51 = vadd.f32 %v315_v50, %v87_v49  ;;  %v329_v52 = vpop.f32.mrf.mxu1 }
  0xa1   :  { %v330_v53 = vadd.f32 %v329_v52, %v316_v51 }
  0xa6   :  { %v343_v54 = vpop.f32.mrf.mxu2  ;;  %v317_v57 = vpop.f32.mrf.mxu0 }
  0xa7   :  { %v357_v55 = vpop.f32.mrf.mxu3  ;;  %v344_v56 = vadd.f32 %v343_v54, %v330_v53  ;;  %v318_v60 = vadd.f32 %v317_v57, %v92_v58  ;;  %v331_v62 = vpop.f32.mrf.mxu1 }
  0xa9   :  { %v358_v59 = vadd.f32 %v357_v55, %v344_v56  ;;  %v332_v1 = vadd.f32 %v331_v62, %v318_v60 }
  0xab   :  { %v364_v63 = vmul.f32 0.02, %v358_v59  ;;  %vm362_vm0 = vcmp.ge.f32.partialorder %v358_v59, 0.0 }
  0xad   :  { %v366_v5 = vsel %vm362_vm0, %v358_v59, %v364_v63 }
  0xae   :  { %v345_v2 = vpop.f32.mrf.mxu2  ;;  %v376_v8 = vmul.f32 %v370_v61, %v366_v5 }
  0xaf   :  { %v346_v3 = vadd.f32 %v345_v2, %v332_v1  ;;  %v359_v4 = vpop.f32.mrf.mxu3 }
  0xb0   :  { %v386_v13 = vadd.f32 %v380_v0, %v376_v8 }
  0xb1   :  { %v360_v6 = vadd.f32 %v359_v4, %v346_v3 }
  0xb3   :  { %vm363_vm1 = vcmp.ge.f32.partialorder %v360_v6, 0.0  ;;  %v365_v7 = vmul.f32 0.02, %v360_v6 }
  0xb5   :  { %v367_v10 = vsel %vm363_vm1, %v360_v6, %v365_v7 }
  0xb6   :  { %v377_v11 = vmul.f32 %v374_v9, %v367_v10 }
  0xb8   :  { %v387_v14 = vadd.f32 %v384_v12, %v377_v11 }
  0xba   :  { %v579_v15 = vpack.c.bf16 %v387_v14, %v386_v13 }
  0xbc   :  { %580 = vst [vmem:[%s745_s3] sm:$0xff] %v579_v15  }

// kernel: nowcasting_forward.31
= control target key start
LH: loop header
LB: loop body
LE: loop exit
PB: predicated region body
PF: predicated region fallthrough
CT: control target
= control target key end

     0   :  { %v461_v6 = vmov 0   ;;  %v462_v7 = vmov 1   ;;  %v463_v8 = vmov 2   ;;  %s583_s1 = inlined_call_operand.vmem [shape: bf16[384,128], index: 1, kind: input, shape index: {}]   ;;  %s584_s2 = inlined_call_operand.vmem [shape: f32[16,3], index: 2, kind: input, shape index: {}]   ;;  %s585_s0 = inlined_call_operand.vmem [shape: bf16[16,384], index: 0, kind: input, shape index: {}]   ;;  %s586_s3 = inlined_call_operand.vmem [shape: bf16[16,128], index: 3, kind: output, shape index: {}]  }
   0x1   :  { %v432_v0 = vld [vmem:[%s583_s1 + $0x38] sm:$0xff]  ;;  %v431_v3 = vld [vmem:[%s583_s1 + $0x30] sm:$0xff]  ;;  %457 = vset.pattern.permute.xlu0 %v461_v6  ;;  %458 = vset.pattern.permute.xlu1 %v462_v7  ;;  %v430_v9 = vld [vmem:[%s583_s1 + $0x28] sm:$0xff] }
   0x2   :  { %v440_v1 = vld [vmem:[%s583_s1 + $0x78] sm:$0xff]  ;;  %238 = vmatpush.bf16.msra.mxu0 %v432_v0  ;;  %v439_v4 = vld [vmem:[%s583_s1 + $0x70] sm:$0xff]  ;;  %459 = vset.pattern.permute.xlu2 %v463_v8  ;;  %v438_v10 = vld [vmem:[%s583_s1 + $0x68] sm:$0xff] }
   0x3   :  { %v448_v2 = vld [vmem:[%s583_s1 + $0xb8] sm:$0xff]  ;;  %252 = vmatpush.bf16.msra.mxu1 %v440_v1  ;;  %v447_v5 = vld [vmem:[%s583_s1 + $0xb0] sm:$0xff]  ;;  %v446_v11 = vld [vmem:[%s583_s1 + $0xa8] sm:$0xff] }
   0x4   :  { %266 = vmatpush.bf16.msra.mxu2 %v448_v2  ;;  %v429_v12 = vld [vmem:[%s583_s1 + $0x20] sm:$0xff]  ;;  %v428_v16 = vld [vmem:[%s583_s1 + $0x18] sm:$0xff]  ;;  %v67_v19 = vld [vmem:[%s584_s2 + $0x8] sm:$0xff] }
   0x5   :  { %v437_v13 = vld [vmem:[%s583_s1 + $0x60] sm:$0xff]  ;;  %v436_v17 = vld [vmem:[%s583_s1 + $0x58] sm:$0xff]  ;;  %v427_v20 = vld [vmem:[%s583_s1 + $0x10] sm:$0xff] }
   0x6   :  { %239 = vmatpush.bf16.msra.mxu0 %v431_v3  ;;  %v66_v14 = vld [vmem:[%s584_s2] sm:$0xff]  ;;  %v444_v18 = vld [vmem:[%s583_s1 + $0x98] sm:$0xff]  ;;  %v435_v21 = vld [vmem:[%s583_s1 + $0x50] sm:$0xff] }
   0x7   :  { %253 = vmatpush.bf16.msra.mxu1 %v439_v4  ;;  %v445_v15 = vld [vmem:[%s583_s1 + $0xa0] sm:$0xff]  ;;  %70 = vperm.xlu0 %457, %v66_v14   ;;  %v443_v22 = vld [vmem:[%s583_s1 + $0x90] sm:$0xff]  ;;  %v426_v23 = vld [vmem:[%s583_s1 + $0x8] sm:$0xff] }
   0x8   :  { %267 = vmatpush.bf16.msra.mxu2 %v447_v5  ;;  %287 = vperm.xlu1 %458, %v66_v14   ;;  %v434_v24 = vld [vmem:[%s583_s1 + $0x48] sm:$0xff]  ;;  %v425_v26 = vld [vmem:[%s583_s1] sm:$0xff]  ;;  %v318_v31 = vld [vmem:[%s585_s0 + $0xc] sm:$0xf0] }
   0x9   :  { %297 = vperm.xlu2 %459, %v66_v14   ;;  %v442_v25 = vld [vmem:[%s583_s1 + $0x88] sm:$0xff]  ;;  %v433_v27 = vld [vmem:[%s583_s1 + $0x40] sm:$0xff]  ;;  %v424_v34 = vld [vmem:[%s585_s0 + $0x10] sm:$0xf0] }
   0xa   :  { %240 = vmatpush.bf16.msra.mxu0 %v430_v9  ;;  %v316_v28 = vld [vmem:[%s585_s0] sm:$0xf]  ;;  %v423_v29 = vld [vmem:[%s585_s0 + $0x8] sm:$0xf0]  ;;  %v422_v30 = vld [vmem:[%s585_s0 + $0x4] sm:$0xf] }
   0xb   :  { %254 = vmatpush.bf16.msra.mxu1 %v438_v10  ;;  %v441_v32 = vld [vmem:[%s583_s1 + $0x80] sm:$0xff]  ;;  %v324_v33 = vld [vmem:[%s585_s0 + $0x8] sm:$0xf]  ;;  %v317_v35 = vor.u32 %v423_v29, %v316_v28  ;;  %v321_v36 = vor.u32 %v422_v30, %v318_v31 }
   0xc   :  { %268 = vmatpush.bf16.msra.mxu2 %v446_v11  ;;  %v325_v37 = vor.u32 %v424_v34, %v324_v33 }
   0xe   :  { %241 = vmatpush.bf16.msra.mxu0 %v429_v12 }
   0xf   :  { %255 = vmatpush.bf16.msra.mxu1 %v437_v13  ;;  %75 = vperm.xlu0 %457, %v67_v19  }
  0x10   :  { %269 = vmatpush.bf16.msra.mxu2 %v445_v15  ;;  %291 = vperm.xlu1 %458, %v67_v19  }
  0x11   :  { %301 = vperm.xlu2 %459, %v67_v19  }
  0x12   :  { %242 = vmatpush.bf16.msra.mxu0 %v428_v16 }
  0x13   :  { %256 = vmatpush.bf16.msra.mxu1 %v436_v17 }
  0x14   :  { %270 = vmatpush.bf16.msra.mxu2 %v444_v18 }
  0x16   :  { %243 = vmatpush.bf16.msra.mxu0 %v427_v20 }
  0x17   :  { %257 = vmatpush.bf16.msra.mxu1 %v435_v21  ;;  %460 = vset.pattern.permute.xlu0 %v463_v8 }
  0x18   :  { %271 = vmatpush.bf16.msra.mxu2 %v443_v22 }
  0x1a   :  { %244 = vmatpush.bf16.msra.mxu0 %v426_v23 }
  0x1b   :  { %258 = vmatpush.bf16.msra.mxu1 %v434_v24 }
  0x1c   :  { %272 = vmatpush.bf16.msra.mxu2 %v442_v25 }
  0x1e   :  { %245 = vmatpush.bf16.msra.mxu0 %v425_v26 }
  0x1f   :  { %259 = vmatpush.bf16.msra.mxu1 %v433_v27 }
  0x20   :  { %273 = vmatpush.bf16.msra.mxu2 %v441_v32 }
  0x21   :  { %246 = vmatmul.bf16.vlgmr.msra.gmra.mxu0 %v317_v35 }
  0x22   :  { %260 = vmatmul.bf16.vlgmr.msra.gmra.mxu1 %v321_v36 }
  0x23   :  { %274 = vmatmul.bf16.vlgmr.msra.gmra.mxu2 %v325_v37 }
  0x63   :  { %v298_v49 = vpop.permute.xlu2 %297 }
  0x6b   :  { %v302_v61 = vpop.permute.xlu2 %301 }
  0x79   :  { %v71_v38 = vpop.permute.xlu0 %70 }
  0x7a   :  { %v288_v47 = vpop.permute.xlu1 %287 }
  0x81   :  { %v76_v46 = vpop.permute.xlu0 %75 }
  0x82   :  { %v292_v58 = vpop.permute.xlu1 %291 }
  0x9e   :  { %v247_v39 = vpop.f32.mrf.mxu0 }
  0x9f   :  { %v248_v40 = vadd.f32 %v247_v39, %v71_v38  ;;  %v261_v41 = vpop.f32.mrf.mxu1 }
  0xa1   :  { %v262_v42 = vadd.f32 %v261_v41, %v248_v40 }
  0xa6   :  { %v275_v43 = vpop.f32.mrf.mxu2  ;;  %v249_v45 = vpop.f32.mrf.mxu0 }
  0xa7   :  { %v276_v44 = vadd.f32 %v275_v43, %v262_v42  ;;  %v250_v48 = vadd.f32 %v249_v45, %v76_v46  ;;  %v263_v51 = vpop.f32.mrf.mxu1 }
  0xa9   :  { %v282_v50 = vmul.f32 0.02, %v276_v44  ;;  %vm280_vm0 = vcmp.ge.f32.partialorder %v276_v44, 0.0  ;;  %v264_v52 = vadd.f32 %v263_v51, %v250_v48 }
  0xab   :  { %v284_v54 = vsel %vm280_vm0, %v276_v44, %v282_v50 }
  0xac   :  { %v294_v57 = vmul.f32 %v288_v47, %v284_v54 }
  0xae   :  { %v277_v53 = vpop.f32.mrf.mxu2  ;;  %v304_v62 = vadd.f32 %v298_v49, %v294_v57 }
  0xaf   :  { %v278_v55 = vadd.f32 %v277_v53, %v264_v52 }
  0xb1   :  { %vm281_vm1 = vcmp.ge.f32.partialorder %v278_v55, 0.0  ;;  %v283_v56 = vmul.f32 0.02, %v278_v55 }
  0xb3   :  { %v285_v59 = vsel %vm281_vm1, %v278_v55, %v283_v56 }
  0xb4   :  { %v295_v60 = vmul.f32 %v292_v58, %v285_v59 }
  0xb6   :  { %v305_v63 = vadd.f32 %v302_v61, %v295_v60 }
  0xb8   :  { %v452_v0 = vpack.c.bf16 %v305_v63, %v304_v62 }
  0xba   :  { %453 = vst [vmem:[%s586_s3] sm:$0xff] %v452_v0  }

// kernel: nowcasting_forward.33
= control target key start
LH: loop header
LB: loop body
LE: loop exit
PB: predicated region body
PF: predicated region fallthrough
CT: control target
= control target key end

     0   :  { %v846_v20 = vmov 0   ;;  %v847_v51 = vmov 1   ;;  %v848_v52 = vmov 2   ;;  %s1063_s1 = inlined_call_operand.vmem [shape: bf16[768,128], index: 1, kind: input, shape index: {}]   ;;  %s1064_s2 = inlined_call_operand.vmem [shape: f32[16,3], index: 2, kind: input, shape index: {}]   ;;  %s1065_s0 = inlined_call_operand.vmem [shape: bf16[16,768], index: 0, kind: input, shape index: {}]   ;;  %s1066_s3 = inlined_call_operand.vmem [shape: bf16[16,128], index: 3, kind: output, shape index: {}]  }
   0x1   :  { %v793_v0 = vld [vmem:[%s1063_s1 + $0x38] sm:$0xff]  ;;  %v792_v4 = vld [vmem:[%s1063_s1 + $0x30] sm:$0xff]  ;;  %v791_v8 = vld [vmem:[%s1063_s1 + $0x28] sm:$0xff]  ;;  %842 = vset.pattern.permute.xlu0 %v846_v20  ;;  %843 = vset.pattern.permute.xlu1 %v847_v51 }
   0x2   :  { %v801_v1 = vld [vmem:[%s1063_s1 + $0x78] sm:$0xff]  ;;  %446 = vmatpush.bf16.msra.mxu0 %v793_v0  ;;  %v800_v5 = vld [vmem:[%s1063_s1 + $0x70] sm:$0xff]  ;;  %v799_v9 = vld [vmem:[%s1063_s1 + $0x68] sm:$0xff]  ;;  %844 = vset.pattern.permute.xlu2 %v848_v52 }
   0x3   :  { %v809_v2 = vld [vmem:[%s1063_s1 + $0xb8] sm:$0xff]  ;;  %460 = vmatpush.bf16.msra.mxu1 %v801_v1  ;;  %v808_v6 = vld [vmem:[%s1063_s1 + $0xb0] sm:$0xff]  ;;  %v807_v10 = vld [vmem:[%s1063_s1 + $0xa8] sm:$0xff] }
   0x4   :  { %v817_v3 = vld [vmem:[%s1063_s1 + $0xf8] sm:$0xff]  ;;  %474 = vmatpush.bf16.msra.mxu2 %v809_v2  ;;  %v816_v7 = vld [vmem:[%s1063_s1 + $0xf0] sm:$0xff]  ;;  %v815_v11 = vld [vmem:[%s1063_s1 + $0xe8] sm:$0xff] }
   0x5   :  { %488 = vmatpush.bf16.msra.mxu3 %v817_v3  ;;  %v790_v12 = vld [vmem:[%s1063_s1 + $0x20] sm:$0xff]  ;;  %v789_v16 = vld [vmem:[%s1063_s1 + $0x18] sm:$0xff]  ;;  %v788_v22 = vld [vmem:[%s1063_s1 + $0x10] sm:$0xff] }
   0x6   :  { %447 = vmatpush.bf16.msra.mxu0 %v792_v4  ;;  %v798_v13 = vld [vmem:[%s1063_s1 + $0x60] sm:$0xff]  ;;  %v797_v17 = vld [vmem:[%s1063_s1 + $0x58] sm:$0xff]  ;;  %v796_v23 = vld [vmem:[%s1063_s1 + $0x50] sm:$0xff] }
   0x7   :  { %461 = vmatpush.bf16.msra.mxu1 %v800_v5  ;;  %v806_v14 = vld [vmem:[%s1063_s1 + $0xa0] sm:$0xff]  ;;  %v805_v18 = vld [vmem:[%s1063_s1 + $0x98] sm:$0xff]  ;;  %v804_v24 = vld [vmem:[%s1063_s1 + $0x90] sm:$0xff] }
   0x8   :  { %475 = vmatpush.bf16.msra.mxu2 %v808_v6  ;;  %v814_v15 = vld [vmem:[%s1063_s1 + $0xe0] sm:$0xff]  ;;  %v813_v19 = vld [vmem:[%s1063_s1 + $0xd8] sm:$0xff]  ;;  %v812_v25 = vld [vmem:[%s1063_s1 + $0xd0] sm:$0xff] }
   0x9   :  { %489 = vmatpush.bf16.msra.mxu3 %v816_v7  ;;  %v932_v21 = vld [vmem:[%s1064_s2] sm:$0xff]  ;;  %v787_v26 = vld [vmem:[%s1063_s1 + $0x8] sm:$0xff]  ;;  %v783_v34 = vld [vmem:[%s1065_s0 + $0x14] sm:$0xf0] }
   0xa   :  { %448 = vmatpush.bf16.msra.mxu0 %v791_v8  ;;  %120 = vperm.xlu0 %842, %v932_v21   ;;  %v795_v27 = vld [vmem:[%s1063_s1 + $0x48] sm:$0xff]  ;;  %v786_v31 = vld [vmem:[%s1063_s1] sm:$0xff]  ;;  %v568_v36 = vld [vmem:[%s1065_s0 + $0x18] sm:$0xf0] }
   0xb   :  { %462 = vmatpush.bf16.msra.mxu1 %v799_v9  ;;  %v803_v28 = vld [vmem:[%s1063_s1 + $0x88] sm:$0xff]  ;;  %v794_v32 = vld [vmem:[%s1063_s1 + $0x40] sm:$0xff]  ;;  %v825_v37 = vld [vmem:[%s1063_s1 + $0x138] sm:$0xff]  ;;  %537 = vperm.xlu1 %843, %v932_v21  }
   0xc   :  { %476 = vmatpush.bf16.msra.mxu2 %v807_v10  ;;  %v811_v29 = vld [vmem:[%s1063_s1 + $0xc8] sm:$0xff]  ;;  %v566_v33 = vld [vmem:[%s1065_s0] sm:$0xf]  ;;  %v780_v35 = vld [vmem:[%s1065_s0 + $0x4] sm:$0xf]  ;;  %547 = vperm.xlu2 %844, %v932_v21  }
   0xd   :  { %490 = vmatpush.bf16.msra.mxu3 %v815_v11  ;;  %v117_v30 = vld [vmem:[%s1064_s2 + $0x8] sm:$0xff]  ;;  %v833_v38 = vld [vmem:[%s1063_s1 + $0x178] sm:$0xff]  ;;  %v802_v39 = vld [vmem:[%s1063_s1 + $0x80] sm:$0xff]  ;;  %v567_v43 = vor.u32 %v783_v34, %v566_v33  ;;  %v571_v46 = vor.u32 %v780_v35, %v568_v36 }
   0xe   :  { %449 = vmatpush.bf16.msra.mxu0 %v790_v12  ;;  %v810_v40 = vld [vmem:[%s1063_s1 + $0xc0] sm:$0xff]  ;;  %v574_v41 = vld [vmem:[%s1065_s0 + $0x8] sm:$0xf]  ;;  %v781_v44 = vld [vmem:[%s1065_s0 + $0xc] sm:$0xf] }
   0xf   :  { %463 = vmatpush.bf16.msra.mxu1 %v798_v13  ;;  %v784_v42 = vld [vmem:[%s1065_s0 + $0x1c] sm:$0xf0]  ;;  %v576_v45 = vld [vmem:[%s1065_s0 + $0x20] sm:$0xf0]  ;;  %v824_v47 = vld [vmem:[%s1063_s1 + $0x130] sm:$0xff] }
  0x10   :  { %477 = vmatpush.bf16.msra.mxu2 %v806_v14  ;;  %v832_v48 = vld [vmem:[%s1063_s1 + $0x170] sm:$0xff]  ;;  %v575_v49 = vor.u32 %v784_v42, %v574_v41  ;;  %v579_v50 = vor.u32 %v781_v44, %v576_v45  ;;  %v823_v53 = vld [vmem:[%s1063_s1 + $0x128] sm:$0xff]  ;;  %v822_v55 = vld [vmem:[%s1063_s1 + $0x120] sm:$0xff] }
  0x11   :  { %491 = vmatpush.bf16.msra.mxu3 %v814_v15  ;;  %v831_v54 = vld [vmem:[%s1063_s1 + $0x168] sm:$0xff]  ;;  %v830_v56 = vld [vmem:[%s1063_s1 + $0x160] sm:$0xff]  ;;  %v821_v57 = vld [vmem:[%s1063_s1 + $0x118] sm:$0xff] }
  0x12   :  { %450 = vmatpush.bf16.msra.mxu0 %v789_v16  ;;  %125 = vperm.xlu0 %842, %v117_v30   ;;  %v829_v58 = vld [vmem:[%s1063_s1 + $0x158] sm:$0xff]  ;;  %v820_v59 = vld [vmem:[%s1063_s1 + $0x110] sm:$0xff]  ;;  %v819_v61 = vld [vmem:[%s1063_s1 + $0x108] sm:$0xff] }
  0x13   :  { %464 = vmatpush.bf16.msra.mxu1 %v797_v17  ;;  %541 = vperm.xlu1 %843, %v117_v30   ;;  %v828_v60 = vld [vmem:[%s1063_s1 + $0x150] sm:$0xff]  ;;  %v827_v62 = vld [vmem:[%s1063_s1 + $0x148] sm:$0xff]  ;;  %v818_v63 = vld [vmem:[%s1063_s1 + $0x100] sm:$0xff] }
  0x14   :  { %478 = vmatpush.bf16.msra.mxu2 %v805_v18  ;;  %551 = vperm.xlu2 %844, %v117_v30   ;;  %v826_v0 = vld [vmem:[%s1063_s1 + $0x140] sm:$0xff]  ;;  %v582_v1 = vld [vmem:[%s1065_s0 + $0x10] sm:$0xf]  ;;  %v785_v2 = vld [vmem:[%s1065_s0 + $0x24] sm:$0xf0] }
  0x15   :  { %492 = vmatpush.bf16.msra.mxu3 %v813_v19  ;;  %v782_v3 = vld [vmem:[%s1065_s0 + $0x14] sm:$0xf]  ;;  %v584_v4 = vld [vmem:[%s1065_s0 + $0x28] sm:$0xf0]  ;;  %v583_v5 = vor.u32 %v785_v2, %v582_v1 }
  0x16   :  { %451 = vmatpush.bf16.msra.mxu0 %v788_v22  ;;  %v587_v6 = vor.u32 %v782_v3, %v584_v4 }
  0x17   :  { %465 = vmatpush.bf16.msra.mxu1 %v796_v23 }
  0x18   :  { %479 = vmatpush.bf16.msra.mxu2 %v804_v24 }
  0x19   :  { %493 = vmatpush.bf16.msra.mxu3 %v812_v25 }
  0x1a   :  { %452 = vmatpush.bf16.msra.mxu0 %v787_v26  ;;  %845 = vset.pattern.permute.xlu0 %v848_v52 }
  0x1b   :  { %466 = vmatpush.bf16.msra.mxu1 %v795_v27 }
  0x1c   :  { %480 = vmatpush.bf16.msra.mxu2 %v803_v28 }
  0x1d   :  { %494 = vmatpush.bf16.msra.mxu3 %v811_v29 }
  0x1e   :  { %453 = vmatpush.bf16.msra.mxu0 %v786_v31 }
  0x1f   :  { %467 = vmatpush.bf16.msra.mxu1 %v794_v32 }
  0x20   :  { %481 = vmatpush.bf16.msra.mxu2 %v802_v39 }
  0x21   :  { %495 = vmatpush.bf16.msra.mxu3 %v810_v40  ;;  %454 = vmatmul.bf16.vlgmr.msra.gmra.mxu0 %v567_v43 }
  0x22   :  { %502 = vmatpush.bf16.msrb.mxu0 %v825_v37  ;;  %468 = vmatmul.bf16.vlgmr.msra.gmra.mxu1 %v571_v46 }
  0x23   :  { %516 = vmatpush.bf16.msrb.mxu1 %v833_v38  ;;  %482 = vmatmul.bf16.vlgmr.msra.gmra.mxu2 %v575_v49 }
  0x24   :  { %496 = vmatmul.bf16.vlgmr.msra.gmra.mxu3 %v579_v50 }
  0x26   :  { %503 = vmatpush.bf16.msrb.mxu0 %v824_v47 }
  0x27   :  { %517 = vmatpush.bf16.msrb.mxu1 %v832_v48 }
  0x2a   :  { %504 = vmatpush.bf16.msrb.mxu0 %v823_v53 }
  0x2b   :  { %518 = vmatpush.bf16.msrb.mxu1 %v831_v54 }
  0x2e   :  { %505 = vmatpush.bf16.msrb.mxu0 %v822_v55 }
  0x2f   :  { %519 = vmatpush.bf16.msrb.mxu1 %v830_v56 }
  0x32   :  { %506 = vmatpush.bf16.msrb.mxu0 %v821_v57 }
  0x33   :  { %520 = vmatpush.bf16.msrb.mxu1 %v829_v58 }
  0x36   :  { %507 = vmatpush.bf16.msrb.mxu0 %v820_v59 }
  0x37   :  { %521 = vmatpush.bf16.msrb.mxu1 %v828_v60 }
  0x3a   :  { %508 = vmatpush.bf16.msrb.mxu0 %v819_v61 }
  0x3b   :  { %522 = vmatpush.bf16.msrb.mxu1 %v827_v62 }
  0x3e   :  { %509 = vmatpush.bf16.msrb.mxu0 %v818_v63 }
  0x3f   :  { %523 = vmatpush.bf16.msrb.mxu1 %v826_v0 }
  0x41   :  { %510 = vmatmul.bf16.vlgmr.msrb.gmra.mxu0 %v583_v5 }
  0x42   :  { %524 = vmatmul.bf16.vlgmr.msrb.gmra.mxu1 %v587_v6 }
  0x66   :  { %v548_v31 = vpop.permute.xlu2 %547 }
  0x6e   :  { %v552_v42 = vpop.permute.xlu2 %551 }
  0x7c   :  { %v121_v7 = vpop.permute.xlu0 %120 }
  0x7d   :  { %v538_v28 = vpop.permute.xlu1 %537 }
  0x84   :  { %v126_v13 = vpop.permute.xlu0 %125 }
  0x85   :  { %v542_v39 = vpop.permute.xlu1 %541 }
  0x9e   :  { %v455_v8 = vpop.f32.mrf.mxu0 }
  0x9f   :  { %v469_v9 = vpop.f32.mrf.mxu1  ;;  %v456_v10 = vadd.f32 %v455_v8, %v121_v7 }
  0xa1   :  { %v470_v12 = vadd.f32 %v469_v9, %v456_v10 }
  0xa6   :  { %v483_v11 = vpop.f32.mrf.mxu2  ;;  %v457_v14 = vpop.f32.mrf.mxu0 }
  0xa7   :  { %v471_v15 = vpop.f32.mrf.mxu1  ;;  %v497_v16 = vpop.f32.mrf.mxu3  ;;  %v484_v17 = vadd.f32 %v483_v11, %v470_v12  ;;  %v458_v18 = vadd.f32 %v457_v14, %v126_v13 }
  0xa9   :  { %v498_v19 = vadd.f32 %v497_v16, %v484_v17  ;;  %v472_v20 = vadd.f32 %v471_v15, %v458_v18 }
  0xae   :  { %v485_v21 = vpop.f32.mrf.mxu2 }
  0xaf   :  { %v486_v25 = vadd.f32 %v485_v21, %v472_v20  ;;  %v499_v27 = vpop.f32.mrf.mxu3 }
  0xb1   :  { %v500_v29 = vadd.f32 %v499_v27, %v486_v25 }
  0xbe   :  { %v511_v22 = vpop.f32.mrf.mxu0 }
  0xbf   :  { %v525_v23 = vpop.f32.mrf.mxu1  ;;  %v512_v24 = vadd.f32 %v511_v22, %v498_v19 }
  0xc1   :  { %v526_v26 = vadd.f32 %v525_v23, %v512_v24 }
  0xc3   :  { %v532_v30 = vmul.f32 0.02, %v526_v26  ;;  %vm530_vm0 = vcmp.ge.f32.partialorder %v526_v26, 0.0 }
  0xc5   :  { %v534_v35 = vsel %vm530_vm0, %v526_v26, %v532_v30 }
  0xc6   :  { %v513_v32 = vpop.f32.mrf.mxu0  ;;  %v544_v38 = vmul.f32 %v538_v28, %v534_v35 }
  0xc7   :  { %v514_v33 = vadd.f32 %v513_v32, %v500_v29  ;;  %v527_v34 = vpop.f32.mrf.mxu1 }
  0xc8   :  { %v554_v43 = vadd.f32 %v548_v31, %v544_v38 }
  0xc9   :  { %v528_v36 = vadd.f32 %v527_v34, %v514_v33 }
  0xcb   :  { %vm531_vm1 = vcmp.ge.f32.partialorder %v528_v36, 0.0  ;;  %v533_v37 = vmul.f32 0.02, %v528_v36 }
  0xcd   :  { %v535_v40 = vsel %vm531_vm1, %v528_v36, %v533_v37 }
  0xce   :  { %v545_v41 = vmul.f32 %v542_v39, %v535_v40 }
  0xd0   :  { %v555_v44 = vadd.f32 %v552_v42, %v545_v41 }
  0xd2   :  { %v837_v45 = vpack.c.bf16 %v555_v44, %v554_v43 }
  0xd4   :  { %838 = vst [vmem:[%s1066_s3] sm:$0xff] %v837_v45  }

// kernel: nowcasting_forward.36
= control target key start
LH: loop header
LB: loop body
LE: loop exit
PB: predicated region body
PF: predicated region fallthrough
CT: control target
= control target key end

     0   :  { %v562_v0 = vmov 0   ;;  %v563_v22 = vmov 1   ;;  %v564_v28 = vmov 2   ;;  %s771_s2 = inlined_call_operand.vmem [shape: f32[96,3], index: 2, kind: input, shape index: {}]   ;;  %s772_s1 = inlined_call_operand.vmem [shape: bf16[128,128], index: 1, kind: input, shape index: {}]   ;;  %s773_s0 = inlined_call_operand.vmem [shape: bf16[96,128], index: 0, kind: input, shape index: {}]   ;;  %s774_s3 = inlined_call_operand.vmem [shape: bf16[96,128], index: 3, kind: output, shape index: {}]  }
   0x1   :  { %555 = vset.pattern.permute.xlu2 %v562_v0  ;;  %554 = vset.pattern.permute.xlu1 %v562_v0  ;;  %v588_v1 = vld [vmem:[%s771_s2 + $0x20] sm:$0xff]  ;;  %v593_v2 = vld [vmem:[%s771_s2 + $0x10] sm:$0xff]  ;;  %v490_v4 = vld [vmem:[%s772_s1 + $0x38] sm:$0xff] }
   0x2   :  { %v598_v3 = vld [vmem:[%s771_s2] sm:$0xff]  ;;  %553 = vset.pattern.permute.xlu0 %v562_v0  ;;  %76 = vperm.xlu2 %555, %v588_v1   ;;  %v489_v5 = vld [vmem:[%s772_s1 + $0x30] sm:$0xff]  ;;  %v612_v6 = vld [vmem:[%s771_s2 + $0x28] sm:$0xff] }
   0x3   :  { %66 = vperm.xlu1 %554, %v593_v2   ;;  %56 = vperm.xlu0 %553, %v598_v3   ;;  %v617_v7 = vld [vmem:[%s771_s2 + $0x18] sm:$0xff]  ;;  %v622_v8 = vld [vmem:[%s771_s2 + $0x8] sm:$0xff]  ;;  %v487_v10 = vld [vmem:[%s772_s1 + $0x20] sm:$0xff] }
   0x4   :  { %198 = vmatpush.bf16.msra.mxu0 %v490_v4  ;;  %526 = vmatpush.bf16.msra.mxu1 %v490_v4  ;;  %v488_v9 = vld [vmem:[%s772_s1 + $0x28] sm:$0xff]  ;;  %v636_v11 = vld [vmem:[%s771_s2 + $0x40] sm:$0xff]  ;;  %v641_v12 = vld [vmem:[%s771_s2 + $0x38] sm:$0xff] }
   0x5   :  { %527 = vmatpush.bf16.msra.mxu2 %v490_v4  ;;  %528 = vmatpush.bf16.msra.mxu3 %v490_v4  ;;  %v646_v13 = vld [vmem:[%s771_s2 + $0x30] sm:$0xff]  ;;  %v486_v14 = vld [vmem:[%s772_s1 + $0x18] sm:$0xff]  ;;  %v51_v18 = vld [vmem:[%s771_s2 + $0x48] sm:$0xff] }
   0x6   :  { %v485_v15 = vld [vmem:[%s772_s1 + $0x10] sm:$0xff]  ;;  %v660_v16 = vld [vmem:[%s771_s2 + $0x58] sm:$0xff]  ;;  %v484_v19 = vld [vmem:[%s772_s1 + $0x8] sm:$0xff] }
   0x7   :  { %v52_v17 = vld [vmem:[%s771_s2 + $0x50] sm:$0xff]  ;;  %v483_v20 = vld [vmem:[%s772_s1] sm:$0xff]  ;;  %v478_v23 = vld [vmem:[%s773_s0 + $0x8] sm:$0xff] }
   0x8   :  { %199 = vmatpush.bf16.msra.mxu0 %v489_v5  ;;  %529 = vmatpush.bf16.msra.mxu1 %v489_v5  ;;  %v477_v21 = vld [vmem:[%s773_s0] sm:$0xff]  ;;  %v479_v24 = vld [vmem:[%s773_s0 + $0x10] sm:$0xff]  ;;  %v480_v26 = vld [vmem:[%s773_s0 + $0x18] sm:$0xff] }
   0x9   :  { %530 = vmatpush.bf16.msra.mxu2 %v489_v5  ;;  %531 = vmatpush.bf16.msra.mxu3 %v489_v5  ;;  %v481_v25 = vld [vmem:[%s773_s0 + $0x20] sm:$0xff]  ;;  %v482_v27 = vld [vmem:[%s773_s0 + $0x28] sm:$0xff] }
   0xa   :  { %81 = vperm.xlu2 %555, %v612_v6  }
   0xb   :  { %71 = vperm.xlu1 %554, %v617_v7   ;;  %61 = vperm.xlu0 %553, %v622_v8  }
   0xc   :  { %200 = vmatpush.bf16.msra.mxu0 %v488_v9  ;;  %532 = vmatpush.bf16.msra.mxu1 %v488_v9 }
   0xd   :  { %533 = vmatpush.bf16.msra.mxu2 %v488_v9  ;;  %534 = vmatpush.bf16.msra.mxu3 %v488_v9 }
  0x10   :  { %201 = vmatpush.bf16.msra.mxu0 %v487_v10  ;;  %535 = vmatpush.bf16.msra.mxu1 %v487_v10 }
  0x11   :  { %536 = vmatpush.bf16.msra.mxu2 %v487_v10  ;;  %537 = vmatpush.bf16.msra.mxu3 %v487_v10 }
  0x12   :  { %96 = vperm.xlu2 %555, %v636_v11  }
  0x13   :  { %91 = vperm.xlu1 %554, %v641_v12   ;;  %86 = vperm.xlu0 %553, %v646_v13  }
  0x14   :  { %202 = vmatpush.bf16.msra.mxu0 %v486_v14  ;;  %538 = vmatpush.bf16.msra.mxu1 %v486_v14 }
  0x15   :  { %539 = vmatpush.bf16.msra.mxu2 %v486_v14  ;;  %540 = vmatpush.bf16.msra.mxu3 %v486_v14 }
  0x18   :  { %203 = vmatpush.bf16.msra.mxu0 %v485_v15  ;;  %541 = vmatpush.bf16.msra.mxu1 %v485_v15 }
  0x19   :  { %542 = vmatpush.bf16.msra.mxu2 %v485_v15  ;;  %543 = vmatpush.bf16.msra.mxu3 %v485_v15 }
  0x1a   :  { %111 = vperm.xlu2 %555, %v660_v16  }
  0x1b   :  { %106 = vperm.xlu1 %554, %v52_v17   ;;  %101 = vperm.xlu0 %553, %v51_v18  }
  0x1c   :  { %204 = vmatpush.bf16.msra.mxu0 %v484_v19  ;;  %544 = vmatpush.bf16.msra.mxu1 %v484_v19 }
  0x1d   :  { %545 = vmatpush.bf16.msra.mxu2 %v484_v19  ;;  %546 = vmatpush.bf16.msra.mxu3 %v484_v19 }
  0x20   :  { %205 = vmatpush.bf16.msra.mxu0 %v483_v20  ;;  %547 = vmatpush.bf16.msra.mxu1 %v483_v20 }
  0x21   :  { %548 = vmatpush.bf16.msra.mxu2 %v483_v20  ;;  %549 = vmatpush.bf16.msra.mxu3 %v483_v20 }
  0x22   :  { %558 = vset.pattern.permute.xlu2 %v563_v22 }
  0x23   :  { %557 = vset.pattern.permute.xlu1 %v563_v22  ;;  %556 = vset.pattern.permute.xlu0 %v563_v22 }
  0x24   :  { %282 = vperm.xlu2 %558, %v593_v2   ;;  %278 = vperm.xlu1 %557, %v622_v8  }
  0x25   :  { %274 = vperm.xlu0 %556, %v598_v3   ;;  %206 = vmatmul.bf16.vlgmr.msra.gmra.mxu0 %v477_v21 }
  0x26   :  { %211 = vmatmul.bf16.vlgmr.msra.gmra.mxu1 %v478_v23  ;;  %216 = vmatmul.bf16.vlgmr.msra.gmra.mxu2 %v479_v24 }
  0x27   :  { %226 = vmatmul.bf16.vlgmr.msra.gmra.mxu3 %v481_v25 }
  0x2c   :  { %290 = vperm.xlu2 %558, %v588_v1   ;;  %286 = vperm.xlu1 %557, %v617_v7  }
  0x2d   :  { %294 = vperm.xlu0 %556, %v612_v6  }
  0x34   :  { %302 = vperm.xlu2 %558, %v641_v12   ;;  %298 = vperm.xlu1 %557, %v646_v13  }
  0x35   :  { %306 = vperm.xlu0 %556, %v636_v11  }
  0x36   :  { %221 = vmatmul.bf16.gmra.mxu2 %v480_v26 }
  0x37   :  { %231 = vmatmul.bf16.gmra.mxu3 %v482_v27 }
  0x3c   :  { %314 = vperm.xlu2 %558, %v52_v17   ;;  %310 = vperm.xlu1 %557, %v51_v18  }
  0x3d   :  { %318 = vperm.xlu0 %556, %v660_v16  }
  0x44   :  { %560 = vset.pattern.permute.xlu2 %v564_v28  ;;  %559 = vset.pattern.permute.xlu1 %v564_v28 }
  0x45   :  { %561 = vset.pattern.permute.xlu0 %v564_v28  ;;  %338 = vperm.xlu2 %560, %v622_v8  }
  0x46   :  { %334 = vperm.xlu1 %559, %v598_v3   ;;  %342 = vperm.xlu0 %561, %v593_v2  }
  0x4d   :  { %350 = vperm.xlu2 %560, %v588_v1  }
  0x4e   :  { %346 = vperm.xlu1 %559, %v617_v7   ;;  %362 = vperm.xlu0 %561, %v641_v12  }
  0x55   :  { %358 = vperm.xlu2 %560, %v646_v13  }
  0x56   :  { %354 = vperm.xlu1 %559, %v612_v6   ;;  %374 = vperm.xlu0 %561, %v52_v17  }
  0x5c   :  { %v77_v29 = vpop.permute.xlu2 %76 }
  0x5d   :  { %370 = vperm.xlu2 %560, %v51_v18  }
  0x5e   :  { %366 = vperm.xlu1 %559, %v636_v11  }
  0x64   :  { %v82_v30 = vpop.permute.xlu2 %81 }
  0x66   :  { %378 = vperm.xlu1 %559, %v660_v16  }
  0x6c   :  { %v713_v31 = vpop.permute.xlu2 %96 }
  0x74   :  { %v715_v36 = vpop.permute.xlu2 %111 }
  0x75   :  { %v67_v32 = vpop.permute.xlu1 %66  ;;  %v57_v33 = vpop.permute.xlu0 %56 }
  0x7d   :  { %v72_v34 = vpop.permute.xlu1 %71  ;;  %v62_v35 = vpop.permute.xlu0 %61 }
  0x7e   :  { %v283_v39 = vpop.permute.xlu2 %282 }
  0x85   :  { %v717_v37 = vpop.permute.xlu1 %91  ;;  %v87_v38 = vpop.permute.xlu0 %86 }
  0x86   :  { %v723_v42 = vpop.permute.xlu2 %290 }
  0x8d   :  { %v719_v40 = vpop.permute.xlu1 %106  ;;  %v721_v41 = vpop.permute.xlu0 %101 }
  0x8e   :  { %v725_v45 = vpop.permute.xlu2 %302 }
  0x96   :  { %v279_v43 = vpop.permute.xlu1 %278  ;;  %v729_v49 = vpop.permute.xlu2 %314 }
  0x97   :  { %v275_v44 = vpop.permute.xlu0 %274 }
  0x9e   :  { %v287_v46 = vpop.permute.xlu1 %286 }
  0x9f   :  { %v727_v47 = vpop.permute.xlu0 %294  ;;  %v339_v60 = vpop.permute.xlu2 %338 }
  0xa2   :  { %v207_v48 = vpop.f32.mrf.mxu0 }
  0xa3   :  { %v212_v51 = vpop.f32.mrf.mxu1  ;;  %v208_v57 = vadd.f32 %v207_v48, %v57_v33 }
  0xa4   :  { %v213_v1 = vadd.f32 %v212_v51, %v67_v32 }
  0xa5   :  { %v249_v61 = vmul.f32 0.02, %v208_v57  ;;  %vm237_vm1 = vcmp.ge.f32.partialorder %v208_v57, 0.0 }
  0xa6   :  { %v731_v50 = vpop.permute.xlu1 %298  ;;  %v251_v8 = vmul.f32 0.02, %v213_v1  ;;  %vm239_vm2 = vcmp.ge.f32.partialorder %v213_v1, 0.0 }
  0xa7   :  { %v733_v53 = vpop.permute.xlu0 %306  ;;  %v261_v4 = vsel %vm237_vm1, %v208_v57, %v249_v61  ;;  %v351_v15 = vpop.permute.xlu2 %350 }
  0xa8   :  { %v321_v7 = vmul.f32 %v275_v44, %v261_v4  ;;  %v263_v20 = vsel %vm239_vm2, %v213_v1, %v251_v8 }
  0xa9   :  { %v217_v52 = vpop.f32.mrf.mxu2  ;;  %v323_v24 = vmul.f32 %v283_v39, %v263_v20 }
  0xaa   :  { %v209_v54 = vpop.f32.mrf.mxu0  ;;  %v227_v55 = vpop.f32.mrf.mxu3  ;;  %v218_v9 = vadd.f32 %v217_v52, %v77_v29 }
  0xab   :  { %v210_v56 = vadd.f32 %v209_v54, %v62_v35  ;;  %v214_v62 = vpop.f32.mrf.mxu1 }
  0xac   :  { %v215_v2 = vadd.f32 %v214_v62, %v72_v34  ;;  %v253_v18 = vmul.f32 0.02, %v218_v9  ;;  %vm241_vm4 = vcmp.ge.f32.partialorder %v218_v9, 0.0 }
  0xad   :  { %v250_v58 = vmul.f32 0.02, %v210_v56  ;;  %vm238_vm0 = vcmp.ge.f32.partialorder %v210_v56, 0.0 }
  0xae   :  { %v735_v59 = vpop.permute.xlu1 %310  ;;  %v252_v10 = vmul.f32 0.02, %v215_v2  ;;  %vm240_vm3 = vcmp.ge.f32.partialorder %v215_v2, 0.0  ;;  %v265_v27 = vsel %vm241_vm4, %v218_v9, %v253_v18 }
  0xaf   :  { %v262_v0 = vsel %vm238_vm0, %v210_v56, %v250_v58  ;;  %v737_v3 = vpop.permute.xlu0 %318  ;;  %v359_v48 = vpop.permute.xlu2 %358 }
  0xb0   :  { %v322_v5 = vmul.f32 %v279_v43, %v262_v0  ;;  %v264_v21 = vsel %vm240_vm3, %v215_v2, %v252_v10  ;;  %v228_v43 = vadd.f32 %v227_v55, %v713_v31 }
  0xb1   :  { %v219_v63 = vpop.f32.mrf.mxu2  ;;  %v324_v26 = vmul.f32 %v287_v46, %v264_v21 }
  0xb2   :  { %v229_v6 = vpop.f32.mrf.mxu3  ;;  %v382_v13 = vadd.f32 %v339_v60, %v322_v5  ;;  %v220_v19 = vadd.f32 %v219_v63, %v82_v30  ;;  %vm245_vm8 = vcmp.ge.f32.partialorder %v228_v43, 0.0  ;;  %v257_v31 = vmul.f32 0.02, %v228_v43 }
  0xb3   :  { %v230_v39 = vadd.f32 %v229_v6, %v721_v41 }
  0xb4   :  { %v254_v28 = vmul.f32 0.02, %v220_v19  ;;  %vm242_vm6 = vcmp.ge.f32.partialorder %v220_v19, 0.0 }
  0xb5   :  { %v258_v55 = vmul.f32 0.02, %v230_v39  ;;  %vm246_vm9 = vcmp.ge.f32.partialorder %v230_v39, 0.0 }
  0xb6   :  { %v266_v51 = vsel %vm242_vm6, %v220_v19, %v254_v28 }
  0xb7   :  { %v270_v0 = vsel %vm246_vm9, %v230_v39, %v258_v55  ;;  %v371_v2 = vpop.permute.xlu2 %370 }
  0xb8   :  { %v335_v11 = vpop.permute.xlu1 %334  ;;  %v343_v22 = vpop.permute.xlu0 %342  ;;  %v330_v4 = vmul.f32 %v735_v59, %v270_v0 }
  0xb9   :  { %v381_v12 = vadd.f32 %v335_v11, %v321_v7  ;;  %v222_v14 = vpop.f32.mrf.mxu2  ;;  %v383_v32 = vadd.f32 %v343_v22, %v323_v24 }
  0xba   :  { %v223_v16 = vadd.f32 %v222_v14, %v87_v38  ;;  %v232_v25 = vpop.f32.mrf.mxu3  ;;  %v325_v38 = vmul.f32 %v723_v42, %v265_v27  ;;  %v326_v42 = vmul.f32 %v727_v47, %v266_v51  ;;  %v269_v47 = vsel %vm245_vm8, %v228_v43, %v257_v31 }
  0xbb   :  { %v494_v17 = vpack.c.bf16 %v382_v13, %v381_v12  ;;  %v233_v1 = vadd.f32 %v232_v25, %v719_v40  ;;  %v329_v5 = vmul.f32 %v733_v53, %v269_v47  ;;  %v390_v8 = vadd.f32 %v371_v2, %v330_v4 }
  0xbc   :  { %v255_v23 = vmul.f32 0.02, %v223_v16  ;;  %vm243_vm5 = vcmp.ge.f32.partialorder %v223_v16, 0.0  ;;  %v385_v41 = vadd.f32 %v351_v15, %v325_v38 }
  0xbd   :  { %495 = vst [vmem:[%s774_s3] sm:$0xff] %v494_v17   ;;  %v259_v6 = vmul.f32 0.02, %v233_v1  ;;  %vm247_vm10 = vcmp.ge.f32.partialorder %v233_v1, 0.0 }
  0xbe   :  { %v267_v34 = vsel %vm243_vm5, %v223_v16, %v255_v23 }
  0xbf   :  { %v327_v52 = vmul.f32 %v731_v50, %v267_v34  ;;  %v271_v10 = vsel %vm247_vm10, %v233_v1, %v259_v6 }
  0xc0   :  { %v347_v29 = vpop.permute.xlu1 %346  ;;  %v363_v56 = vpop.permute.xlu0 %362  ;;  %v331_v13 = vmul.f32 %v729_v49, %v271_v10 }
  0xc1   :  { %v384_v33 = vadd.f32 %v347_v29, %v324_v26  ;;  %v224_v30 = vpop.f32.mrf.mxu2  ;;  %v387_v58 = vadd.f32 %v359_v48, %v327_v52 }
  0xc2   :  { %v225_v35 = vadd.f32 %v224_v30, %v717_v37  ;;  %v234_v61 = vpop.f32.mrf.mxu3 }
  0xc3   :  { %v499_v44 = vpack.c.bf16 %v384_v33, %v383_v32 }
  0xc4   :  { %vm244_vm7 = vcmp.ge.f32.partialorder %v225_v35, 0.0  ;;  %v256_v46 = vmul.f32 0.02, %v225_v35 }
  0xc5   :  { %521 = vst [vmem:[%s774_s3 + $0x8] sm:$0xff] %v499_v44  }
  0xc6   :  { %v268_v54 = vsel %vm244_vm7, %v225_v35, %v256_v46 }
  0xc7   :  { %v328_v37 = vmul.f32 %v725_v45, %v268_v54  ;;  %v235_v45 = vadd.f32 %v234_v61, %v715_v36 }
  0xc8   :  { %v355_v57 = vpop.permute.xlu1 %354  ;;  %v375_v12 = vpop.permute.xlu0 %374 }
  0xc9   :  { %v388_v60 = vadd.f32 %v363_v56, %v328_v37  ;;  %v386_v50 = vadd.f32 %v355_v57, %v326_v42  ;;  %v260_v7 = vmul.f32 0.02, %v235_v45  ;;  %vm248_vm11 = vcmp.ge.f32.partialorder %v235_v45, 0.0 }
  0xca   :  { %v391_v14 = vadd.f32 %v375_v12, %v331_v13 }
  0xcb   :  { %v509_v62 = vpack.c.bf16 %v388_v60, %v387_v58  ;;  %v504_v63 = vpack.c.bf16 %v386_v50, %v385_v41  ;;  %v272_v11 = vsel %vm248_vm11, %v235_v45, %v260_v7 }
  0xcc   :  { %v332_v59 = vmul.f32 %v737_v3, %v272_v11 }
  0xcd   :  { %523 = vst [vmem:[%s774_s3 + $0x18] sm:$0xff] %v509_v62  }
  0xce   :  { %522 = vst [vmem:[%s774_s3 + $0x10] sm:$0xff] %v504_v63  }
  0xd0   :  { %v367_v40 = vpop.permute.xlu1 %366 }
  0xd1   :  { %v389_v36 = vadd.f32 %v367_v40, %v329_v5 }
  0xd3   :  { %v514_v9 = vpack.c.bf16 %v390_v8, %v389_v36 }
  0xd5   :  { %524 = vst [vmem:[%s774_s3 + $0x20] sm:$0xff] %v514_v9  }
  0xd8   :  { %v379_v53 = vpop.permute.xlu1 %378 }
  0xd9   :  { %v392_v15 = vadd.f32 %v379_v53, %v332_v59 }
  0xdb   :  { %v519_v16 = vpack.c.bf16 %v392_v15, %v391_v14 }
  0xdd   :  { %525 = vst [vmem:[%s774_s3 + $0x28] sm:$0xff] %v519_v16  }

// kernel: nowcasting_forward.38
= control target key start
LH: loop header
LB: loop body
LE: loop exit
PB: predicated region body
PF: predicated region fallthrough
CT: control target
= control target key end

     0   :  { %v474_v6 = vmov 0   ;;  %v475_v7 = vmov 1   ;;  %v476_v8 = vmov 2   ;;  %s604_s1 = inlined_call_operand.vmem [shape: bf16[384,128], index: 1, kind: input, shape index: {}]   ;;  %s605_s2 = inlined_call_operand.vmem [shape: f32[16,3], index: 2, kind: input, shape index: {}]   ;;  %s606_s0 = inlined_call_operand.vmem [shape: bf16[16,384], index: 0, kind: input, shape index: {}]   ;;  %s607_s3 = inlined_call_operand.vmem [shape: bf16[16,128], index: 3, kind: input, shape index: {}]   ;;  %s608_s4 = inlined_call_operand.vmem [shape: bf16[16,128], index: 4, kind: output, shape index: {}]  }
   0x1   :  { %v441_v0 = vld [vmem:[%s604_s1 + $0x38] sm:$0xff]  ;;  %v440_v3 = vld [vmem:[%s604_s1 + $0x30] sm:$0xff]  ;;  %470 = vset.pattern.permute.xlu0 %v474_v6  ;;  %471 = vset.pattern.permute.xlu1 %v475_v7  ;;  %v439_v9 = vld [vmem:[%s604_s1 + $0x28] sm:$0xff] }
   0x2   :  { %v449_v1 = vld [vmem:[%s604_s1 + $0x78] sm:$0xff]  ;;  %241 = vmatpush.bf16.msra.mxu0 %v441_v0  ;;  %v448_v4 = vld [vmem:[%s604_s1 + $0x70] sm:$0xff]  ;;  %472 = vset.pattern.permute.xlu2 %v476_v8  ;;  %v447_v10 = vld [vmem:[%s604_s1 + $0x68] sm:$0xff] }
   0x3   :  { %v457_v2 = vld [vmem:[%s604_s1 + $0xb8] sm:$0xff]  ;;  %255 = vmatpush.bf16.msra.mxu1 %v449_v1  ;;  %v456_v5 = vld [vmem:[%s604_s1 + $0xb0] sm:$0xff]  ;;  %v455_v11 = vld [vmem:[%s604_s1 + $0xa8] sm:$0xff] }
   0x4   :  { %269 = vmatpush.bf16.msra.mxu2 %v457_v2  ;;  %v438_v12 = vld [vmem:[%s604_s1 + $0x20] sm:$0xff]  ;;  %v437_v16 = vld [vmem:[%s604_s1 + $0x18] sm:$0xff]  ;;  %v70_v19 = vld [vmem:[%s605_s2 + $0x8] sm:$0xff] }
   0x5   :  { %v446_v13 = vld [vmem:[%s604_s1 + $0x60] sm:$0xff]  ;;  %v445_v17 = vld [vmem:[%s604_s1 + $0x58] sm:$0xff]  ;;  %v436_v20 = vld [vmem:[%s604_s1 + $0x10] sm:$0xff] }
   0x6   :  { %242 = vmatpush.bf16.msra.mxu0 %v440_v3  ;;  %v69_v14 = vld [vmem:[%s605_s2] sm:$0xff]  ;;  %v453_v18 = vld [vmem:[%s604_s1 + $0x98] sm:$0xff]  ;;  %v444_v21 = vld [vmem:[%s604_s1 + $0x50] sm:$0xff] }
   0x7   :  { %256 = vmatpush.bf16.msra.mxu1 %v448_v4  ;;  %v454_v15 = vld [vmem:[%s604_s1 + $0xa0] sm:$0xff]  ;;  %73 = vperm.xlu0 %470, %v69_v14   ;;  %v452_v22 = vld [vmem:[%s604_s1 + $0x90] sm:$0xff]  ;;  %v435_v23 = vld [vmem:[%s604_s1 + $0x8] sm:$0xff] }
   0x8   :  { %270 = vmatpush.bf16.msra.mxu2 %v456_v5  ;;  %290 = vperm.xlu1 %471, %v69_v14   ;;  %v443_v24 = vld [vmem:[%s604_s1 + $0x48] sm:$0xff]  ;;  %v434_v26 = vld [vmem:[%s604_s1] sm:$0xff]  ;;  %v327_v31 = vld [vmem:[%s606_s0 + $0xc] sm:$0xf0] }
   0x9   :  { %300 = vperm.xlu2 %472, %v69_v14   ;;  %v451_v25 = vld [vmem:[%s604_s1 + $0x88] sm:$0xff]  ;;  %v442_v27 = vld [vmem:[%s604_s1 + $0x40] sm:$0xff]  ;;  %v433_v34 = vld [vmem:[%s606_s0 + $0x10] sm:$0xf0] }
   0xa   :  { %243 = vmatpush.bf16.msra.mxu0 %v439_v9  ;;  %v325_v28 = vld [vmem:[%s606_s0] sm:$0xf]  ;;  %v432_v29 = vld [vmem:[%s606_s0 + $0x8] sm:$0xf0]  ;;  %v431_v30 = vld [vmem:[%s606_s0 + $0x4] sm:$0xf] }
   0xb   :  { %257 = vmatpush.bf16.msra.mxu1 %v447_v10  ;;  %v450_v32 = vld [vmem:[%s604_s1 + $0x80] sm:$0xff]  ;;  %v333_v33 = vld [vmem:[%s606_s0 + $0x8] sm:$0xf]  ;;  %v326_v35 = vor.u32 %v432_v29, %v325_v28  ;;  %v330_v36 = vor.u32 %v431_v30, %v327_v31 }
   0xc   :  { %271 = vmatpush.bf16.msra.mxu2 %v455_v11  ;;  %v334_v37 = vor.u32 %v433_v34, %v333_v33  ;;  %v459_v57 = vld [vmem:[%s607_s3] sm:$0xff]  }
   0xd   :  { %v460_v62 = vunpack.c.l.bf16 %v459_v57  ;;  %v461_v0 = vunpack.c.h.bf16 %v459_v57 }
   0xe   :  { %244 = vmatpush.bf16.msra.mxu0 %v438_v12 }
   0xf   :  { %258 = vmatpush.bf16.msra.mxu1 %v446_v13  ;;  %78 = vperm.xlu0 %470, %v70_v19  }
  0x10   :  { %272 = vmatpush.bf16.msra.mxu2 %v454_v15  ;;  %294 = vperm.xlu1 %471, %v70_v19  }
  0x11   :  { %304 = vperm.xlu2 %472, %v70_v19  }
  0x12   :  { %245 = vmatpush.bf16.msra.mxu0 %v437_v16 }
  0x13   :  { %259 = vmatpush.bf16.msra.mxu1 %v445_v17 }
  0x14   :  { %273 = vmatpush.bf16.msra.mxu2 %v453_v18 }
  0x16   :  { %246 = vmatpush.bf16.msra.mxu0 %v436_v20 }
  0x17   :  { %260 = vmatpush.bf16.msra.mxu1 %v444_v21  ;;  %473 = vset.pattern.permute.xlu0 %v476_v8 }
  0x18   :  { %274 = vmatpush.bf16.msra.mxu2 %v452_v22 }
  0x1a   :  { %247 = vmatpush.bf16.msra.mxu0 %v435_v23 }
  0x1b   :  { %261 = vmatpush.bf16.msra.mxu1 %v443_v24 }
  0x1c   :  { %275 = vmatpush.bf16.msra.mxu2 %v451_v25 }
  0x1e   :  { %248 = vmatpush.bf16.msra.mxu0 %v434_v26 }
  0x1f   :  { %262 = vmatpush.bf16.msra.mxu1 %v442_v27 }
  0x20   :  { %276 = vmatpush.bf16.msra.mxu2 %v450_v32 }
  0x21   :  { %249 = vmatmul.bf16.vlgmr.msra.gmra.mxu0 %v326_v35 }
  0x22   :  { %263 = vmatmul.bf16.vlgmr.msra.gmra.mxu1 %v330_v36 }
  0x23   :  { %277 = vmatmul.bf16.vlgmr.msra.gmra.mxu2 %v334_v37 }
  0x63   :  { %v301_v50 = vpop.permute.xlu2 %300 }
  0x6b   :  { %v305_v1 = vpop.permute.xlu2 %304 }
  0x79   :  { %v74_v38 = vpop.permute.xlu0 %73 }
  0x7a   :  { %v291_v47 = vpop.permute.xlu1 %290 }
  0x81   :  { %v79_v46 = vpop.permute.xlu0 %78 }
  0x82   :  { %v295_v59 = vpop.permute.xlu1 %294 }
  0x9e   :  { %v250_v39 = vpop.f32.mrf.mxu0 }
  0x9f   :  { %v251_v40 = vadd.f32 %v250_v39, %v74_v38  ;;  %v264_v41 = vpop.f32.mrf.mxu1 }
  0xa1   :  { %v265_v42 = vadd.f32 %v264_v41, %v251_v40 }
  0xa6   :  { %v278_v43 = vpop.f32.mrf.mxu2  ;;  %v252_v45 = vpop.f32.mrf.mxu0 }
  0xa7   :  { %v279_v44 = vadd.f32 %v278_v43, %v265_v42  ;;  %v253_v49 = vadd.f32 %v252_v45, %v79_v46  ;;  %v266_v51 = vpop.f32.mrf.mxu1 }
  0xa9   :  { %v285_v48 = vmul.f32 0.02, %v279_v44  ;;  %vm283_vm0 = vcmp.ge.f32.partialorder %v279_v44, 0.0  ;;  %v267_v53 = vadd.f32 %v266_v51, %v253_v49 }
  0xab   :  { %v287_v52 = vsel %vm283_vm0, %v279_v44, %v285_v48 }
  0xac   :  { %v297_v56 = vmul.f32 %v291_v47, %v287_v52 }
  0xae   :  { %v280_v54 = vpop.f32.mrf.mxu2  ;;  %v307_v61 = vadd.f32 %v301_v50, %v297_v56 }
  0xaf   :  { %v281_v55 = vadd.f32 %v280_v54, %v267_v53 }
  0xb0   :  { %v313_v3 = vadd.f32 %v460_v62, %v307_v61 }
  0xb1   :  { %vm284_vm1 = vcmp.ge.f32.partialorder %v281_v55, 0.0  ;;  %v286_v58 = vmul.f32 0.02, %v281_v55 }
  0xb3   :  { %v288_v60 = vsel %vm284_vm1, %v281_v55, %v286_v58 }
  0xb4   :  { %v298_v63 = vmul.f32 %v295_v59, %v288_v60 }
  0xb6   :  { %v308_v2 = vadd.f32 %v305_v1, %v298_v63 }
  0xb8   :  { %v314_v4 = vadd.f32 %v461_v0, %v308_v2 }
  0xba   :  { %v465_v5 = vpack.c.bf16 %v314_v4, %v313_v3 }
  0xbc   :  { %466 = vst [vmem:[%s608_s4] sm:$0xff] %v465_v5  }

// kernel: nowcasting_forward.39
= control target key start
LH: loop header
LB: loop body
LE: loop exit
PB: predicated region body
PF: predicated region fallthrough
CT: control target
= control target key end

     0   :  { %v430_v0 = vmov 0   ;;  %v431_v15 = vmov 1   ;;  %v432_v22 = vmov 2   ;;  %s556_s2 = inlined_call_operand.vmem [shape: f32[64,3], index: 2, kind: input, shape index: {}]   ;;  %s557_s1 = inlined_call_operand.vmem [shape: bf16[128,128], index: 1, kind: input, shape index: {}]   ;;  %s558_s0 = inlined_call_operand.vmem [shape: bf16[64,128], index: 0, kind: input, shape index: {}]   ;;  %s559_s3 = inlined_call_operand.vmem [shape: bf16[64,128], index: 3, kind: output, shape index: {}]  }
   0x1   :  { %422 = vset.pattern.permute.xlu1 %v430_v0  ;;  %421 = vset.pattern.permute.xlu0 %v430_v0  ;;  %v456_v1 = vld [vmem:[%s556_s2 + $0x10] sm:$0xff]  ;;  %v461_v2 = vld [vmem:[%s556_s2] sm:$0xff]  ;;  %v370_v3 = vld [vmem:[%s557_s1 + $0x38] sm:$0xff] }
   0x2   :  { %58 = vperm.xlu1 %422, %v456_v1   ;;  %48 = vperm.xlu0 %421, %v461_v2   ;;  %v369_v4 = vld [vmem:[%s557_s1 + $0x30] sm:$0xff]  ;;  %v474_v5 = vld [vmem:[%s556_s2 + $0x20] sm:$0xff]  ;;  %v480_v6 = vld [vmem:[%s556_s2 + $0x18] sm:$0xff] }
   0x3   :  { %158 = vmatpush.bf16.msra.mxu0 %v370_v3  ;;  %394 = vmatpush.bf16.msra.mxu1 %v370_v3  ;;  %v485_v7 = vld [vmem:[%s556_s2 + $0x8] sm:$0xff]  ;;  %v367_v9 = vld [vmem:[%s557_s1 + $0x20] sm:$0xff]  ;;  %v45_v11 = vld [vmem:[%s556_s2 + $0x38] sm:$0xff] }
   0x4   :  { %395 = vmatpush.bf16.msra.mxu2 %v370_v3  ;;  %396 = vmatpush.bf16.msra.mxu3 %v370_v3  ;;  %v368_v8 = vld [vmem:[%s557_s1 + $0x28] sm:$0xff]  ;;  %v44_v12 = vld [vmem:[%s556_s2 + $0x30] sm:$0xff]  ;;  %v366_v13 = vld [vmem:[%s557_s1 + $0x18] sm:$0xff] }
   0x5   :  { %423 = vset.pattern.permute.xlu2 %v430_v0  ;;  %v43_v10 = vld [vmem:[%s556_s2 + $0x28] sm:$0xff]  ;;  %v365_v14 = vld [vmem:[%s557_s1 + $0x10] sm:$0xff]  ;;  %v363_v17 = vld [vmem:[%s557_s1] sm:$0xff] }
   0x6   :  { %68 = vperm.xlu2 %423, %v474_v5   ;;  %v364_v16 = vld [vmem:[%s557_s1 + $0x8] sm:$0xff]  ;;  %v359_v18 = vld [vmem:[%s558_s0] sm:$0xff]  ;;  %v361_v20 = vld [vmem:[%s558_s0 + $0x10] sm:$0xff] }
   0x7   :  { %159 = vmatpush.bf16.msra.mxu0 %v369_v4  ;;  %397 = vmatpush.bf16.msra.mxu1 %v369_v4  ;;  %v360_v19 = vld [vmem:[%s558_s0 + $0x8] sm:$0xff]  ;;  %v362_v21 = vld [vmem:[%s558_s0 + $0x18] sm:$0xff] }
   0x8   :  { %398 = vmatpush.bf16.msra.mxu2 %v369_v4  ;;  %399 = vmatpush.bf16.msra.mxu3 %v369_v4 }
   0xa   :  { %63 = vperm.xlu1 %422, %v480_v6   ;;  %53 = vperm.xlu0 %421, %v485_v7  }
   0xb   :  { %160 = vmatpush.bf16.msra.mxu0 %v368_v8  ;;  %400 = vmatpush.bf16.msra.mxu1 %v368_v8 }
   0xc   :  { %401 = vmatpush.bf16.msra.mxu2 %v368_v8  ;;  %402 = vmatpush.bf16.msra.mxu3 %v368_v8 }
   0xe   :  { %73 = vperm.xlu2 %423, %v43_v10  }
   0xf   :  { %161 = vmatpush.bf16.msra.mxu0 %v367_v9  ;;  %403 = vmatpush.bf16.msra.mxu1 %v367_v9 }
  0x10   :  { %404 = vmatpush.bf16.msra.mxu2 %v367_v9  ;;  %405 = vmatpush.bf16.msra.mxu3 %v367_v9 }
  0x12   :  { %83 = vperm.xlu1 %422, %v45_v11   ;;  %78 = vperm.xlu0 %421, %v44_v12  }
  0x13   :  { %162 = vmatpush.bf16.msra.mxu0 %v366_v13  ;;  %406 = vmatpush.bf16.msra.mxu1 %v366_v13 }
  0x14   :  { %407 = vmatpush.bf16.msra.mxu2 %v366_v13  ;;  %408 = vmatpush.bf16.msra.mxu3 %v366_v13 }
  0x16   :  { %424 = vset.pattern.permute.xlu2 %v431_v15 }
  0x17   :  { %163 = vmatpush.bf16.msra.mxu0 %v365_v14  ;;  %409 = vmatpush.bf16.msra.mxu1 %v365_v14 }
  0x18   :  { %410 = vmatpush.bf16.msra.mxu2 %v365_v14  ;;  %411 = vmatpush.bf16.msra.mxu3 %v365_v14 }
  0x19   :  { %212 = vperm.xlu2 %424, %v461_v2  }
  0x1a   :  { %426 = vset.pattern.permute.xlu1 %v431_v15  ;;  %425 = vset.pattern.permute.xlu0 %v431_v15 }
  0x1b   :  { %220 = vperm.xlu1 %426, %v456_v1   ;;  %164 = vmatpush.bf16.msra.mxu0 %v364_v16 }
  0x1c   :  { %412 = vmatpush.bf16.msra.mxu1 %v364_v16  ;;  %413 = vmatpush.bf16.msra.mxu2 %v364_v16 }
  0x1d   :  { %414 = vmatpush.bf16.msra.mxu3 %v364_v16  ;;  %216 = vperm.xlu0 %425, %v485_v7  }
  0x1f   :  { %165 = vmatpush.bf16.msra.mxu0 %v363_v17 }
  0x20   :  { %415 = vmatpush.bf16.msra.mxu1 %v363_v17  ;;  %416 = vmatpush.bf16.msra.mxu2 %v363_v17 }
  0x21   :  { %417 = vmatpush.bf16.msra.mxu3 %v363_v17  ;;  %224 = vperm.xlu2 %424, %v480_v6  }
  0x22   :  { %166 = vmatmul.bf16.vlgmr.msra.gmra.mxu0 %v359_v18 }
  0x23   :  { %228 = vperm.xlu1 %426, %v474_v5   ;;  %171 = vmatmul.bf16.vlgmr.msra.gmra.mxu1 %v360_v19 }
  0x24   :  { %176 = vmatmul.bf16.vlgmr.msra.gmra.mxu2 %v361_v20  ;;  %181 = vmatmul.bf16.vlgmr.msra.gmra.mxu3 %v362_v21 }
  0x25   :  { %236 = vperm.xlu0 %425, %v44_v12  }
  0x29   :  { %232 = vperm.xlu2 %424, %v43_v10  }
  0x2b   :  { %240 = vperm.xlu1 %426, %v45_v11  }
  0x2d   :  { %428 = vset.pattern.permute.xlu0 %v432_v22 }
  0x2e   :  { %256 = vperm.xlu0 %428, %v485_v7  }
  0x31   :  { %427 = vset.pattern.permute.xlu2 %v432_v22 }
  0x32   :  { %252 = vperm.xlu2 %427, %v461_v2  }
  0x33   :  { %429 = vset.pattern.permute.xlu1 %v432_v22 }
  0x34   :  { %260 = vperm.xlu1 %429, %v456_v1  }
  0x36   :  { %276 = vperm.xlu0 %428, %v44_v12  }
  0x3a   :  { %264 = vperm.xlu2 %427, %v480_v6  }
  0x3c   :  { %268 = vperm.xlu1 %429, %v474_v5  }
  0x42   :  { %272 = vperm.xlu2 %427, %v43_v10  }
  0x44   :  { %280 = vperm.xlu1 %429, %v45_v11  }
  0x60   :  { %v69_v23 = vpop.permute.xlu2 %68 }
  0x68   :  { %v74_v25 = vpop.permute.xlu2 %73 }
  0x73   :  { %v213_v28 = vpop.permute.xlu2 %212 }
  0x74   :  { %v59_v24 = vpop.permute.xlu1 %58  ;;  %v49_v26 = vpop.permute.xlu0 %48 }
  0x7b   :  { %v225_v32 = vpop.permute.xlu2 %224 }
  0x7c   :  { %v64_v27 = vpop.permute.xlu1 %63  ;;  %v54_v30 = vpop.permute.xlu0 %53 }
  0x83   :  { %v233_v36 = vpop.permute.xlu2 %232 }
  0x84   :  { %v84_v29 = vpop.permute.xlu1 %83  ;;  %v79_v33 = vpop.permute.xlu0 %78 }
  0x8c   :  { %v253_v43 = vpop.permute.xlu2 %252 }
  0x8d   :  { %v221_v31 = vpop.permute.xlu1 %220 }
  0x8f   :  { %v217_v35 = vpop.permute.xlu0 %216 }
  0x94   :  { %v265_v62 = vpop.permute.xlu2 %264 }
  0x95   :  { %v538_v34 = vpop.permute.xlu1 %228 }
  0x97   :  { %v237_v41 = vpop.permute.xlu0 %236 }
  0x9d   :  { %v540_v37 = vpop.permute.xlu1 %240 }
  0x9f   :  { %v167_v38 = vpop.f32.mrf.mxu0 }
  0xa0   :  { %v168_v39 = vadd.f32 %v167_v38, %v49_v26  ;;  %v172_v40 = vpop.f32.mrf.mxu1  ;;  %v257_v59 = vpop.permute.xlu0 %256 }
  0xa1   :  { %v173_v42 = vadd.f32 %v172_v40, %v59_v24  ;;  %v273_v26 = vpop.permute.xlu2 %272 }
  0xa2   :  { %v195_v44 = vmul.f32 0.02, %v168_v39  ;;  %vm187_vm0 = vcmp.ge.f32.partialorder %v168_v39, 0.0 }
  0xa3   :  { %v197_v45 = vmul.f32 0.02, %v173_v42  ;;  %vm189_vm1 = vcmp.ge.f32.partialorder %v173_v42, 0.0 }
  0xa4   :  { %v203_v47 = vsel %vm187_vm0, %v168_v39, %v195_v44 }
  0xa5   :  { %v205_v48 = vsel %vm189_vm1, %v173_v42, %v197_v45  ;;  %v243_v57 = vmul.f32 %v213_v28, %v203_v47 }
  0xa6   :  { %v261_v46 = vpop.permute.xlu1 %260  ;;  %v245_v58 = vmul.f32 %v221_v31, %v205_v48 }
  0xa7   :  { %v177_v49 = vpop.f32.mrf.mxu2  ;;  %v182_v50 = vpop.f32.mrf.mxu3  ;;  %v283_v6 = vadd.f32 %v253_v43, %v243_v57 }
  0xa8   :  { %v169_v51 = vpop.f32.mrf.mxu0  ;;  %v174_v52 = vpop.f32.mrf.mxu1  ;;  %v178_v53 = vadd.f32 %v177_v49, %v69_v23  ;;  %v183_v54 = vadd.f32 %v182_v50, %v79_v33  ;;  %v285_v7 = vadd.f32 %v261_v46, %v245_v58 }
  0xa9   :  { %v170_v55 = vadd.f32 %v169_v51, %v54_v30  ;;  %v175_v56 = vadd.f32 %v174_v52, %v64_v27  ;;  %v277_v22 = vpop.permute.xlu0 %276 }
  0xaa   :  { %v199_v63 = vmul.f32 0.02, %v178_v53  ;;  %v201_v0 = vmul.f32 0.02, %v183_v54  ;;  %vm191_vm4 = vcmp.ge.f32.partialorder %v178_v53, 0.0  ;;  %vm193_vm5 = vcmp.ge.f32.partialorder %v183_v54, 0.0 }
  0xab   :  { %vm188_vm2 = vcmp.ge.f32.partialorder %v170_v55, 0.0  ;;  %v196_v60 = vmul.f32 0.02, %v170_v55  ;;  %vm190_vm3 = vcmp.ge.f32.partialorder %v175_v56, 0.0  ;;  %v198_v61 = vmul.f32 0.02, %v175_v56 }
  0xac   :  { %v209_v14 = vsel %vm193_vm5, %v183_v54, %v201_v0  ;;  %v207_v15 = vsel %vm191_vm4, %v178_v53, %v199_v63 }
  0xad   :  { %v204_v1 = vsel %vm188_vm2, %v170_v55, %v196_v60  ;;  %v206_v2 = vsel %vm190_vm3, %v175_v56, %v198_v61  ;;  %v249_v20 = vmul.f32 %v237_v41, %v209_v14  ;;  %v247_v23 = vmul.f32 %v538_v34, %v207_v15 }
  0xae   :  { %v244_v3 = vmul.f32 %v217_v35, %v204_v1  ;;  %v246_v4 = vmul.f32 %v225_v32, %v206_v2  ;;  %v269_v5 = vpop.permute.xlu1 %268 }
  0xaf   :  { %v179_v8 = vpop.f32.mrf.mxu2  ;;  %v184_v9 = vpop.f32.mrf.mxu3  ;;  %v289_v31 = vadd.f32 %v277_v22, %v249_v20 }
  0xb0   :  { %v284_v10 = vadd.f32 %v257_v59, %v244_v3  ;;  %v286_v11 = vadd.f32 %v265_v62, %v246_v4  ;;  %v180_v12 = vadd.f32 %v179_v8, %v74_v25  ;;  %v185_v13 = vadd.f32 %v184_v9, %v84_v29 }
  0xb1   :  { %v287_v29 = vadd.f32 %v269_v5, %v247_v23 }
  0xb2   :  { %v374_v16 = vpack.c.bf16 %v284_v10, %v283_v6  ;;  %v379_v17 = vpack.c.bf16 %v286_v11, %v285_v7  ;;  %vm192_vm6 = vcmp.ge.f32.partialorder %v180_v12, 0.0  ;;  %v200_v18 = vmul.f32 0.02, %v180_v12 }
  0xb3   :  { %vm194_vm7 = vcmp.ge.f32.partialorder %v185_v13, 0.0  ;;  %v202_v19 = vmul.f32 0.02, %v185_v13 }
  0xb4   :  { %v208_v21 = vsel %vm192_vm6, %v180_v12, %v200_v18  ;;  %375 = vst [vmem:[%s559_s3] sm:$0xff] %v374_v16  }
  0xb5   :  { %v248_v24 = vmul.f32 %v233_v36, %v208_v21  ;;  %v210_v25 = vsel %vm194_vm7, %v185_v13, %v202_v19  ;;  %391 = vst [vmem:[%s559_s3 + $0x8] sm:$0xff] %v379_v17  }
  0xb6   :  { %v281_v27 = vpop.permute.xlu1 %280  ;;  %v250_v28 = vmul.f32 %v540_v37, %v210_v25 }
  0xb7   :  { %v288_v30 = vadd.f32 %v273_v26, %v248_v24 }
  0xb8   :  { %v290_v32 = vadd.f32 %v281_v27, %v250_v28 }
  0xb9   :  { %v384_v33 = vpack.c.bf16 %v288_v30, %v287_v29 }
  0xba   :  { %v389_v35 = vpack.c.bf16 %v290_v32, %v289_v31 }
  0xbb   :  { %392 = vst [vmem:[%s559_s3 + $0x10] sm:$0xff] %v384_v33  }
  0xbc   :  { %393 = vst [vmem:[%s559_s3 + $0x18] sm:$0xff] %v389_v35  }

// kernel: nowcasting_forward.41
= control target key start
LH: loop header
LB: loop body
LE: loop exit
PB: predicated region body
PF: predicated region fallthrough
CT: control target
= control target key end

     0   :  { %v343_v4 = vmov 0   ;;  %v344_v5 = vmov 1   ;;  %v345_v6 = vmov 2   ;;  %s443_s1 = inlined_call_operand.vmem [shape: bf16[256,128], index: 1, kind: input, shape index: {}]   ;;  %s444_s2 = inlined_call_operand.vmem [shape: f32[16,3], index: 2, kind: input, shape index: {}]   ;;  %s445_s0 = inlined_call_operand.vmem [shape: bf16[16,256], index: 0, kind: input, shape index: {}]   ;;  %s446_s3 = inlined_call_operand.vmem [shape: bf16[16,128], index: 3, kind: input, shape index: {}]   ;;  %s447_s4 = inlined_call_operand.vmem [shape: bf16[16,128], index: 4, kind: output, shape index: {}]  }
   0x1   :  { %v318_v0 = vld [vmem:[%s443_s1 + $0x38] sm:$0xff]  ;;  %v317_v2 = vld [vmem:[%s443_s1 + $0x30] sm:$0xff]  ;;  %339 = vset.pattern.permute.xlu0 %v343_v4  ;;  %340 = vset.pattern.permute.xlu1 %v344_v5  ;;  %v316_v7 = vld [vmem:[%s443_s1 + $0x28] sm:$0xff] }
   0x2   :  { %v326_v1 = vld [vmem:[%s443_s1 + $0x78] sm:$0xff]  ;;  %169 = vmatpush.bf16.msra.mxu0 %v318_v0  ;;  %v325_v3 = vld [vmem:[%s443_s1 + $0x70] sm:$0xff]  ;;  %341 = vset.pattern.permute.xlu2 %v345_v6  ;;  %v324_v8 = vld [vmem:[%s443_s1 + $0x68] sm:$0xff] }
   0x3   :  { %183 = vmatpush.bf16.msra.mxu1 %v326_v1  ;;  %v51_v9 = vld [vmem:[%s444_s2] sm:$0xff]  ;;  %v52_v12 = vld [vmem:[%s444_s2 + $0x8] sm:$0xff]  ;;  %v314_v13 = vld [vmem:[%s443_s1 + $0x18] sm:$0xff] }
   0x4   :  { %55 = vperm.xlu0 %339, %v51_v9   ;;  %204 = vperm.xlu1 %340, %v51_v9   ;;  %v315_v10 = vld [vmem:[%s443_s1 + $0x20] sm:$0xff]  ;;  %v322_v14 = vld [vmem:[%s443_s1 + $0x58] sm:$0xff]  ;;  %v313_v15 = vld [vmem:[%s443_s1 + $0x10] sm:$0xff] }
   0x5   :  { %214 = vperm.xlu2 %341, %v51_v9   ;;  %v323_v11 = vld [vmem:[%s443_s1 + $0x60] sm:$0xff]  ;;  %v321_v16 = vld [vmem:[%s443_s1 + $0x50] sm:$0xff]  ;;  %v312_v17 = vld [vmem:[%s443_s1 + $0x8] sm:$0xff] }
   0x6   :  { %170 = vmatpush.bf16.msra.mxu0 %v317_v2  ;;  %v320_v18 = vld [vmem:[%s443_s1 + $0x48] sm:$0xff]  ;;  %v311_v19 = vld [vmem:[%s443_s1] sm:$0xff] }
   0x7   :  { %184 = vmatpush.bf16.msra.mxu1 %v325_v3  ;;  %v319_v20 = vld [vmem:[%s443_s1 + $0x40] sm:$0xff]  ;;  %v310_v22 = vld [vmem:[%s445_s0 + $0x4] sm:$0xf0]  ;;  %v241_v24 = vld [vmem:[%s445_s0 + $0x8] sm:$0xf0] }
   0x8   :  { %v239_v21 = vld [vmem:[%s445_s0] sm:$0xf]  ;;  %v309_v23 = vld [vmem:[%s445_s0 + $0x4] sm:$0xf] }
   0x9   :  { %v240_v25 = vor.u32 %v310_v22, %v239_v21  ;;  %v244_v26 = vor.u32 %v309_v23, %v241_v24  ;;  %v328_v42 = vld [vmem:[%s446_s3] sm:$0xff]  }
   0xa   :  { %171 = vmatpush.bf16.msra.mxu0 %v316_v7  ;;  %v329_v46 = vunpack.c.l.bf16 %v328_v42  ;;  %v330_v48 = vunpack.c.h.bf16 %v328_v42 }
   0xb   :  { %185 = vmatpush.bf16.msra.mxu1 %v324_v8 }
   0xc   :  { %60 = vperm.xlu0 %339, %v52_v12   ;;  %208 = vperm.xlu1 %340, %v52_v12  }
   0xd   :  { %218 = vperm.xlu2 %341, %v52_v12  }
   0xe   :  { %172 = vmatpush.bf16.msra.mxu0 %v315_v10 }
   0xf   :  { %186 = vmatpush.bf16.msra.mxu1 %v323_v11 }
  0x12   :  { %173 = vmatpush.bf16.msra.mxu0 %v314_v13 }
  0x13   :  { %187 = vmatpush.bf16.msra.mxu1 %v322_v14 }
  0x14   :  { %342 = vset.pattern.permute.xlu0 %v345_v6 }
  0x16   :  { %174 = vmatpush.bf16.msra.mxu0 %v313_v15 }
  0x17   :  { %188 = vmatpush.bf16.msra.mxu1 %v321_v16 }
  0x1a   :  { %175 = vmatpush.bf16.msra.mxu0 %v312_v17 }
  0x1b   :  { %189 = vmatpush.bf16.msra.mxu1 %v320_v18 }
  0x1e   :  { %176 = vmatpush.bf16.msra.mxu0 %v311_v19 }
  0x1f   :  { %190 = vmatpush.bf16.msra.mxu1 %v319_v20 }
  0x21   :  { %177 = vmatmul.bf16.vlgmr.msra.gmra.mxu0 %v240_v25 }
  0x22   :  { %191 = vmatmul.bf16.vlgmr.msra.gmra.mxu1 %v244_v26 }
  0x5f   :  { %v215_v34 = vpop.permute.xlu2 %214 }
  0x67   :  { %v219_v50 = vpop.permute.xlu2 %218 }
  0x76   :  { %v56_v27 = vpop.permute.xlu0 %55  ;;  %v205_v32 = vpop.permute.xlu1 %204 }
  0x7e   :  { %v61_v35 = vpop.permute.xlu0 %60  ;;  %v209_v44 = vpop.permute.xlu1 %208 }
  0x9e   :  { %v178_v28 = vpop.f32.mrf.mxu0 }
  0x9f   :  { %v192_v29 = vpop.f32.mrf.mxu1  ;;  %v179_v30 = vadd.f32 %v178_v28, %v56_v27 }
  0xa1   :  { %v193_v31 = vadd.f32 %v192_v29, %v179_v30 }
  0xa3   :  { %v199_v33 = vmul.f32 0.02, %v193_v31  ;;  %vm197_vm0 = vcmp.ge.f32.partialorder %v193_v31, 0.0 }
  0xa5   :  { %v201_v37 = vsel %vm197_vm0, %v193_v31, %v199_v33 }
  0xa6   :  { %v180_v36 = vpop.f32.mrf.mxu0  ;;  %v211_v41 = vmul.f32 %v205_v32, %v201_v37 }
  0xa7   :  { %v181_v38 = vadd.f32 %v180_v36, %v61_v35  ;;  %v194_v39 = vpop.f32.mrf.mxu1 }
  0xa8   :  { %v221_v47 = vadd.f32 %v215_v34, %v211_v41 }
  0xa9   :  { %v195_v40 = vadd.f32 %v194_v39, %v181_v38 }
  0xaa   :  { %v227_v52 = vadd.f32 %v329_v46, %v221_v47 }
  0xab   :  { %vm198_vm1 = vcmp.ge.f32.partialorder %v195_v40, 0.0  ;;  %v200_v43 = vmul.f32 0.02, %v195_v40 }
  0xad   :  { %v202_v45 = vsel %vm198_vm1, %v195_v40, %v200_v43 }
  0xae   :  { %v212_v49 = vmul.f32 %v209_v44, %v202_v45 }
  0xb0   :  { %v222_v51 = vadd.f32 %v219_v50, %v212_v49 }
  0xb2   :  { %v228_v53 = vadd.f32 %v330_v48, %v222_v51 }
  0xb4   :  { %v334_v54 = vpack.c.bf16 %v228_v53, %v227_v52 }
  0xb6   :  { %335 = vst [vmem:[%s447_s4] sm:$0xff] %v334_v54  }

// kernel: nowcasting_forward.42
= control target key start
LH: loop header
LB: loop body
LE: loop exit
PB: predicated region body
PF: predicated region fallthrough
CT: control target
= control target key end

     0   :  { %v389_v3 = vmov 0   ;;  %v390_v31 = vmov 1   ;;  %v391_v56 = vmov 2   ;;  %s548_s1 = inlined_call_operand.vmem [shape: bf16[128,256], index: 1, kind: input, shape index: {}]   ;;  %s549_s2 = inlined_call_operand.vmem [shape: f32[32,3], index: 2, kind: input, shape index: {}]   ;;  %s550_s0 = inlined_call_operand.vmem [shape: bf16[32,128], index: 0, kind: input, shape index: {}]   ;;  %s551_s3 = inlined_call_operand.vmem [shape: bf16[32,256], index: 3, kind: output, shape index: {}]  }
   0x1   :  { %v338_v0 = vld [vmem:[%s548_s1 + $0x70] sm:$0xf]  ;;  %v361_v1 = vld [vmem:[%s548_s1 + $0x74] sm:$0xf0]  ;;  %v360_v2 = vld [vmem:[%s548_s1 + $0x74] sm:$0xf]  ;;  %382 = vset.pattern.permute.xlu1 %v389_v3  ;;  %381 = vset.pattern.permute.xlu0 %v389_v3 }
   0x2   :  { %v339_v4 = vor.u32 %v361_v1, %v338_v0  ;;  %v340_v5 = vld [vmem:[%s548_s1 + $0x78] sm:$0xf0]  ;;  %v330_v6 = vld [vmem:[%s548_s1 + $0x60] sm:$0xf]  ;;  %v359_v7 = vld [vmem:[%s548_s1 + $0x64] sm:$0xf0]  ;;  %383 = vset.pattern.permute.xlu2 %v390_v31 }
   0x3   :  { %v343_v8 = vor.u32 %v360_v2, %v340_v5  ;;  %v358_v9 = vld [vmem:[%s548_s1 + $0x64] sm:$0xf]  ;;  %v332_v10 = vld [vmem:[%s548_s1 + $0x68] sm:$0xf0]  ;;  %v331_v11 = vor.u32 %v359_v7, %v330_v6  ;;  %v322_v13 = vld [vmem:[%s548_s1 + $0x50] sm:$0xf] }
   0x4   :  { %150 = vmatpush.bf16.msra.mxu0 %v339_v4  ;;  %362 = vmatpush.bf16.msra.mxu2 %v339_v4  ;;  %v335_v12 = vor.u32 %v358_v9, %v332_v10  ;;  %v357_v14 = vld [vmem:[%s548_s1 + $0x54] sm:$0xf0]  ;;  %v356_v15 = vld [vmem:[%s548_s1 + $0x54] sm:$0xf]  ;;  %v324_v16 = vld [vmem:[%s548_s1 + $0x58] sm:$0xf0] }
   0x5   :  { %169 = vmatpush.bf16.msra.mxu1 %v343_v8  ;;  %370 = vmatpush.bf16.msra.mxu3 %v343_v8  ;;  %v323_v17 = vor.u32 %v357_v14, %v322_v13  ;;  %v327_v18 = vor.u32 %v356_v15, %v324_v16  ;;  %v314_v19 = vld [vmem:[%s548_s1 + $0x40] sm:$0xf]  ;;  %v355_v20 = vld [vmem:[%s548_s1 + $0x44] sm:$0xf0]  ;;  %v354_v21 = vld [vmem:[%s548_s1 + $0x44] sm:$0xf] }
   0x6   :  { %v316_v22 = vld [vmem:[%s548_s1 + $0x48] sm:$0xf0]  ;;  %v463_v23 = vld [vmem:[%s549_s2 + $0x10] sm:$0xff]  ;;  %v315_v24 = vor.u32 %v355_v20, %v314_v19  ;;  %v468_v25 = vld [vmem:[%s549_s2] sm:$0xff] }
   0x7   :  { %v319_v26 = vor.u32 %v354_v21, %v316_v22  ;;  %v306_v27 = vld [vmem:[%s548_s1 + $0x30] sm:$0xf]  ;;  %v353_v28 = vld [vmem:[%s548_s1 + $0x34] sm:$0xf0]  ;;  %v352_v29 = vld [vmem:[%s548_s1 + $0x34] sm:$0xf]  ;;  %50 = vperm.xlu1 %382, %v463_v23   ;;  %40 = vperm.xlu0 %381, %v468_v25  }
   0x8   :  { %151 = vmatpush.bf16.msra.mxu0 %v331_v11  ;;  %363 = vmatpush.bf16.msra.mxu2 %v331_v11  ;;  %v308_v30 = vld [vmem:[%s548_s1 + $0x38] sm:$0xf0]  ;;  %v307_v32 = vor.u32 %v353_v28, %v306_v27  ;;  %v298_v34 = vld [vmem:[%s548_s1 + $0x20] sm:$0xf]  ;;  %v351_v35 = vld [vmem:[%s548_s1 + $0x24] sm:$0xf0] }
   0x9   :  { %170 = vmatpush.bf16.msra.mxu1 %v335_v12  ;;  %371 = vmatpush.bf16.msra.mxu3 %v335_v12  ;;  %v311_v33 = vor.u32 %v352_v29, %v308_v30  ;;  %v350_v36 = vld [vmem:[%s548_s1 + $0x24] sm:$0xf]  ;;  %v300_v37 = vld [vmem:[%s548_s1 + $0x28] sm:$0xf0]  ;;  %v37_v38 = vld [vmem:[%s549_s2 + $0x18] sm:$0xff]  ;;  %v299_v40 = vor.u32 %v351_v35, %v298_v34 }
   0xa   :  { %213 = vperm.xlu2 %383, %v468_v25   ;;  %v35_v39 = vld [vmem:[%s549_s2 + $0x8] sm:$0xff]  ;;  %v303_v41 = vor.u32 %v350_v36, %v300_v37  ;;  %v290_v42 = vld [vmem:[%s548_s1 + $0x10] sm:$0xf]  ;;  %v349_v43 = vld [vmem:[%s548_s1 + $0x14] sm:$0xf0] }
   0xb   :  { %v348_v44 = vld [vmem:[%s548_s1 + $0x14] sm:$0xf]  ;;  %v292_v45 = vld [vmem:[%s548_s1 + $0x18] sm:$0xf0]  ;;  %v291_v46 = vor.u32 %v349_v43, %v290_v42  ;;  %v282_v48 = vld [vmem:[%s548_s1] sm:$0xf] }
   0xc   :  { %152 = vmatpush.bf16.msra.mxu0 %v323_v17  ;;  %364 = vmatpush.bf16.msra.mxu2 %v323_v17  ;;  %v295_v47 = vor.u32 %v348_v44, %v292_v45  ;;  %v347_v49 = vld [vmem:[%s548_s1 + $0x4] sm:$0xf0]  ;;  %v346_v50 = vld [vmem:[%s548_s1 + $0x4] sm:$0xf]  ;;  %v284_v51 = vld [vmem:[%s548_s1 + $0x8] sm:$0xf0] }
   0xd   :  { %171 = vmatpush.bf16.msra.mxu1 %v327_v18  ;;  %372 = vmatpush.bf16.msra.mxu3 %v327_v18  ;;  %v283_v52 = vor.u32 %v347_v49, %v282_v48  ;;  %v287_v53 = vor.u32 %v346_v50, %v284_v51  ;;  %v344_v54 = vld [vmem:[%s550_s0] sm:$0xff]  ;;  %v345_v55 = vld [vmem:[%s550_s0 + $0x8] sm:$0xff] }
   0xf   :  { %55 = vperm.xlu1 %382, %v37_v38   ;;  %45 = vperm.xlu0 %381, %v35_v39  }
  0x10   :  { %153 = vmatpush.bf16.msra.mxu0 %v315_v24  ;;  %365 = vmatpush.bf16.msra.mxu2 %v315_v24 }
  0x11   :  { %172 = vmatpush.bf16.msra.mxu1 %v319_v26  ;;  %373 = vmatpush.bf16.msra.mxu3 %v319_v26 }
  0x12   :  { %217 = vperm.xlu2 %383, %v35_v39  }
  0x14   :  { %154 = vmatpush.bf16.msra.mxu0 %v307_v32  ;;  %366 = vmatpush.bf16.msra.mxu2 %v307_v32 }
  0x15   :  { %173 = vmatpush.bf16.msra.mxu1 %v311_v33  ;;  %374 = vmatpush.bf16.msra.mxu3 %v311_v33 }
  0x17   :  { %385 = vset.pattern.permute.xlu1 %v390_v31  ;;  %384 = vset.pattern.permute.xlu0 %v390_v31 }
  0x18   :  { %155 = vmatpush.bf16.msra.mxu0 %v299_v40  ;;  %367 = vmatpush.bf16.msra.mxu2 %v299_v40 }
  0x19   :  { %174 = vmatpush.bf16.msra.mxu1 %v303_v41  ;;  %375 = vmatpush.bf16.msra.mxu3 %v303_v41 }
  0x1a   :  { %225 = vperm.xlu1 %385, %v37_v38   ;;  %221 = vperm.xlu0 %384, %v463_v23  }
  0x1b   :  { %386 = vset.pattern.permute.xlu2 %v391_v56 }
  0x1c   :  { %156 = vmatpush.bf16.msra.mxu0 %v291_v46  ;;  %368 = vmatpush.bf16.msra.mxu2 %v291_v46 }
  0x1d   :  { %175 = vmatpush.bf16.msra.mxu1 %v295_v47  ;;  %376 = vmatpush.bf16.msra.mxu3 %v295_v47 }
  0x1e   :  { %237 = vperm.xlu2 %386, %v468_v25  }
  0x20   :  { %157 = vmatpush.bf16.msra.mxu0 %v283_v52  ;;  %369 = vmatpush.bf16.msra.mxu2 %v283_v52 }
  0x21   :  { %176 = vmatpush.bf16.msra.mxu1 %v287_v53  ;;  %377 = vmatpush.bf16.msra.mxu3 %v287_v53 }
  0x22   :  { %387 = vset.pattern.permute.xlu1 %v391_v56  ;;  %388 = vset.pattern.permute.xlu0 %v391_v56 }
  0x23   :  { %158 = vmatmul.bf16.vlgmr.msra.gmra.mxu0 %v344_v54  ;;  %163 = vmatmul.bf16.vlgmr.msra.gmra.mxu2 %v345_v55 }
  0x24   :  { %177 = vmatmul.bf16.vlgmr.msra.gmra.mxu1 %v344_v54  ;;  %182 = vmatmul.bf16.vlgmr.msra.gmra.mxu3 %v345_v55 }
  0x25   :  { %241 = vperm.xlu1 %387, %v35_v39   ;;  %249 = vperm.xlu0 %388, %v37_v38  }
  0x26   :  { %245 = vperm.xlu2 %386, %v463_v23  }
  0x64   :  { %v214_v57 = vpop.permute.xlu2 %213 }
  0x6c   :  { %v218_v59 = vpop.permute.xlu2 %217 }
  0x78   :  { %v238_v63 = vpop.permute.xlu2 %237 }
  0x79   :  { %v51_v58 = vpop.permute.xlu1 %50  ;;  %v41_v60 = vpop.permute.xlu0 %40 }
  0x80   :  { %v246_v27 = vpop.permute.xlu2 %245 }
  0x81   :  { %v56_v61 = vpop.permute.xlu1 %55  ;;  %v46_v0 = vpop.permute.xlu0 %45 }
  0x8c   :  { %v226_v5 = vpop.permute.xlu1 %225  ;;  %v222_v21 = vpop.permute.xlu0 %221 }
  0x97   :  { %v242_v32 = vpop.permute.xlu1 %241  ;;  %v250_v49 = vpop.permute.xlu0 %249 }
  0xa0   :  { %v159_v62 = vpop.f32.mrf.mxu0 }
  0xa1   :  { %v160_v1 = vadd.f32 %v159_v62, %v41_v60  ;;  %v178_v2 = vpop.f32.mrf.mxu1 }
  0xa2   :  { %v179_v3 = vadd.f32 %v178_v2, %v41_v60 }
  0xa3   :  { %vm188_vm0 = vcmp.ge.f32.partialorder %v160_v1, 0.0  ;;  %v196_v4 = vmul.f32 0.02, %v160_v1 }
  0xa4   :  { %vm189_vm1 = vcmp.ge.f32.partialorder %v179_v3, 0.0  ;;  %v197_v6 = vmul.f32 0.02, %v179_v3 }
  0xa5   :  { %v204_v7 = vsel %vm188_vm0, %v160_v1, %v196_v4 }
  0xa6   :  { %v205_v8 = vsel %vm189_vm1, %v179_v3, %v197_v6  ;;  %v228_v9 = vmul.f32 %v214_v57, %v204_v7  ;;  %v164_v10 = vpop.f32.mrf.mxu2 }
  0xa7   :  { %v229_v11 = vmul.f32 %v214_v57, %v205_v8  ;;  %v165_v12 = vadd.f32 %v164_v10, %v51_v58  ;;  %v183_v13 = vpop.f32.mrf.mxu3 }
  0xa8   :  { %v252_v14 = vadd.f32 %v238_v63, %v228_v9  ;;  %v184_v15 = vadd.f32 %v183_v13, %v51_v58  ;;  %v161_v16 = vpop.f32.mrf.mxu0 }
  0xa9   :  { %v253_v17 = vadd.f32 %v238_v63, %v229_v11  ;;  %v200_v18 = vmul.f32 0.02, %v165_v12  ;;  %v162_v19 = vadd.f32 %v161_v16, %v46_v0  ;;  %v180_v20 = vpop.f32.mrf.mxu1  ;;  %vm192_vm2 = vcmp.ge.f32.partialorder %v165_v12, 0.0 }
  0xaa   :  { %v201_v22 = vmul.f32 0.02, %v184_v15  ;;  %v181_v23 = vadd.f32 %v180_v20, %v46_v0  ;;  %vm193_vm3 = vcmp.ge.f32.partialorder %v184_v15, 0.0 }
  0xab   :  { %v260_v24 = vpack.c.bf16 %v253_v17, %v252_v14  ;;  %vm190_vm4 = vcmp.ge.f32.partialorder %v162_v19, 0.0  ;;  %v198_v25 = vmul.f32 0.02, %v162_v19  ;;  %v208_v26 = vsel %vm192_vm2, %v165_v12, %v200_v18 }
  0xac   :  { %vm191_vm5 = vcmp.ge.f32.partialorder %v181_v23, 0.0  ;;  %v199_v28 = vmul.f32 0.02, %v181_v23  ;;  %v209_v29 = vsel %vm193_vm3, %v184_v15, %v201_v22  ;;  %v232_v30 = vmul.f32 %v222_v21, %v208_v26 }
  0xad   :  { %264 = vst [vmem:[%s551_s3] sm:$0xff] %v260_v24  ;;  %v233_v31 = vmul.f32 %v222_v21, %v209_v29  ;;  %v206_v33 = vsel %vm190_vm4, %v162_v19, %v198_v25 }
  0xae   :  { %v256_v34 = vadd.f32 %v246_v27, %v232_v30  ;;  %v166_v35 = vpop.f32.mrf.mxu2  ;;  %v207_v36 = vsel %vm191_vm5, %v181_v23, %v199_v28  ;;  %v230_v37 = vmul.f32 %v218_v59, %v206_v33 }
  0xaf   :  { %v257_v38 = vadd.f32 %v246_v27, %v233_v31  ;;  %v167_v39 = vadd.f32 %v166_v35, %v56_v61  ;;  %v185_v40 = vpop.f32.mrf.mxu3  ;;  %v231_v41 = vmul.f32 %v218_v59, %v207_v36 }
  0xb0   :  { %v186_v42 = vadd.f32 %v185_v40, %v56_v61  ;;  %v254_v43 = vadd.f32 %v242_v32, %v230_v37 }
  0xb1   :  { %v262_v44 = vpack.c.bf16 %v257_v38, %v256_v34  ;;  %vm194_vm6 = vcmp.ge.f32.partialorder %v167_v39, 0.0  ;;  %v202_v45 = vmul.f32 0.02, %v167_v39  ;;  %v255_v46 = vadd.f32 %v242_v32, %v231_v41 }
  0xb2   :  { %vm195_vm7 = vcmp.ge.f32.partialorder %v186_v42, 0.0  ;;  %v203_v47 = vmul.f32 0.02, %v186_v42 }
  0xb3   :  { %266 = vst [vmem:[%s551_s3 + $0x10] sm:$0xff] %v262_v44  ;;  %v261_v48 = vpack.c.bf16 %v255_v46, %v254_v43  ;;  %v210_v50 = vsel %vm194_vm6, %v167_v39, %v202_v45 }
  0xb4   :  { %v211_v51 = vsel %vm195_vm7, %v186_v42, %v203_v47  ;;  %v234_v52 = vmul.f32 %v226_v5, %v210_v50 }
  0xb5   :  { %265 = vst [vmem:[%s551_s3 + $0x8] sm:$0xff] %v261_v48  ;;  %v235_v53 = vmul.f32 %v226_v5, %v211_v51 }
  0xb6   :  { %v258_v54 = vadd.f32 %v250_v49, %v234_v52 }
  0xb7   :  { %v259_v55 = vadd.f32 %v250_v49, %v235_v53 }
  0xb9   :  { %v263_v56 = vpack.c.bf16 %v259_v55, %v258_v54 }
  0xbb   :  { %267 = vst [vmem:[%s551_s3 + $0x18] sm:$0xff] %v263_v56 }

// kernel: nowcasting_forward.44
= control target key start
LH: loop header
LB: loop body
LE: loop exit
PB: predicated region body
PF: predicated region fallthrough
CT: control target
= control target key end

     0   :  { %s1052_s15 = smov 0   ;;  %s1054_s16 = smov 0   ;;  %s1292_s0 = inlined_call_operand.vmem [shape: bf16[16,128], index: 0, kind: input, shape index: {}]   ;;  %s1293_s1 = inlined_call_operand.vmem [shape: bf16[128,1024], index: 1, kind: input, shape index: {}]   ;;  %s1294_s2 = inlined_call_operand.vmem [shape: f32[16,3], index: 2, kind: input, shape index: {}]   ;;  %s1295_s3 = inlined_call_operand.vmem [shape: bf16[16,1024], index: 3, kind: input, shape index: {}]   ;;  %s1296_s4 = inlined_call_operand.vmem [shape: bf16[16,1024], index: 4, kind: output, shape index: {}]  }
   0x1   :  { %s1056_s17 = smov 0  }
   0x2 LB: > { %s782_s18 = sadd.s32 4294967295, %s1022_s17   ;;  %s1069_s19 = sadd.s32 1, %s1022_s17   ;;  %s1022_s17 = sphi %s1056_s17, %s1301_s17   ;;  %s1018_s16 = sphi %s1054_s16, %s1300_s16   ;;  %s1014_s15 = sphi %s1052_s15, %s1299_s15  }
   0x3   : > { %s39_s20 = ssub.s32 %s1022_s17, %s1069_s19  ;;  %s42_s21 = sadd.s32 1, %s1018_s16 }
   0x4   : > { %p40_p0 = scmp.eq.s32.totalorder %s39_s20, 0  ;;  %p49_p1 = scmp.ne.s32.totalorder %s1018_s16, %s1014_s15 }
   0x5   : > { %p50_p2 = scmp.eq.s32.totalorder %s1022_s17, 0  ;;  %p126_p3 = scmp.eq.s32.totalorder %s782_s18, 1 }
   0x6   : > { %s1080_s22 = scalar_select %p40_p0, %s1018_s16, %s42_s21  }
   0x7   : > { %p1082_p4 = por %p50_p2, %p49_p1  ;;  %p1086_p5 = por %p126_p3, %p49_p1 }
   0x8   : > { %p785_p6 = scmp.ge.s32.totalorder %s1022_s17, 2 }
   0xa   : > { %154 = sbr.rel (%p785_p6) target bundleno = 59 (0x3b), region = 24 }
   0xf   : > { %157 = sbr.rel (!%p1082_p4) target bundleno = 51 (0x33), region = 28  ;;  %s159_s25 = sand.u32 (%p1082_p4), 1, %s1018_s16  }
  0x10   : > { %s933_s26 = sshll.u32 (%p1082_p4), %s1022_s17, 4  ;;  %s786_s27 = sshll.u32 (%p1082_p4), %s159_s25, 8 }
  0x11   : > { %s1098_s30 = scalar_lea.vmem (%p1082_p4), %s1293_s1, %s933_s26  ;;  %s1103_s5 = scalar_lea.vmem (%p1082_p4), [#allocation2], %s786_s27 }
  0x12   : > { %v177_v0 = vld [vmem:[%s1098_s30] sm:$0xff] (%p1082_p4)  ;;  %v179_v1 = vld [vmem:[%s1098_s30 + $0x8] sm:$0xff] (%p1082_p4) }
  0x13   : > { %v181_v2 = vld [vmem:[%s1098_s30 + $0x20] sm:$0xff] (%p1082_p4)  ;;  %178 = vst [vmem:[%s1103_s5] sm:$0xff] (%p1082_p4), %v177_v0  ;;  %v183_v3 = vld [vmem:[%s1098_s30 + $0x28] sm:$0xff] (%p1082_p4) }
  0x14   : > { %180 = vst [vmem:[%s1103_s5 + $0x8] sm:$0xff] %v179_v1  ;;  %v185_v4 = vld [vmem:[%s1098_s30 + $0x40] sm:$0xff]  ;;  %v187_v5 = vld [vmem:[%s1098_s30 + $0x48] sm:$0xff] }
  0x15   : > { %182 = vst [vmem:[%s1103_s5 + $0x10] sm:$0xff] %v181_v2  ;;  %v189_v6 = vld [vmem:[%s1098_s30 + $0x60] sm:$0xff]  ;;  %v191_v7 = vld [vmem:[%s1098_s30 + $0x68] sm:$0xff] }
  0x16   : > { %184 = vst [vmem:[%s1103_s5 + $0x18] sm:$0xff] %v183_v3  ;;  %v193_v8 = vld [vmem:[%s1098_s30 + $0x80] sm:$0xff]  ;;  %v195_v9 = vld [vmem:[%s1098_s30 + $0x88] sm:$0xff] }
  0x17   : > { %186 = vst [vmem:[%s1103_s5 + $0x20] sm:$0xff] %v185_v4  ;;  %v197_v10 = vld [vmem:[%s1098_s30 + $0xa0] sm:$0xff]  ;;  %v199_v11 = vld [vmem:[%s1098_s30 + $0xa8] sm:$0xff] }
  0x18   : > { %188 = vst [vmem:[%s1103_s5 + $0x28] sm:$0xff] %v187_v5  ;;  %v201_v12 = vld [vmem:[%s1098_s30 + $0xc0] sm:$0xff]  ;;  %v203_v13 = vld [vmem:[%s1098_s30 + $0xc8] sm:$0xff] }
  0x19   : > { %190 = vst [vmem:[%s1103_s5 + $0x30] sm:$0xff] %v189_v6  ;;  %v205_v14 = vld [vmem:[%s1098_s30 + $0xe0] sm:$0xff]  ;;  %v207_v15 = vld [vmem:[%s1098_s30 + $0xe8] sm:$0xff] }
  0x1a   : > { %192 = vst [vmem:[%s1103_s5 + $0x38] sm:$0xff] %v191_v7  ;;  %v209_v16 = vld [vmem:[%s1098_s30 + $0x100] sm:$0xff]  ;;  %v211_v17 = vld [vmem:[%s1098_s30 + $0x108] sm:$0xff] }
  0x1b   : > { %194 = vst [vmem:[%s1103_s5 + $0x40] sm:$0xff] %v193_v8  ;;  %v213_v18 = vld [vmem:[%s1098_s30 + $0x120] sm:$0xff]  ;;  %v215_v19 = vld [vmem:[%s1098_s30 + $0x128] sm:$0xff] }
  0x1c   : > { %196 = vst [vmem:[%s1103_s5 + $0x48] sm:$0xff] %v195_v9  ;;  %v217_v20 = vld [vmem:[%s1098_s30 + $0x140] sm:$0xff]  ;;  %v219_v21 = vld [vmem:[%s1098_s30 + $0x148] sm:$0xff] }
  0x1d   : > { %198 = vst [vmem:[%s1103_s5 + $0x50] sm:$0xff] %v197_v10  ;;  %v221_v22 = vld [vmem:[%s1098_s30 + $0x160] sm:$0xff]  ;;  %v223_v23 = vld [vmem:[%s1098_s30 + $0x168] sm:$0xff] }
  0x1e   : > { %200 = vst [vmem:[%s1103_s5 + $0x58] sm:$0xff] %v199_v11  ;;  %v225_v24 = vld [vmem:[%s1098_s30 + $0x180] sm:$0xff]  ;;  %v227_v25 = vld [vmem:[%s1098_s30 + $0x188] sm:$0xff] }
  0x1f   : > { %202 = vst [vmem:[%s1103_s5 + $0x60] sm:$0xff] %v201_v12  ;;  %v229_v26 = vld [vmem:[%s1098_s30 + $0x1a0] sm:$0xff]  ;;  %v231_v27 = vld [vmem:[%s1098_s30 + $0x1a8] sm:$0xff] }
  0x20   : > { %204 = vst [vmem:[%s1103_s5 + $0x68] sm:$0xff] %v203_v13  ;;  %v233_v28 = vld [vmem:[%s1098_s30 + $0x1c0] sm:$0xff]  ;;  %v235_v29 = vld [vmem:[%s1098_s30 + $0x1c8] sm:$0xff] }
  0x21   : > { %206 = vst [vmem:[%s1103_s5 + $0x70] sm:$0xff] %v205_v14  ;;  %v237_v30 = vld [vmem:[%s1098_s30 + $0x1e0] sm:$0xff]  ;;  %v239_v31 = vld [vmem:[%s1098_s30 + $0x1e8] sm:$0xff] }
  0x22   : > { %208 = vst [vmem:[%s1103_s5 + $0x78] sm:$0xff] %v207_v15 }
  0x23   : > { %210 = vst [vmem:[%s1103_s5 + $0x80] sm:$0xff] %v209_v16 }
  0x24   : > { %212 = vst [vmem:[%s1103_s5 + $0x88] sm:$0xff] %v211_v17 }
  0x25   : > { %214 = vst [vmem:[%s1103_s5 + $0x90] sm:$0xff] %v213_v18 }
  0x26   : > { %216 = vst [vmem:[%s1103_s5 + $0x98] sm:$0xff] %v215_v19 }
  0x27   : > { %218 = vst [vmem:[%s1103_s5 + $0xa0] sm:$0xff] %v217_v20 }
  0x28   : > { %220 = vst [vmem:[%s1103_s5 + $0xa8] sm:$0xff] %v219_v21 }
  0x29   : > { %222 = vst [vmem:[%s1103_s5 + $0xb0] sm:$0xff] %v221_v22 }
  0x2a   : > { %224 = vst [vmem:[%s1103_s5 + $0xb8] sm:$0xff] %v223_v23 }
  0x2b   : > { %226 = vst [vmem:[%s1103_s5 + $0xc0] sm:$0xff] %v225_v24 }
  0x2c   : > { %228 = vst [vmem:[%s1103_s5 + $0xc8] sm:$0xff] %v227_v25 }
  0x2d   : > { %230 = vst [vmem:[%s1103_s5 + $0xd0] sm:$0xff] %v229_v26 }
  0x2e   : > { %232 = vst [vmem:[%s1103_s5 + $0xd8] sm:$0xff] %v231_v27 }
  0x2f   : > { %234 = vst [vmem:[%s1103_s5 + $0xe0] sm:$0xff] %v233_v28 }
  0x30   : > { %236 = vst [vmem:[%s1103_s5 + $0xe8] sm:$0xff] %v235_v29 }
  0x31   : > { %238 = vst [vmem:[%s1103_s5 + $0xf0] sm:$0xff] %v237_v30 }
  0x32   : > { %240 = vst [vmem:[%s1103_s5 + $0xf8] sm:$0xff] %v239_v31 }
  0x33 PF: > { %246 = sbr.rel (!%p1082_p4) target bundleno = 59 (0x3b), region = 51  ;;  %s248_s6 = sand.u32 (%p1082_p4), 1, %s1018_s16  }
  0x34   : > { %s934_s7 = sshll.u32 (%p1082_p4), %s1022_s17, 4  ;;  %s789_s8 = sshll.u32 (%p1082_p4), %s248_s6, 5 }
  0x35   : > { %s253_s11 = scalar_lea.vmem (%p1082_p4), %s1295_s3, %s934_s7  ;;  %s250_s12 = scalar_lea.vmem (%p1082_p4), [#allocation3], %s789_s8 }
  0x36   : > { %v266_v32 = vld [vmem:[%s253_s11] sm:$0xff] (%p1082_p4)  ;;  %v268_v33 = vld [vmem:[%s253_s11 + $0x8] sm:$0xff] (%p1082_p4) }
  0x37   : > { %v270_v34 = vld [vmem:[%s253_s11 + $0x20] sm:$0xff] (%p1082_p4)  ;;  %267 = vst [vmem:[%s250_s12] sm:$0xff] (%p1082_p4), %v266_v32  ;;  %v272_v35 = vld [vmem:[%s253_s11 + $0x28] sm:$0xff] (%p1082_p4) }
  0x38   : > { %269 = vst [vmem:[%s250_s12 + $0x8] sm:$0xff] %v268_v33 }
  0x39   : > { %271 = vst [vmem:[%s250_s12 + $0x10] sm:$0xff] %v270_v34 }
  0x3a   : > { %273 = vst [vmem:[%s250_s12 + $0x18] sm:$0xff] %v272_v35 }
  0x3b PF: > { %p792_p7 = scmp.ge.s32.totalorder %s1022_s17, 1  ;;  %p278_p8 = scmp.lt.s32.totalorder %s1022_s17, 3 }
  0x3d   : > { %p279_p9 = pnand %p792_p7, %p278_p8 }
  0x3e   : > { %s285_s13 = sand.u32 (!%p279_p9), 1, %s1014_s15  }
  0x3f   : > { %282 = sbr.rel (%p279_p9) target bundleno = 266 (0x10a), region = 74  ;;  %s793_s14 = sshll.u32 (!%p279_p9), %s285_s13, 8 }
  0x40   : > { %s1178_s20 = scalar_lea.vmem (!%p279_p9), [#allocation2], %s793_s14  ;;  %s1255_s29 = sshll.u32 (!%p279_p9), %s285_s13, 5 }
  0x41   : > { %s1258_s30 = scalar_lea.vmem (!%p279_p9), [#allocation3], %s1255_s29  ;;  %s1264_s15 = scalar_lea.vmem (!%p279_p9), [#allocation4], %s1255_s29 }
  0x44   : > { %v914_v36 = vld [vmem:[%s1178_s20 + $0xe0] sm:$0xf]  ;;  %v966_v37 = vld [vmem:[%s1178_s20 + $0xec] sm:$0xf0]  ;;  %v964_v38 = vld [vmem:[%s1178_s20 + $0xe4] sm:$0xf] }
  0x45   : > { %v915_v39 = vor.u32 %v966_v37, %v914_v36  ;;  %v916_v40 = vld [vmem:[%s1178_s20 + $0xf0] sm:$0xf0]  ;;  %v922_v41 = vld [vmem:[%s1178_s20 + $0xe8] sm:$0xf]  ;;  %v967_v42 = vld [vmem:[%s1178_s20 + $0xf4] sm:$0xf0] }
  0x46   : > { %v919_v43 = vor.u32 %v964_v38, %v916_v40  ;;  %v923_v44 = vor.u32 %v967_v42, %v922_v41  ;;  %v965_v45 = vld [vmem:[%s1178_s20 + $0xec] sm:$0xf]  ;;  %v924_v46 = vld [vmem:[%s1178_s20 + $0xf8] sm:$0xf0]  ;;  %v898_v47 = vld [vmem:[%s1178_s20 + $0xc0] sm:$0xf] }
  0x47   : > { %535 = vmatpush.bf16.msra.mxu0 %v915_v39  ;;  %v927_v48 = vor.u32 %v965_v45, %v924_v46  ;;  %v962_v49 = vld [vmem:[%s1178_s20 + $0xcc] sm:$0xf0]  ;;  %v960_v50 = vld [vmem:[%s1178_s20 + $0xc4] sm:$0xf]  ;;  %v900_v51 = vld [vmem:[%s1178_s20 + $0xd0] sm:$0xf0] }
  0x48   : > { %549 = vmatpush.bf16.msra.mxu1 %v919_v43  ;;  %563 = vmatpush.bf16.msra.mxu2 %v923_v44  ;;  %v899_v52 = vor.u32 %v962_v49, %v898_v47  ;;  %v903_v53 = vor.u32 %v960_v50, %v900_v51  ;;  %v906_v54 = vld [vmem:[%s1178_s20 + $0xc8] sm:$0xf]  ;;  %v963_v55 = vld [vmem:[%s1178_s20 + $0xd4] sm:$0xf0]  ;;  %v961_v56 = vld [vmem:[%s1178_s20 + $0xcc] sm:$0xf] }
  0x49   : > { %577 = vmatpush.bf16.msra.mxu3 %v927_v48  ;;  %v907_v57 = vor.u32 %v963_v55, %v906_v54  ;;  %v908_v58 = vld [vmem:[%s1178_s20 + $0xd8] sm:$0xf0]  ;;  %v882_v59 = vld [vmem:[%s1178_s20 + $0xa0] sm:$0xf]  ;;  %v958_v60 = vld [vmem:[%s1178_s20 + $0xac] sm:$0xf0] }
  0x4a   : > { %v911_v61 = vor.u32 %v961_v56, %v908_v58  ;;  %v956_v62 = vld [vmem:[%s1178_s20 + $0xa4] sm:$0xf]  ;;  %v884_v63 = vld [vmem:[%s1178_s20 + $0xb0] sm:$0xf0]  ;;  %v890_v0 = vld [vmem:[%s1178_s20 + $0xa8] sm:$0xf]  ;;  %v883_v1 = vor.u32 %v958_v60, %v882_v59 }
  0x4b   : > { %536 = vmatpush.bf16.msra.mxu0 %v899_v52  ;;  %v959_v2 = vld [vmem:[%s1178_s20 + $0xb4] sm:$0xf0]  ;;  %v957_v3 = vld [vmem:[%s1178_s20 + $0xac] sm:$0xf]  ;;  %v892_v4 = vld [vmem:[%s1178_s20 + $0xb8] sm:$0xf0]  ;;  %v887_v5 = vor.u32 %v956_v62, %v884_v63 }
  0x4c   : > { %550 = vmatpush.bf16.msra.mxu1 %v903_v53  ;;  %564 = vmatpush.bf16.msra.mxu2 %v907_v57  ;;  %v891_v6 = vor.u32 %v959_v2, %v890_v0  ;;  %v866_v7 = vld [vmem:[%s1178_s20 + $0x80] sm:$0xf]  ;;  %v954_v8 = vld [vmem:[%s1178_s20 + $0x8c] sm:$0xf0]  ;;  %v952_v9 = vld [vmem:[%s1178_s20 + $0x84] sm:$0xf]  ;;  %v895_v10 = vor.u32 %v957_v3, %v892_v4 }
  0x4d   : > { %578 = vmatpush.bf16.msra.mxu3 %v911_v61  ;;  %v868_v11 = vld [vmem:[%s1178_s20 + $0x90] sm:$0xf0]  ;;  %v874_v12 = vld [vmem:[%s1178_s20 + $0x88] sm:$0xf]  ;;  %v955_v13 = vld [vmem:[%s1178_s20 + $0x94] sm:$0xf0]  ;;  %v867_v16 = vor.u32 %v954_v8, %v866_v7 }
  0x4e   : > { %v953_v14 = vld [vmem:[%s1178_s20 + $0x8c] sm:$0xf]  ;;  %v876_v15 = vld [vmem:[%s1178_s20 + $0x98] sm:$0xf0]  ;;  %v871_v17 = vor.u32 %v952_v9, %v868_v11  ;;  %v875_v18 = vor.u32 %v955_v13, %v874_v12  ;;  %v850_v19 = vld [vmem:[%s1178_s20 + $0x60] sm:$0xf] }
  0x4f   : > { %537 = vmatpush.bf16.msra.mxu0 %v883_v1  ;;  %v950_v20 = vld [vmem:[%s1178_s20 + $0x6c] sm:$0xf0]  ;;  %v948_v21 = vld [vmem:[%s1178_s20 + $0x64] sm:$0xf]  ;;  %v879_v22 = vor.u32 %v953_v14, %v876_v15  ;;  %v852_v23 = vld [vmem:[%s1178_s20 + $0x70] sm:$0xf0] }
  0x50   : > { %551 = vmatpush.bf16.msra.mxu1 %v887_v5  ;;  %565 = vmatpush.bf16.msra.mxu2 %v891_v6  ;;  %v858_v24 = vld [vmem:[%s1178_s20 + $0x68] sm:$0xf]  ;;  %v951_v25 = vld [vmem:[%s1178_s20 + $0x74] sm:$0xf0]  ;;  %v949_v26 = vld [vmem:[%s1178_s20 + $0x6c] sm:$0xf]  ;;  %v851_v28 = vor.u32 %v950_v20, %v850_v19  ;;  %v855_v29 = vor.u32 %v948_v21, %v852_v23 }
  0x51   : > { %579 = vmatpush.bf16.msra.mxu3 %v895_v10  ;;  %v860_v27 = vld [vmem:[%s1178_s20 + $0x78] sm:$0xf0]  ;;  %v859_v30 = vor.u32 %v951_v25, %v858_v24  ;;  %v834_v31 = vld [vmem:[%s1178_s20 + $0x40] sm:$0xf]  ;;  %v946_v32 = vld [vmem:[%s1178_s20 + $0x4c] sm:$0xf0] }
  0x52   : > { %v944_v33 = vld [vmem:[%s1178_s20 + $0x44] sm:$0xf]  ;;  %v863_v34 = vor.u32 %v949_v26, %v860_v27  ;;  %v836_v35 = vld [vmem:[%s1178_s20 + $0x50] sm:$0xf0]  ;;  %v842_v36 = vld [vmem:[%s1178_s20 + $0x48] sm:$0xf]  ;;  %v835_v40 = vor.u32 %v946_v32, %v834_v31 }
  0x53   : > { %538 = vmatpush.bf16.msra.mxu0 %v867_v16  ;;  %v947_v37 = vld [vmem:[%s1178_s20 + $0x54] sm:$0xf0]  ;;  %v945_v38 = vld [vmem:[%s1178_s20 + $0x4c] sm:$0xf]  ;;  %v844_v39 = vld [vmem:[%s1178_s20 + $0x58] sm:$0xf0]  ;;  %v839_v43 = vor.u32 %v944_v33, %v836_v35 }
  0x54   : > { %552 = vmatpush.bf16.msra.mxu1 %v871_v17  ;;  %566 = vmatpush.bf16.msra.mxu2 %v875_v18  ;;  %v818_v41 = vld [vmem:[%s1178_s20 + $0x20] sm:$0xf]  ;;  %v942_v42 = vld [vmem:[%s1178_s20 + $0x2c] sm:$0xf0]  ;;  %v843_v44 = vor.u32 %v947_v37, %v842_v36  ;;  %v940_v45 = vld [vmem:[%s1178_s20 + $0x24] sm:$0xf]  ;;  %v847_v48 = vor.u32 %v945_v38, %v844_v39 }
  0x55   : > { %580 = vmatpush.bf16.msra.mxu3 %v879_v22  ;;  %v820_v46 = vld [vmem:[%s1178_s20 + $0x30] sm:$0xf0]  ;;  %v826_v47 = vld [vmem:[%s1178_s20 + $0x28] sm:$0xf]  ;;  %v943_v49 = vld [vmem:[%s1178_s20 + $0x34] sm:$0xf0]  ;;  %v819_v55 = vor.u32 %v942_v42, %v818_v41 }
  0x56   : > { %v357_v50 = vld [vmem:[%s1294_s2] sm:$0xff]  ;;  %v941_v51 = vld [vmem:[%s1178_s20 + $0x2c] sm:$0xf]  ;;  %v828_v52 = vld [vmem:[%s1178_s20 + $0x38] sm:$0xf0]  ;;  %v1024_v53 = vmov 0   ;;  %v823_v56 = vor.u32 %v940_v45, %v820_v46  ;;  %v827_v57 = vor.u32 %v943_v49, %v826_v47 }
  0x57   : > { %539 = vmatpush.bf16.msra.mxu0 %v851_v28  ;;  %996 = vset.pattern.permute.xlu0 %v1024_v53  ;;  %v1025_v54 = vmov 1   ;;  %v802_v58 = vld [vmem:[%s1178_s20] sm:$0xf]  ;;  %v938_v59 = vld [vmem:[%s1178_s20 + $0xc] sm:$0xf0]  ;;  %v831_v61 = vor.u32 %v941_v51, %v828_v52  ;;  %v1026_v3 = vmov 2  }
  0x58   : > { %553 = vmatpush.bf16.msra.mxu1 %v855_v29  ;;  %567 = vmatpush.bf16.msra.mxu2 %v859_v30  ;;  %v936_v60 = vld [vmem:[%s1178_s20 + $0x4] sm:$0xf]  ;;  %v804_v62 = vld [vmem:[%s1178_s20 + $0x10] sm:$0xf0]  ;;  %v810_v63 = vld [vmem:[%s1178_s20 + $0x8] sm:$0xf]  ;;  %v803_v4 = vor.u32 %v938_v59, %v802_v58 }
  0x59   : > { %581 = vmatpush.bf16.msra.mxu3 %v863_v34  ;;  %997 = vset.pattern.permute.xlu1 %v1025_v54  ;;  %v939_v0 = vld [vmem:[%s1178_s20 + $0x14] sm:$0xf0]  ;;  %v937_v1 = vld [vmem:[%s1178_s20 + $0xc] sm:$0xf]  ;;  %v812_v2 = vld [vmem:[%s1178_s20 + $0x18] sm:$0xf0]  ;;  %v807_v5 = vor.u32 %v936_v60, %v804_v62 }
  0x5a   : > { %361 = vperm.xlu0 %996, %v357_v50   ;;  %616 = vperm.xlu1 %997, %v357_v50   ;;  %v811_v6 = vor.u32 %v939_v0, %v810_v63  ;;  %v358_v7 = vld [vmem:[%s1294_s2 + $0x8] sm:$0xff]  ;;  %v815_v8 = vor.u32 %v937_v1, %v812_v2  ;;  %v935_v9 = vld [vmem:[%s1292_s0] sm:$0xff]  ;;  %s968_s5 = sshll.u32 (%p1086_p5), %s782_s18, 4 }
  0x5b   : > { %540 = vmatpush.bf16.msra.mxu0 %v835_v40  ;;  %998 = vset.pattern.permute.xlu2 %v1026_v3  ;;  %v647_v16 = vld [vmem:[%s1258_s30] sm:$0xff]  ;;  %v648_v24 = vld [vmem:[%s1258_s30 + $0x8] sm:$0xff]  ;;  %s684_s8 = scalar_lea.vmem (%p1086_p5), %s1296_s4, %s968_s5 }
  0x5c   : > { %554 = vmatpush.bf16.msra.mxu1 %v839_v43  ;;  %568 = vmatpush.bf16.msra.mxu2 %v843_v44  ;;  %v651_v23 = vunpack.c.l.bf16 %v647_v16  ;;  %v652_v26 = vunpack.c.h.bf16 %v647_v16  ;;  %v653_v34 = vunpack.c.l.bf16 %v648_v24  ;;  %v649_v43 = vld [vmem:[%s1258_s30 + $0x10] sm:$0xff] }
  0x5d   : > { %582 = vmatpush.bf16.msra.mxu3 %v847_v48  ;;  %632 = vperm.xlu2 %998, %v357_v50   ;;  %v654_v50 = vunpack.c.h.bf16 %v648_v24  ;;  %v656_v59 = vunpack.c.h.bf16 %v649_v43 }
  0x5f   : > { %541 = vmatpush.bf16.msra.mxu0 %v819_v55  ;;  %v655_v55 = vunpack.c.l.bf16 %v649_v43 }
  0x60   : > { %555 = vmatpush.bf16.msra.mxu1 %v823_v56  ;;  %569 = vmatpush.bf16.msra.mxu2 %v827_v57 }
  0x61   : > { %583 = vmatpush.bf16.msra.mxu3 %v831_v61 }
  0x62   : > { %366 = vperm.xlu0 %996, %v358_v7   ;;  %620 = vperm.xlu1 %997, %v358_v7  }
  0x63   : > { %542 = vmatpush.bf16.msra.mxu0 %v803_v4 }
  0x64   : > { %556 = vmatpush.bf16.msra.mxu1 %v807_v5  ;;  %570 = vmatpush.bf16.msra.mxu2 %v811_v6 }
  0x65   : > { %584 = vmatpush.bf16.msra.mxu3 %v815_v8  ;;  %636 = vperm.xlu2 %998, %v358_v7   ;;  %v650_v7 = vld [vmem:[%s1258_s30 + $0x18] sm:$0xff] }
  0x66   : > { %543 = vmatmul.bf16.vlgmr.msra.gmra.mxu0 %v935_v9 }
  0x67   : > { %557 = vmatmul.bf16.vlgmr.msra.gmra.mxu1 %v935_v9  ;;  %571 = vmatmul.bf16.vlgmr.msra.gmra.mxu2 %v935_v9 }
  0x68   : > { %585 = vmatmul.bf16.vlgmr.msra.gmra.mxu3 %v935_v9 }
  0x6a   : > { %999 = vset.pattern.permute.xlu0 %v1026_v3 }
  0xb7   : > { %v633_v22 = vpop.permute.xlu2 %632 }
  0xbf   : > { %v637_v62 = vpop.permute.xlu2 %636 }
  0xcc   : > { %v362_v10 = vpop.permute.xlu0 %361  ;;  %v617_v18 = vpop.permute.xlu1 %616 }
  0xd4   : > { %v367_v27 = vpop.permute.xlu0 %366  ;;  %v621_v52 = vpop.permute.xlu1 %620 }
  0xe3   : > { %v544_v11 = vpop.f32.mrf.mxu0 }
  0xe4   : > { %v545_v12 = vadd.f32 %v544_v11, %v362_v10  ;;  %v558_v13 = vpop.f32.mrf.mxu1 }
  0xe5   : > { %v559_v14 = vadd.f32 %v558_v13, %v362_v10 }
  0xe6   : > { %vm591_vm0 = vcmp.ge.f32.partialorder %v545_v12, 0.0  ;;  %v599_v15 = vmul.f32 0.02, %v545_v12 }
  0xe7   : > { %vm592_vm1 = vcmp.ge.f32.partialorder %v559_v14, 0.0  ;;  %v600_v17 = vmul.f32 0.02, %v559_v14 }
  0xe8   : > { %v607_v19 = vsel %vm591_vm0, %v545_v12, %v599_v15  ;;  %v657_v15 = vunpack.c.l.bf16 %v650_v7 }
  0xe9   : > { %v608_v20 = vsel %vm592_vm1, %v559_v14, %v600_v17  ;;  %v623_v21 = vmul.f32 %v617_v18, %v607_v19 }
  0xea   : > { %v624_v25 = vmul.f32 %v617_v18, %v608_v20  ;;  %v572_v28 = vpop.f32.mrf.mxu2 }
  0xeb   : > { %v639_v29 = vadd.f32 %v633_v22, %v623_v21  ;;  %v573_v30 = vadd.f32 %v572_v28, %v362_v10  ;;  %v586_v31 = vpop.f32.mrf.mxu3  ;;  %v546_v32 = vpop.f32.mrf.mxu0 }
  0xec   : > { %v640_v33 = vadd.f32 %v633_v22, %v624_v25  ;;  %v587_v35 = vadd.f32 %v586_v31, %v362_v10  ;;  %v547_v36 = vadd.f32 %v546_v32, %v367_v27  ;;  %v560_v37 = vpop.f32.mrf.mxu1 }
  0xed   : > { %v659_v38 = vadd.f32 %v651_v23, %v639_v29  ;;  %vm593_vm2 = vcmp.ge.f32.partialorder %v573_v30, 0.0  ;;  %v601_v39 = vmul.f32 0.02, %v573_v30  ;;  %v561_v40 = vadd.f32 %v560_v37, %v367_v27 }
  0xee   : > { %v660_v41 = vadd.f32 %v652_v26, %v640_v33  ;;  %vm594_vm3 = vcmp.ge.f32.partialorder %v587_v35, 0.0  ;;  %v602_v42 = vmul.f32 0.02, %v587_v35  ;;  %vm595_vm4 = vcmp.ge.f32.partialorder %v547_v36, 0.0 }
  0xef   : > { %v609_v44 = vsel %vm593_vm2, %v573_v30, %v601_v39  ;;  %v603_v45 = vmul.f32 0.02, %v547_v36  ;;  %vm596_vm5 = vcmp.ge.f32.partialorder %v561_v40, 0.0  ;;  %v604_v46 = vmul.f32 0.02, %v561_v40 }
  0xf0   : > { %v667_v47 = vpack.c.bf16 %v660_v41, %v659_v38  ;;  %v625_v48 = vmul.f32 %v617_v18, %v609_v44  ;;  %v610_v49 = vsel %vm594_vm3, %v587_v35, %v602_v42 }
  0xf1   : > { %v626_v51 = vmul.f32 %v617_v18, %v610_v49  ;;  %v611_v53 = vsel %vm595_vm4, %v547_v36, %v603_v45  ;;  %v612_v54 = vsel %vm596_vm5, %v561_v40, %v604_v46  ;;  %v658_v18 = vunpack.c.h.bf16 %v650_v7 }
  0xf2   : > { %671 = vst [vmem:[%s1264_s15] sm:$0xff] %v667_v47  ;;  %v641_v56 = vadd.f32 %v633_v22, %v625_v48  ;;  %v627_v57 = vmul.f32 %v621_v52, %v611_v53  ;;  %v628_v58 = vmul.f32 %v621_v52, %v612_v54  ;;  %v574_v60 = vpop.f32.mrf.mxu2 }
  0xf3   : > { %v642_v61 = vadd.f32 %v633_v22, %v626_v51  ;;  %v575_v63 = vadd.f32 %v574_v60, %v367_v27  ;;  %v588_v0 = vpop.f32.mrf.mxu3 }
  0xf4   : > { %v661_v1 = vadd.f32 %v653_v34, %v641_v56  ;;  %v643_v2 = vadd.f32 %v637_v62, %v627_v57  ;;  %v644_v3 = vadd.f32 %v637_v62, %v628_v58  ;;  %v589_v4 = vadd.f32 %v588_v0, %v367_v27 }
  0xf5   : > { %v662_v5 = vadd.f32 %v654_v50, %v642_v61  ;;  %vm597_vm6 = vcmp.ge.f32.partialorder %v575_v63, 0.0  ;;  %v605_v6 = vmul.f32 0.02, %v575_v63 }
  0xf6   : > { %v663_v8 = vadd.f32 %v655_v55, %v643_v2  ;;  %v664_v9 = vadd.f32 %v656_v59, %v644_v3  ;;  %vm598_vm7 = vcmp.ge.f32.partialorder %v589_v4, 0.0  ;;  %v606_v10 = vmul.f32 0.02, %v589_v4 }
  0xf7   : > { %v668_v11 = vpack.c.bf16 %v662_v5, %v661_v1  ;;  %v613_v12 = vsel %vm597_vm6, %v575_v63, %v605_v6 }
  0xf8   : > { %v669_v13 = vpack.c.bf16 %v664_v9, %v663_v8  ;;  %v629_v14 = vmul.f32 %v621_v52, %v613_v12  ;;  %v614_v16 = vsel %vm598_vm7, %v589_v4, %v606_v10 }
  0xf9   : > { %672 = vst [vmem:[%s1264_s15 + $0x8] sm:$0xff] %v668_v11  ;;  %v630_v17 = vmul.f32 %v621_v52, %v614_v16  ;;  %v697_v24 = vld [vmem:[%s1264_s15] sm:$0xff] (%p1086_p5) }
  0xfa   : > { %673 = vst [vmem:[%s1264_s15 + $0x10] sm:$0xff] %v669_v13  ;;  %v645_v19 = vadd.f32 %v637_v62, %v629_v14 }
  0xfb   : > { %v646_v20 = vadd.f32 %v637_v62, %v630_v17  ;;  %698 = vst [vmem:[%s684_s8] sm:$0xff] (%p1086_p5), %v697_v24 }
  0xfc   : > { %v665_v21 = vadd.f32 %v657_v15, %v645_v19 }
  0xfd   : > { %v666_v22 = vadd.f32 %v658_v18, %v646_v20  ;;  %681 = sbr.rel (!%p1086_p5) target bundleno = 266 (0x10a), region = 86 }
  0xff   : > { %v670_v23 = vpack.c.bf16 %v666_v22, %v665_v21 }
 0x100   : > { %v699_v25 = vld [vmem:[%s1264_s15 + $0x8] sm:$0xff] (%p1086_p5) }
 0x101   : > { %674 = vst [vmem:[%s1264_s15 + $0x18] sm:$0xff] %v670_v23  ;;  %v701_v26 = vld [vmem:[%s1264_s15 + $0x10] sm:$0xff] (%p1086_p5) }
 0x102   : > { %700 = vst [vmem:[%s684_s8 + $0x8] sm:$0xff] %v699_v25 }
 0x103   : > { %702 = vst [vmem:[%s684_s8 + $0x20] sm:$0xff] %v701_v26 }
 0x108   : > { %v703_v27 = vld [vmem:[%s1264_s15 + $0x18] sm:$0xff] }
 0x109   : > { %704 = vst [vmem:[%s684_s8 + $0x28] sm:$0xff] %v703_v27 }
 0x10a PF: > { %p11_p10 = scmp.ge.s32.totalorder %s1069_s19, 4   ;;  %s1299_s15 = smov %s1018_s16 }
 0x10b   : > { %s1300_s16 = smov %s1080_s22  ;;  %s1301_s17 = smov %s1069_s19 }
 0x10c   :  { %13 = sbr.rel (!%p11_p10) target bundleno = 2 (0x2), region = 148 }

// kernel: nowcasting_forward.45
= control target key start
LH: loop header
LB: loop body
LE: loop exit
PB: predicated region body
PF: predicated region fallthrough
CT: control target
= control target key end

     0   :  { %s930_s12 = smov 0   ;;  %s932_s13 = smov 0   ;;  %s1147_s0 = inlined_call_operand.vmem [shape: bf16[16,128], index: 0, kind: input, shape index: {}]   ;;  %s1148_s1 = inlined_call_operand.vmem [shape: bf16[128,1536], index: 1, kind: input, shape index: {}]   ;;  %s1149_s2 = inlined_call_operand.vmem [shape: f32[16,3], index: 2, kind: input, shape index: {}]   ;;  %s1150_s3 = inlined_call_operand.vmem [shape: bf16[16,1536], index: 3, kind: output, shape index: {}]  }
   0x1   :  { %s934_s14 = smov 0  }
   0x2 LB: > { %s670_s15 = sadd.s32 4294967295, %s905_s14   ;;  %s947_s16 = sadd.s32 1, %s905_s14   ;;  %s905_s14 = sphi %s934_s14, %s1154_s14   ;;  %s901_s13 = sphi %s932_s13, %s1153_s13   ;;  %s897_s12 = sphi %s930_s12, %s1152_s12  }
   0x3   : > { %s38_s17 = ssub.s32 %s905_s14, %s947_s16  ;;  %s41_s18 = sadd.s32 1, %s901_s13 }
   0x4   : > { %p39_p0 = scmp.eq.s32.totalorder %s38_s17, 0  ;;  %p48_p1 = scmp.ne.s32.totalorder %s901_s13, %s897_s12 }
   0x5   : > { %p49_p2 = scmp.eq.s32.totalorder %s905_s14, 0  ;;  %p99_p3 = scmp.eq.s32.totalorder %s670_s15, 2 }
   0x6   : > { %s958_s19 = scalar_select %p39_p0, %s901_s13, %s41_s18  }
   0x7   : > { %p50_p4 = por %p49_p2, %p48_p1  ;;  %p960_p5 = por %p99_p3, %p48_p1 }
   0x8   : > { %p673_p6 = scmp.ge.s32.totalorder %s905_s14, 3 }
   0xa   : > { %127 = sbr.rel (%p673_p6) target bundleno = 51 (0x33), region = 24 }
   0xf   : > { %130 = sbr.rel (!%p50_p4) target bundleno = 51 (0x33), region = 28  ;;  %s132_s21 = sand.u32 (%p50_p4), 1, %s901_s13  }
  0x10   : > { %s817_s22 = sshll.u32 (%p50_p4), %s905_s14, 4  ;;  %s674_s23 = sshll.u32 (%p50_p4), %s132_s21, 8 }
  0x11   : > { %s970_s26 = scalar_lea.vmem (%p50_p4), %s1148_s1, %s817_s22  ;;  %s975_s27 = scalar_lea.vmem (%p50_p4), [#allocation2], %s674_s23 }
  0x12   : > { %v150_v0 = vld [vmem:[%s970_s26] sm:$0xff] (%p50_p4)  ;;  %v152_v1 = vld [vmem:[%s970_s26 + $0x8] sm:$0xff] (%p50_p4)  ;;  %v154_v2 = vld [vmem:[%s970_s26 + $0x30] sm:$0xff] (%p50_p4) }
  0x13   : > { %151 = vst [vmem:[%s975_s27] sm:$0xff] (%p50_p4), %v150_v0  ;;  %v156_v3 = vld [vmem:[%s970_s26 + $0x38] sm:$0xff] (%p50_p4)  ;;  %v158_v4 = vld [vmem:[%s970_s26 + $0x60] sm:$0xff] (%p50_p4)  ;;  %v160_v5 = vld [vmem:[%s970_s26 + $0x68] sm:$0xff] (%p50_p4) }
  0x14   : > { %153 = vst [vmem:[%s975_s27 + $0x8] sm:$0xff] %v152_v1  ;;  %v162_v6 = vld [vmem:[%s970_s26 + $0x90] sm:$0xff]  ;;  %v164_v7 = vld [vmem:[%s970_s26 + $0x98] sm:$0xff]  ;;  %v166_v8 = vld [vmem:[%s970_s26 + $0xc0] sm:$0xff] }
  0x15   : > { %155 = vst [vmem:[%s975_s27 + $0x10] sm:$0xff] %v154_v2  ;;  %v168_v9 = vld [vmem:[%s970_s26 + $0xc8] sm:$0xff]  ;;  %v170_v10 = vld [vmem:[%s970_s26 + $0xf0] sm:$0xff]  ;;  %v172_v11 = vld [vmem:[%s970_s26 + $0xf8] sm:$0xff] }
  0x16   : > { %157 = vst [vmem:[%s975_s27 + $0x18] sm:$0xff] %v156_v3  ;;  %v174_v12 = vld [vmem:[%s970_s26 + $0x120] sm:$0xff]  ;;  %v176_v13 = vld [vmem:[%s970_s26 + $0x128] sm:$0xff]  ;;  %v178_v14 = vld [vmem:[%s970_s26 + $0x150] sm:$0xff] }
  0x17   : > { %159 = vst [vmem:[%s975_s27 + $0x20] sm:$0xff] %v158_v4  ;;  %v180_v15 = vld [vmem:[%s970_s26 + $0x158] sm:$0xff]  ;;  %v182_v16 = vld [vmem:[%s970_s26 + $0x180] sm:$0xff]  ;;  %v184_v17 = vld [vmem:[%s970_s26 + $0x188] sm:$0xff] }
  0x18   : > { %161 = vst [vmem:[%s975_s27 + $0x28] sm:$0xff] %v160_v5  ;;  %v186_v18 = vld [vmem:[%s970_s26 + $0x1b0] sm:$0xff]  ;;  %v188_v19 = vld [vmem:[%s970_s26 + $0x1b8] sm:$0xff]  ;;  %v190_v20 = vld [vmem:[%s970_s26 + $0x1e0] sm:$0xff] }
  0x19   : > { %163 = vst [vmem:[%s975_s27 + $0x30] sm:$0xff] %v162_v6  ;;  %v192_v21 = vld [vmem:[%s970_s26 + $0x1e8] sm:$0xff]  ;;  %v194_v22 = vld [vmem:[%s970_s26 + $0x210] sm:$0xff]  ;;  %v196_v23 = vld [vmem:[%s970_s26 + $0x218] sm:$0xff] }
  0x1a   : > { %165 = vst [vmem:[%s975_s27 + $0x38] sm:$0xff] %v164_v7  ;;  %v198_v24 = vld [vmem:[%s970_s26 + $0x240] sm:$0xff]  ;;  %v200_v25 = vld [vmem:[%s970_s26 + $0x248] sm:$0xff]  ;;  %v202_v26 = vld [vmem:[%s970_s26 + $0x270] sm:$0xff] }
  0x1b   : > { %167 = vst [vmem:[%s975_s27 + $0x40] sm:$0xff] %v166_v8  ;;  %v204_v27 = vld [vmem:[%s970_s26 + $0x278] sm:$0xff]  ;;  %v206_v28 = vld [vmem:[%s970_s26 + $0x2a0] sm:$0xff]  ;;  %v208_v29 = vld [vmem:[%s970_s26 + $0x2a8] sm:$0xff] }
  0x1c   : > { %169 = vst [vmem:[%s975_s27 + $0x48] sm:$0xff] %v168_v9  ;;  %v210_v30 = vld [vmem:[%s970_s26 + $0x2d0] sm:$0xff]  ;;  %v212_v31 = vld [vmem:[%s970_s26 + $0x2d8] sm:$0xff] }
  0x1d   : > { %171 = vst [vmem:[%s975_s27 + $0x50] sm:$0xff] %v170_v10 }
  0x1e   : > { %173 = vst [vmem:[%s975_s27 + $0x58] sm:$0xff] %v172_v11 }
  0x1f   : > { %175 = vst [vmem:[%s975_s27 + $0x60] sm:$0xff] %v174_v12 }
  0x20   : > { %177 = vst [vmem:[%s975_s27 + $0x68] sm:$0xff] %v176_v13 }
  0x21   : > { %179 = vst [vmem:[%s975_s27 + $0x70] sm:$0xff] %v178_v14 }
  0x22   : > { %181 = vst [vmem:[%s975_s27 + $0x78] sm:$0xff] %v180_v15 }
  0x23   : > { %183 = vst [vmem:[%s975_s27 + $0x80] sm:$0xff] %v182_v16 }
  0x24   : > { %185 = vst [vmem:[%s975_s27 + $0x88] sm:$0xff] %v184_v17 }
  0x25   : > { %187 = vst [vmem:[%s975_s27 + $0x90] sm:$0xff] %v186_v18 }
  0x26   : > { %189 = vst [vmem:[%s975_s27 + $0x98] sm:$0xff] %v188_v19 }
  0x27   : > { %191 = vst [vmem:[%s975_s27 + $0xa0] sm:$0xff] %v190_v20 }
  0x28   : > { %193 = vst [vmem:[%s975_s27 + $0xa8] sm:$0xff] %v192_v21 }
  0x29   : > { %195 = vst [vmem:[%s975_s27 + $0xb0] sm:$0xff] %v194_v22 }
  0x2a   : > { %197 = vst [vmem:[%s975_s27 + $0xb8] sm:$0xff] %v196_v23 }
  0x2b   : > { %199 = vst [vmem:[%s975_s27 + $0xc0] sm:$0xff] %v198_v24 }
  0x2c   : > { %201 = vst [vmem:[%s975_s27 + $0xc8] sm:$0xff] %v200_v25 }
  0x2d   : > { %203 = vst [vmem:[%s975_s27 + $0xd0] sm:$0xff] %v202_v26 }
  0x2e   : > { %205 = vst [vmem:[%s975_s27 + $0xd8] sm:$0xff] %v204_v27 }
  0x2f   : > { %207 = vst [vmem:[%s975_s27 + $0xe0] sm:$0xff] %v206_v28 }
  0x30   : > { %209 = vst [vmem:[%s975_s27 + $0xe8] sm:$0xff] %v208_v29 }
  0x31   : > { %211 = vst [vmem:[%s975_s27 + $0xf0] sm:$0xff] %v210_v30 }
  0x32   : > { %213 = vst [vmem:[%s975_s27 + $0xf8] sm:$0xff] %v212_v31 }
  0x33 PF: > { %p677_p7 = scmp.ge.s32.totalorder %s905_s14, 1  ;;  %p218_p8 = scmp.lt.s32.totalorder %s905_s14, 4 }
  0x35   : > { %p219_p9 = pnand %p677_p7, %p218_p8 }
  0x36   : > { %s225_s28 = sand.u32 (!%p219_p9), 1, %s897_s12  }
  0x37   : > { %222 = sbr.rel (%p219_p9) target bundleno = 256 (0x100), region = 51  ;;  %s678_s29 = sshll.u32 (!%p219_p9), %s225_s28, 8 }
  0x38   : > { %s1043_s30 = scalar_lea.vmem (!%p219_p9), [#allocation2], %s678_s29  ;;  %s679_s10 = sshll.u32 (!%p219_p9), %s225_s28, 5 }
  0x39   : > { %s1120_s11 = scalar_lea.vmem (!%p219_p9), [#allocation3], %s679_s10 }
  0x3c   : > { %v798_v32 = vld [vmem:[%s1043_s30 + $0xe0] sm:$0xf]  ;;  %v849_v33 = vld [vmem:[%s1043_s30 + $0xec] sm:$0xf0]  ;;  %v847_v34 = vld [vmem:[%s1043_s30 + $0xe4] sm:$0xf] }
  0x3d   : > { %v799_v35 = vor.u32 %v849_v33, %v798_v32  ;;  %v800_v36 = vld [vmem:[%s1043_s30 + $0xf0] sm:$0xf0]  ;;  %v806_v37 = vld [vmem:[%s1043_s30 + $0xe8] sm:$0xf]  ;;  %v850_v38 = vld [vmem:[%s1043_s30 + $0xf4] sm:$0xf0] }
  0x3e   : > { %v803_v39 = vor.u32 %v847_v34, %v800_v36  ;;  %v807_v40 = vor.u32 %v850_v38, %v806_v37  ;;  %v848_v41 = vld [vmem:[%s1043_s30 + $0xec] sm:$0xf]  ;;  %v808_v42 = vld [vmem:[%s1043_s30 + $0xf8] sm:$0xf0]  ;;  %v782_v43 = vld [vmem:[%s1043_s30 + $0xc0] sm:$0xf] }
  0x3f   : > { %461 = vmatpush.bf16.msra.mxu0 %v799_v35  ;;  %v811_v44 = vor.u32 %v848_v41, %v808_v42  ;;  %v845_v45 = vld [vmem:[%s1043_s30 + $0xcc] sm:$0xf0]  ;;  %v843_v46 = vld [vmem:[%s1043_s30 + $0xc4] sm:$0xf]  ;;  %v784_v47 = vld [vmem:[%s1043_s30 + $0xd0] sm:$0xf0] }
  0x40   : > { %475 = vmatpush.bf16.msra.mxu1 %v803_v39  ;;  %489 = vmatpush.bf16.msra.mxu2 %v807_v40  ;;  %v783_v48 = vor.u32 %v845_v45, %v782_v43  ;;  %v787_v49 = vor.u32 %v843_v46, %v784_v47  ;;  %v790_v50 = vld [vmem:[%s1043_s30 + $0xc8] sm:$0xf]  ;;  %v846_v51 = vld [vmem:[%s1043_s30 + $0xd4] sm:$0xf0]  ;;  %v844_v52 = vld [vmem:[%s1043_s30 + $0xcc] sm:$0xf] }
  0x41   : > { %503 = vmatpush.bf16.msra.mxu3 %v811_v44  ;;  %v791_v53 = vor.u32 %v846_v51, %v790_v50  ;;  %v792_v54 = vld [vmem:[%s1043_s30 + $0xd8] sm:$0xf0]  ;;  %v766_v55 = vld [vmem:[%s1043_s30 + $0xa0] sm:$0xf]  ;;  %v841_v56 = vld [vmem:[%s1043_s30 + $0xac] sm:$0xf0] }
  0x42   : > { %v795_v57 = vor.u32 %v844_v52, %v792_v54  ;;  %v839_v58 = vld [vmem:[%s1043_s30 + $0xa4] sm:$0xf]  ;;  %v768_v59 = vld [vmem:[%s1043_s30 + $0xb0] sm:$0xf0]  ;;  %v774_v60 = vld [vmem:[%s1043_s30 + $0xa8] sm:$0xf]  ;;  %v767_v61 = vor.u32 %v841_v56, %v766_v55 }
  0x43   : > { %462 = vmatpush.bf16.msra.mxu0 %v783_v48  ;;  %v842_v62 = vld [vmem:[%s1043_s30 + $0xb4] sm:$0xf0]  ;;  %v840_v63 = vld [vmem:[%s1043_s30 + $0xac] sm:$0xf]  ;;  %v776_v0 = vld [vmem:[%s1043_s30 + $0xb8] sm:$0xf0]  ;;  %v771_v1 = vor.u32 %v839_v58, %v768_v59 }
  0x44   : > { %476 = vmatpush.bf16.msra.mxu1 %v787_v49  ;;  %490 = vmatpush.bf16.msra.mxu2 %v791_v53  ;;  %v775_v2 = vor.u32 %v842_v62, %v774_v60  ;;  %v750_v3 = vld [vmem:[%s1043_s30 + $0x80] sm:$0xf]  ;;  %v837_v4 = vld [vmem:[%s1043_s30 + $0x8c] sm:$0xf0]  ;;  %v835_v5 = vld [vmem:[%s1043_s30 + $0x84] sm:$0xf]  ;;  %v779_v6 = vor.u32 %v840_v63, %v776_v0 }
  0x45   : > { %504 = vmatpush.bf16.msra.mxu3 %v795_v57  ;;  %v752_v7 = vld [vmem:[%s1043_s30 + $0x90] sm:$0xf0]  ;;  %v758_v8 = vld [vmem:[%s1043_s30 + $0x88] sm:$0xf]  ;;  %v838_v9 = vld [vmem:[%s1043_s30 + $0x94] sm:$0xf0]  ;;  %v751_v12 = vor.u32 %v837_v4, %v750_v3 }
  0x46   : > { %v836_v10 = vld [vmem:[%s1043_s30 + $0x8c] sm:$0xf]  ;;  %v760_v11 = vld [vmem:[%s1043_s30 + $0x98] sm:$0xf0]  ;;  %v755_v13 = vor.u32 %v835_v5, %v752_v7  ;;  %v759_v14 = vor.u32 %v838_v9, %v758_v8  ;;  %v734_v15 = vld [vmem:[%s1043_s30 + $0x60] sm:$0xf] }
  0x47   : > { %463 = vmatpush.bf16.msra.mxu0 %v767_v61  ;;  %v833_v16 = vld [vmem:[%s1043_s30 + $0x6c] sm:$0xf0]  ;;  %v831_v17 = vld [vmem:[%s1043_s30 + $0x64] sm:$0xf]  ;;  %v763_v18 = vor.u32 %v836_v10, %v760_v11  ;;  %v736_v19 = vld [vmem:[%s1043_s30 + $0x70] sm:$0xf0] }
  0x48   : > { %477 = vmatpush.bf16.msra.mxu1 %v771_v1  ;;  %491 = vmatpush.bf16.msra.mxu2 %v775_v2  ;;  %v742_v20 = vld [vmem:[%s1043_s30 + $0x68] sm:$0xf]  ;;  %v834_v21 = vld [vmem:[%s1043_s30 + $0x74] sm:$0xf0]  ;;  %v832_v22 = vld [vmem:[%s1043_s30 + $0x6c] sm:$0xf]  ;;  %v735_v24 = vor.u32 %v833_v16, %v734_v15  ;;  %v739_v25 = vor.u32 %v831_v17, %v736_v19 }
  0x49   : > { %505 = vmatpush.bf16.msra.mxu3 %v779_v6  ;;  %v744_v23 = vld [vmem:[%s1043_s30 + $0x78] sm:$0xf0]  ;;  %v743_v26 = vor.u32 %v834_v21, %v742_v20  ;;  %v718_v27 = vld [vmem:[%s1043_s30 + $0x40] sm:$0xf]  ;;  %v829_v28 = vld [vmem:[%s1043_s30 + $0x4c] sm:$0xf0] }
  0x4a   : > { %v827_v29 = vld [vmem:[%s1043_s30 + $0x44] sm:$0xf]  ;;  %v747_v30 = vor.u32 %v832_v22, %v744_v23  ;;  %v720_v31 = vld [vmem:[%s1043_s30 + $0x50] sm:$0xf0]  ;;  %v726_v32 = vld [vmem:[%s1043_s30 + $0x48] sm:$0xf]  ;;  %v719_v36 = vor.u32 %v829_v28, %v718_v27 }
  0x4b   : > { %464 = vmatpush.bf16.msra.mxu0 %v751_v12  ;;  %v830_v33 = vld [vmem:[%s1043_s30 + $0x54] sm:$0xf0]  ;;  %v828_v34 = vld [vmem:[%s1043_s30 + $0x4c] sm:$0xf]  ;;  %v728_v35 = vld [vmem:[%s1043_s30 + $0x58] sm:$0xf0]  ;;  %v723_v39 = vor.u32 %v827_v29, %v720_v31 }
  0x4c   : > { %478 = vmatpush.bf16.msra.mxu1 %v755_v13  ;;  %492 = vmatpush.bf16.msra.mxu2 %v759_v14  ;;  %v702_v37 = vld [vmem:[%s1043_s30 + $0x20] sm:$0xf]  ;;  %v825_v38 = vld [vmem:[%s1043_s30 + $0x2c] sm:$0xf0]  ;;  %v727_v40 = vor.u32 %v830_v33, %v726_v32  ;;  %v823_v41 = vld [vmem:[%s1043_s30 + $0x24] sm:$0xf]  ;;  %v731_v44 = vor.u32 %v828_v34, %v728_v35 }
  0x4d   : > { %506 = vmatpush.bf16.msra.mxu3 %v763_v18  ;;  %v704_v42 = vld [vmem:[%s1043_s30 + $0x30] sm:$0xf0]  ;;  %v710_v43 = vld [vmem:[%s1043_s30 + $0x28] sm:$0xf]  ;;  %v826_v45 = vld [vmem:[%s1043_s30 + $0x34] sm:$0xf0]  ;;  %v703_v51 = vor.u32 %v825_v38, %v702_v37 }
  0x4e   : > { %v283_v46 = vld [vmem:[%s1149_s2] sm:$0xff]  ;;  %v824_v47 = vld [vmem:[%s1043_s30 + $0x2c] sm:$0xf]  ;;  %v712_v48 = vld [vmem:[%s1043_s30 + $0x38] sm:$0xf0]  ;;  %v907_v49 = vmov 0   ;;  %v707_v52 = vor.u32 %v823_v41, %v704_v42  ;;  %v711_v53 = vor.u32 %v826_v45, %v710_v43 }
  0x4f   : > { %465 = vmatpush.bf16.msra.mxu0 %v735_v24  ;;  %879 = vset.pattern.permute.xlu0 %v907_v49  ;;  %v908_v50 = vmov 1   ;;  %v686_v54 = vld [vmem:[%s1043_s30] sm:$0xf]  ;;  %v821_v55 = vld [vmem:[%s1043_s30 + $0xc] sm:$0xf0]  ;;  %v715_v57 = vor.u32 %v824_v47, %v712_v48  ;;  %v909_v63 = vmov 2  }
  0x50   : > { %479 = vmatpush.bf16.msra.mxu1 %v739_v25  ;;  %493 = vmatpush.bf16.msra.mxu2 %v743_v26  ;;  %v819_v56 = vld [vmem:[%s1043_s30 + $0x4] sm:$0xf]  ;;  %v688_v58 = vld [vmem:[%s1043_s30 + $0x10] sm:$0xf0]  ;;  %v694_v59 = vld [vmem:[%s1043_s30 + $0x8] sm:$0xf]  ;;  %v687_v0 = vor.u32 %v821_v55, %v686_v54 }
  0x51   : > { %507 = vmatpush.bf16.msra.mxu3 %v747_v30  ;;  %880 = vset.pattern.permute.xlu1 %v908_v50  ;;  %v822_v60 = vld [vmem:[%s1043_s30 + $0x14] sm:$0xf0]  ;;  %v820_v61 = vld [vmem:[%s1043_s30 + $0xc] sm:$0xf]  ;;  %v696_v62 = vld [vmem:[%s1043_s30 + $0x18] sm:$0xf0]  ;;  %v691_v1 = vor.u32 %v819_v56, %v688_v58 }
  0x52   : > { %287 = vperm.xlu0 %879, %v283_v46   ;;  %542 = vperm.xlu1 %880, %v283_v46   ;;  %v695_v2 = vor.u32 %v822_v60, %v694_v59  ;;  %v284_v3 = vld [vmem:[%s1149_s2 + $0x8] sm:$0xff]  ;;  %v699_v4 = vor.u32 %v820_v61, %v696_v62  ;;  %v818_v5 = vld [vmem:[%s1147_s0] sm:$0xff]  ;;  %s851_s12 = sshll.u32 (%p960_p5), %s670_s15, 4 }
  0x53   : > { %466 = vmatpush.bf16.msra.mxu0 %v719_v36  ;;  %881 = vset.pattern.permute.xlu2 %v909_v63  ;;  %s590_s21 = scalar_lea.vmem (%p960_p5), %s1150_s3, %s851_s12 }
  0x54   : > { %480 = vmatpush.bf16.msra.mxu1 %v723_v39  ;;  %494 = vmatpush.bf16.msra.mxu2 %v727_v40 }
  0x55   : > { %508 = vmatpush.bf16.msra.mxu3 %v731_v44  ;;  %558 = vperm.xlu2 %881, %v283_v46  }
  0x57   : > { %467 = vmatpush.bf16.msra.mxu0 %v703_v51 }
  0x58   : > { %481 = vmatpush.bf16.msra.mxu1 %v707_v52  ;;  %495 = vmatpush.bf16.msra.mxu2 %v711_v53 }
  0x59   : > { %509 = vmatpush.bf16.msra.mxu3 %v715_v57 }
  0x5a   : > { %292 = vperm.xlu0 %879, %v284_v3   ;;  %546 = vperm.xlu1 %880, %v284_v3  }
  0x5b   : > { %468 = vmatpush.bf16.msra.mxu0 %v687_v0 }
  0x5c   : > { %482 = vmatpush.bf16.msra.mxu1 %v691_v1  ;;  %496 = vmatpush.bf16.msra.mxu2 %v695_v2 }
  0x5d   : > { %510 = vmatpush.bf16.msra.mxu3 %v699_v4  ;;  %562 = vperm.xlu2 %881, %v284_v3  }
  0x5e   : > { %469 = vmatmul.bf16.vlgmr.msra.gmra.mxu0 %v818_v5 }
  0x5f   : > { %483 = vmatmul.bf16.vlgmr.msra.gmra.mxu1 %v818_v5  ;;  %497 = vmatmul.bf16.vlgmr.msra.gmra.mxu2 %v818_v5 }
  0x60   : > { %511 = vmatmul.bf16.vlgmr.msra.gmra.mxu3 %v818_v5 }
  0x62   : > { %882 = vset.pattern.permute.xlu0 %v909_v63 }
  0xaf   : > { %v559_v17 = vpop.permute.xlu2 %558 }
  0xb7   : > { %v563_v47 = vpop.permute.xlu2 %562 }
  0xc4   : > { %v288_v6 = vpop.permute.xlu0 %287  ;;  %v543_v13 = vpop.permute.xlu1 %542 }
  0xcc   : > { %v293_v19 = vpop.permute.xlu0 %292  ;;  %v547_v39 = vpop.permute.xlu1 %546 }
  0xdb   : > { %v470_v7 = vpop.f32.mrf.mxu0 }
  0xdc   : > { %v471_v8 = vadd.f32 %v470_v7, %v288_v6  ;;  %v484_v9 = vpop.f32.mrf.mxu1 }
  0xdd   : > { %v485_v10 = vadd.f32 %v484_v9, %v288_v6 }
  0xde   : > { %vm517_vm0 = vcmp.ge.f32.partialorder %v471_v8, 0.0  ;;  %v525_v11 = vmul.f32 0.02, %v471_v8 }
  0xdf   : > { %vm518_vm1 = vcmp.ge.f32.partialorder %v485_v10, 0.0  ;;  %v526_v12 = vmul.f32 0.02, %v485_v10 }
  0xe0   : > { %v533_v14 = vsel %vm517_vm0, %v471_v8, %v525_v11 }
  0xe1   : > { %v534_v15 = vsel %vm518_vm1, %v485_v10, %v526_v12  ;;  %v549_v16 = vmul.f32 %v543_v13, %v533_v14 }
  0xe2   : > { %v550_v18 = vmul.f32 %v543_v13, %v534_v15  ;;  %v498_v20 = vpop.f32.mrf.mxu2 }
  0xe3   : > { %v565_v21 = vadd.f32 %v559_v17, %v549_v16  ;;  %v499_v22 = vadd.f32 %v498_v20, %v288_v6  ;;  %v512_v23 = vpop.f32.mrf.mxu3  ;;  %v472_v24 = vpop.f32.mrf.mxu0 }
  0xe4   : > { %v566_v25 = vadd.f32 %v559_v17, %v550_v18  ;;  %v513_v26 = vadd.f32 %v512_v23, %v288_v6  ;;  %v473_v27 = vadd.f32 %v472_v24, %v293_v19  ;;  %v486_v28 = vpop.f32.mrf.mxu1 }
  0xe5   : > { %vm519_vm2 = vcmp.ge.f32.partialorder %v499_v22, 0.0  ;;  %v527_v29 = vmul.f32 0.02, %v499_v22  ;;  %v487_v30 = vadd.f32 %v486_v28, %v293_v19 }
  0xe6   : > { %v573_v31 = vpack.c.bf16 %v566_v25, %v565_v21  ;;  %vm520_vm3 = vcmp.ge.f32.partialorder %v513_v26, 0.0  ;;  %v528_v32 = vmul.f32 0.02, %v513_v26  ;;  %vm521_vm4 = vcmp.ge.f32.partialorder %v473_v27, 0.0 }
  0xe7   : > { %v535_v33 = vsel %vm519_vm2, %v499_v22, %v527_v29  ;;  %v529_v34 = vmul.f32 0.02, %v473_v27  ;;  %vm522_vm5 = vcmp.ge.f32.partialorder %v487_v30, 0.0  ;;  %v530_v35 = vmul.f32 0.02, %v487_v30 }
  0xe8   : > { %577 = vst [vmem:[%s1120_s11] sm:$0xff] %v573_v31  ;;  %v551_v36 = vmul.f32 %v543_v13, %v535_v33  ;;  %v536_v37 = vsel %vm520_vm3, %v513_v26, %v528_v32 }
  0xe9   : > { %v552_v38 = vmul.f32 %v543_v13, %v536_v37  ;;  %v537_v40 = vsel %vm521_vm4, %v473_v27, %v529_v34  ;;  %v538_v41 = vsel %vm522_vm5, %v487_v30, %v530_v35 }
  0xea   : > { %v567_v42 = vadd.f32 %v559_v17, %v551_v36  ;;  %v553_v43 = vmul.f32 %v547_v39, %v537_v40  ;;  %v554_v44 = vmul.f32 %v547_v39, %v538_v41  ;;  %v500_v45 = vpop.f32.mrf.mxu2 }
  0xeb   : > { %v568_v46 = vadd.f32 %v559_v17, %v552_v38  ;;  %v501_v48 = vadd.f32 %v500_v45, %v293_v19  ;;  %v514_v49 = vpop.f32.mrf.mxu3 }
  0xec   : > { %v569_v50 = vadd.f32 %v563_v47, %v553_v43  ;;  %v570_v51 = vadd.f32 %v563_v47, %v554_v44  ;;  %v515_v52 = vadd.f32 %v514_v49, %v293_v19 }
  0xed   : > { %v574_v53 = vpack.c.bf16 %v568_v46, %v567_v42  ;;  %vm523_vm6 = vcmp.ge.f32.partialorder %v501_v48, 0.0  ;;  %v531_v54 = vmul.f32 0.02, %v501_v48 }
  0xee   : > { %v575_v55 = vpack.c.bf16 %v570_v51, %v569_v50  ;;  %vm524_vm7 = vcmp.ge.f32.partialorder %v515_v52, 0.0  ;;  %v532_v56 = vmul.f32 0.02, %v515_v52 }
  0xef   : > { %578 = vst [vmem:[%s1120_s11 + $0x8] sm:$0xff] %v574_v53  ;;  %v539_v57 = vsel %vm523_vm6, %v501_v48, %v531_v54  ;;  %v603_v0 = vld [vmem:[%s1120_s11] sm:$0xff] (%p960_p5) }
  0xf0   : > { %579 = vst [vmem:[%s1120_s11 + $0x10] sm:$0xff] %v575_v55  ;;  %v555_v58 = vmul.f32 %v547_v39, %v539_v57  ;;  %v540_v59 = vsel %vm524_vm7, %v515_v52, %v532_v56 }
  0xf1   : > { %v556_v60 = vmul.f32 %v547_v39, %v540_v59  ;;  %604 = vst [vmem:[%s590_s21] sm:$0xff] (%p960_p5), %v603_v0 }
  0xf2   : > { %v571_v61 = vadd.f32 %v563_v47, %v555_v58 }
  0xf3   : > { %v572_v62 = vadd.f32 %v563_v47, %v556_v60  ;;  %587 = sbr.rel (!%p960_p5) target bundleno = 256 (0x100), region = 59 }
  0xf5   : > { %v576_v63 = vpack.c.bf16 %v572_v62, %v571_v61 }
  0xf6   : > { %v605_v1 = vld [vmem:[%s1120_s11 + $0x8] sm:$0xff] (%p960_p5) }
  0xf7   : > { %580 = vst [vmem:[%s1120_s11 + $0x18] sm:$0xff] %v576_v63  ;;  %v607_v2 = vld [vmem:[%s1120_s11 + $0x10] sm:$0xff] (%p960_p5) }
  0xf8   : > { %606 = vst [vmem:[%s590_s21 + $0x8] sm:$0xff] %v605_v1 }
  0xf9   : > { %608 = vst [vmem:[%s590_s21 + $0x30] sm:$0xff] %v607_v2 }
  0xfe   : > { %v609_v3 = vld [vmem:[%s1120_s11 + $0x18] sm:$0xff] }
  0xff   : > { %610 = vst [vmem:[%s590_s21 + $0x38] sm:$0xff] %v609_v3 }
 0x100 PF: > { %p10_p10 = scmp.ge.s32.totalorder %s947_s16, 5   ;;  %s1152_s12 = smov %s901_s13 }
 0x101   : > { %s1153_s13 = smov %s958_s19  ;;  %s1154_s14 = smov %s947_s16 }
 0x102   :  { %12 = sbr.rel (!%p10_p10) target bundleno = 2 (0x2), region = 113 }

// kernel: nowcasting_forward.46
= control target key start
LH: loop header
LB: loop body
LE: loop exit
PB: predicated region body
PF: predicated region fallthrough
CT: control target
= control target key end

     0   :  { %s930_s12 = smov 0   ;;  %s932_s13 = smov 0   ;;  %s1147_s0 = inlined_call_operand.vmem [shape: bf16[16,128], index: 0, kind: input, shape index: {}]   ;;  %s1148_s1 = inlined_call_operand.vmem [shape: bf16[128,8192], index: 1, kind: input, shape index: {}]   ;;  %s1149_s2 = inlined_call_operand.vmem [shape: f32[16,3], index: 2, kind: input, shape index: {}]   ;;  %s1150_s3 = inlined_call_operand.vmem [shape: bf16[16,8192], index: 3, kind: output, shape index: {}]  }
   0x1   :  { %s934_s14 = smov 0  }
   0x2 LB: > { %s670_s15 = sadd.s32 4294967295, %s905_s14   ;;  %s947_s16 = sadd.s32 1, %s905_s14   ;;  %s905_s14 = sphi %s934_s14, %s1154_s14   ;;  %s901_s13 = sphi %s932_s13, %s1153_s13   ;;  %s897_s12 = sphi %s930_s12, %s1152_s12  }
   0x3   : > { %s38_s17 = ssub.s32 %s905_s14, %s947_s16  ;;  %s41_s18 = sadd.s32 1, %s901_s13 }
   0x4   : > { %p39_p0 = scmp.eq.s32.totalorder %s38_s17, 0  ;;  %p48_p1 = scmp.ne.s32.totalorder %s901_s13, %s897_s12 }
   0x5   : > { %p49_p2 = scmp.eq.s32.totalorder %s905_s14, 0  ;;  %p99_p3 = scmp.eq.s32.totalorder %s670_s15, 15 }
   0x6   : > { %s958_s19 = scalar_select %p39_p0, %s901_s13, %s41_s18  }
   0x7   : > { %p50_p4 = por %p49_p2, %p48_p1  ;;  %p960_p5 = por %p99_p3, %p48_p1 }
   0x8   : > { %p673_p6 = scmp.ge.s32.totalorder %s905_s14, 16 }
   0xa   : > { %127 = sbr.rel (%p673_p6) target bundleno = 51 (0x33), region = 24 }
   0xf   : > { %130 = sbr.rel (!%p50_p4) target bundleno = 51 (0x33), region = 28  ;;  %s132_s21 = sand.u32 (%p50_p4), 1, %s901_s13  }
  0x10   : > { %s817_s22 = sshll.u32 (%p50_p4), %s905_s14, 4  ;;  %s674_s23 = sshll.u32 (%p50_p4), %s132_s21, 8 }
  0x11   : > { %s970_s26 = scalar_lea.vmem (%p50_p4), %s1148_s1, %s817_s22  ;;  %s975_s27 = scalar_lea.vmem (%p50_p4), [#allocation2], %s674_s23 }
  0x12   : > { %v150_v0 = vld [vmem:[%s970_s26] sm:$0xff] (%p50_p4)  ;;  %v152_v1 = vld [vmem:[%s970_s26 + $0x8] sm:$0xff] (%p50_p4) }
  0x13   : > { %v154_v2 = vld [vmem:[%s970_s26 + $0x100] sm:$0xff] (%p50_p4)  ;;  %151 = vst [vmem:[%s975_s27] sm:$0xff] (%p50_p4), %v150_v0  ;;  %v156_v3 = vld [vmem:[%s970_s26 + $0x108] sm:$0xff] (%p50_p4) }
  0x14   : > { %153 = vst [vmem:[%s975_s27 + $0x8] sm:$0xff] %v152_v1  ;;  %v158_v4 = vld [vmem:[%s970_s26 + $0x200] sm:$0xff]  ;;  %v160_v5 = vld [vmem:[%s970_s26 + $0x208] sm:$0xff] }
  0x15   : > { %155 = vst [vmem:[%s975_s27 + $0x10] sm:$0xff] %v154_v2  ;;  %v162_v6 = vld [vmem:[%s970_s26 + $0x300] sm:$0xff]  ;;  %v164_v7 = vld [vmem:[%s970_s26 + $0x308] sm:$0xff] }
  0x16   : > { %157 = vst [vmem:[%s975_s27 + $0x18] sm:$0xff] %v156_v3  ;;  %v166_v8 = vld [vmem:[%s970_s26 + $0x400] sm:$0xff]  ;;  %v168_v9 = vld [vmem:[%s970_s26 + $0x408] sm:$0xff] }
  0x17   : > { %159 = vst [vmem:[%s975_s27 + $0x20] sm:$0xff] %v158_v4  ;;  %v170_v10 = vld [vmem:[%s970_s26 + $0x500] sm:$0xff]  ;;  %v172_v11 = vld [vmem:[%s970_s26 + $0x508] sm:$0xff] }
  0x18   : > { %161 = vst [vmem:[%s975_s27 + $0x28] sm:$0xff] %v160_v5  ;;  %v174_v12 = vld [vmem:[%s970_s26 + $0x600] sm:$0xff]  ;;  %v176_v13 = vld [vmem:[%s970_s26 + $0x608] sm:$0xff] }
  0x19   : > { %163 = vst [vmem:[%s975_s27 + $0x30] sm:$0xff] %v162_v6  ;;  %v178_v14 = vld [vmem:[%s970_s26 + $0x700] sm:$0xff]  ;;  %v180_v15 = vld [vmem:[%s970_s26 + $0x708] sm:$0xff] }
  0x1a   : > { %165 = vst [vmem:[%s975_s27 + $0x38] sm:$0xff] %v164_v7  ;;  %v182_v16 = vld [vmem:[%s970_s26 + $0x800] sm:$0xff]  ;;  %v184_v17 = vld [vmem:[%s970_s26 + $0x808] sm:$0xff] }
  0x1b   : > { %167 = vst [vmem:[%s975_s27 + $0x40] sm:$0xff] %v166_v8  ;;  %v186_v18 = vld [vmem:[%s970_s26 + $0x900] sm:$0xff]  ;;  %v188_v19 = vld [vmem:[%s970_s26 + $0x908] sm:$0xff] }
  0x1c   : > { %169 = vst [vmem:[%s975_s27 + $0x48] sm:$0xff] %v168_v9  ;;  %v190_v20 = vld [vmem:[%s970_s26 + $0xa00] sm:$0xff]  ;;  %v192_v21 = vld [vmem:[%s970_s26 + $0xa08] sm:$0xff] }
  0x1d   : > { %171 = vst [vmem:[%s975_s27 + $0x50] sm:$0xff] %v170_v10  ;;  %v194_v22 = vld [vmem:[%s970_s26 + $0xb00] sm:$0xff]  ;;  %v196_v23 = vld [vmem:[%s970_s26 + $0xb08] sm:$0xff] }
  0x1e   : > { %173 = vst [vmem:[%s975_s27 + $0x58] sm:$0xff] %v172_v11  ;;  %v198_v24 = vld [vmem:[%s970_s26 + $0xc00] sm:$0xff]  ;;  %v200_v25 = vld [vmem:[%s970_s26 + $0xc08] sm:$0xff] }
  0x1f   : > { %175 = vst [vmem:[%s975_s27 + $0x60] sm:$0xff] %v174_v12  ;;  %v202_v26 = vld [vmem:[%s970_s26 + $0xd00] sm:$0xff]  ;;  %v204_v27 = vld [vmem:[%s970_s26 + $0xd08] sm:$0xff] }
  0x20   : > { %177 = vst [vmem:[%s975_s27 + $0x68] sm:$0xff] %v176_v13  ;;  %v206_v28 = vld [vmem:[%s970_s26 + $0xe00] sm:$0xff]  ;;  %v208_v29 = vld [vmem:[%s970_s26 + $0xe08] sm:$0xff] }
  0x21   : > { %179 = vst [vmem:[%s975_s27 + $0x70] sm:$0xff] %v178_v14  ;;  %v210_v30 = vld [vmem:[%s970_s26 + $0xf00] sm:$0xff]  ;;  %v212_v31 = vld [vmem:[%s970_s26 + $0xf08] sm:$0xff] }
  0x22   : > { %181 = vst [vmem:[%s975_s27 + $0x78] sm:$0xff] %v180_v15 }
  0x23   : > { %183 = vst [vmem:[%s975_s27 + $0x80] sm:$0xff] %v182_v16 }
  0x24   : > { %185 = vst [vmem:[%s975_s27 + $0x88] sm:$0xff] %v184_v17 }
  0x25   : > { %187 = vst [vmem:[%s975_s27 + $0x90] sm:$0xff] %v186_v18 }
  0x26   : > { %189 = vst [vmem:[%s975_s27 + $0x98] sm:$0xff] %v188_v19 }
  0x27   : > { %191 = vst [vmem:[%s975_s27 + $0xa0] sm:$0xff] %v190_v20 }
  0x28   : > { %193 = vst [vmem:[%s975_s27 + $0xa8] sm:$0xff] %v192_v21 }
  0x29   : > { %195 = vst [vmem:[%s975_s27 + $0xb0] sm:$0xff] %v194_v22 }
  0x2a   : > { %197 = vst [vmem:[%s975_s27 + $0xb8] sm:$0xff] %v196_v23 }
  0x2b   : > { %199 = vst [vmem:[%s975_s27 + $0xc0] sm:$0xff] %v198_v24 }
  0x2c   : > { %201 = vst [vmem:[%s975_s27 + $0xc8] sm:$0xff] %v200_v25 }
  0x2d   : > { %203 = vst [vmem:[%s975_s27 + $0xd0] sm:$0xff] %v202_v26 }
  0x2e   : > { %205 = vst [vmem:[%s975_s27 + $0xd8] sm:$0xff] %v204_v27 }
  0x2f   : > { %207 = vst [vmem:[%s975_s27 + $0xe0] sm:$0xff] %v206_v28 }
  0x30   : > { %209 = vst [vmem:[%s975_s27 + $0xe8] sm:$0xff] %v208_v29 }
  0x31   : > { %211 = vst [vmem:[%s975_s27 + $0xf0] sm:$0xff] %v210_v30 }
  0x32   : > { %213 = vst [vmem:[%s975_s27 + $0xf8] sm:$0xff] %v212_v31 }
  0x33 PF: > { %p677_p7 = scmp.ge.s32.totalorder %s905_s14, 1  ;;  %p218_p8 = scmp.lt.s32.totalorder %s905_s14, 17 }
  0x35   : > { %p219_p9 = pnand %p677_p7, %p218_p8 }
  0x36   : > { %s225_s28 = sand.u32 (!%p219_p9), 1, %s897_s12  }
  0x37   : > { %222 = sbr.rel (%p219_p9) target bundleno = 256 (0x100), region = 51  ;;  %s678_s29 = sshll.u32 (!%p219_p9), %s225_s28, 8 }
  0x38   : > { %s1043_s30 = scalar_lea.vmem (!%p219_p9), [#allocation2], %s678_s29  ;;  %s679_s10 = sshll.u32 (!%p219_p9), %s225_s28, 5 }
  0x39   : > { %s1120_s11 = scalar_lea.vmem (!%p219_p9), [#allocation3], %s679_s10 }
  0x3c   : > { %v798_v32 = vld [vmem:[%s1043_s30 + $0xe0] sm:$0xf]  ;;  %v849_v33 = vld [vmem:[%s1043_s30 + $0xec] sm:$0xf0]  ;;  %v847_v34 = vld [vmem:[%s1043_s30 + $0xe4] sm:$0xf] }
  0x3d   : > { %v799_v35 = vor.u32 %v849_v33, %v798_v32  ;;  %v800_v36 = vld [vmem:[%s1043_s30 + $0xf0] sm:$0xf0]  ;;  %v806_v37 = vld [vmem:[%s1043_s30 + $0xe8] sm:$0xf]  ;;  %v850_v38 = vld [vmem:[%s1043_s30 + $0xf4] sm:$0xf0] }
  0x3e   : > { %v803_v39 = vor.u32 %v847_v34, %v800_v36  ;;  %v807_v40 = vor.u32 %v850_v38, %v806_v37  ;;  %v848_v41 = vld [vmem:[%s1043_s30 + $0xec] sm:$0xf]  ;;  %v808_v42 = vld [vmem:[%s1043_s30 + $0xf8] sm:$0xf0]  ;;  %v782_v43 = vld [vmem:[%s1043_s30 + $0xc0] sm:$0xf] }
  0x3f   : > { %461 = vmatpush.bf16.msra.mxu0 %v799_v35  ;;  %v811_v44 = vor.u32 %v848_v41, %v808_v42  ;;  %v845_v45 = vld [vmem:[%s1043_s30 + $0xcc] sm:$0xf0]  ;;  %v843_v46 = vld [vmem:[%s1043_s30 + $0xc4] sm:$0xf]  ;;  %v784_v47 = vld [vmem:[%s1043_s30 + $0xd0] sm:$0xf0] }
  0x40   : > { %475 = vmatpush.bf16.msra.mxu1 %v803_v39  ;;  %489 = vmatpush.bf16.msra.mxu2 %v807_v40  ;;  %v783_v48 = vor.u32 %v845_v45, %v782_v43  ;;  %v787_v49 = vor.u32 %v843_v46, %v784_v47  ;;  %v790_v50 = vld [vmem:[%s1043_s30 + $0xc8] sm:$0xf]  ;;  %v846_v51 = vld [vmem:[%s1043_s30 + $0xd4] sm:$0xf0]  ;;  %v844_v52 = vld [vmem:[%s1043_s30 + $0xcc] sm:$0xf] }
  0x41   : > { %503 = vmatpush.bf16.msra.mxu3 %v811_v44  ;;  %v791_v53 = vor.u32 %v846_v51, %v790_v50  ;;  %v792_v54 = vld [vmem:[%s1043_s30 + $0xd8] sm:$0xf0]  ;;  %v766_v55 = vld [vmem:[%s1043_s30 + $0xa0] sm:$0xf]  ;;  %v841_v56 = vld [vmem:[%s1043_s30 + $0xac] sm:$0xf0] }
  0x42   : > { %v795_v57 = vor.u32 %v844_v52, %v792_v54  ;;  %v839_v58 = vld [vmem:[%s1043_s30 + $0xa4] sm:$0xf]  ;;  %v768_v59 = vld [vmem:[%s1043_s30 + $0xb0] sm:$0xf0]  ;;  %v774_v60 = vld [vmem:[%s1043_s30 + $0xa8] sm:$0xf]  ;;  %v767_v61 = vor.u32 %v841_v56, %v766_v55 }
  0x43   : > { %462 = vmatpush.bf16.msra.mxu0 %v783_v48  ;;  %v842_v62 = vld [vmem:[%s1043_s30 + $0xb4] sm:$0xf0]  ;;  %v840_v63 = vld [vmem:[%s1043_s30 + $0xac] sm:$0xf]  ;;  %v776_v0 = vld [vmem:[%s1043_s30 + $0xb8] sm:$0xf0]  ;;  %v771_v1 = vor.u32 %v839_v58, %v768_v59 }
  0x44   : > { %476 = vmatpush.bf16.msra.mxu1 %v787_v49  ;;  %490 = vmatpush.bf16.msra.mxu2 %v791_v53  ;;  %v775_v2 = vor.u32 %v842_v62, %v774_v60  ;;  %v750_v3 = vld [vmem:[%s1043_s30 + $0x80] sm:$0xf]  ;;  %v837_v4 = vld [vmem:[%s1043_s30 + $0x8c] sm:$0xf0]  ;;  %v835_v5 = vld [vmem:[%s1043_s30 + $0x84] sm:$0xf]  ;;  %v779_v6 = vor.u32 %v840_v63, %v776_v0 }
  0x45   : > { %504 = vmatpush.bf16.msra.mxu3 %v795_v57  ;;  %v752_v7 = vld [vmem:[%s1043_s30 + $0x90] sm:$0xf0]  ;;  %v758_v8 = vld [vmem:[%s1043_s30 + $0x88] sm:$0xf]  ;;  %v838_v9 = vld [vmem:[%s1043_s30 + $0x94] sm:$0xf0]  ;;  %v751_v12 = vor.u32 %v837_v4, %v750_v3 }
  0x46   : > { %v836_v10 = vld [vmem:[%s1043_s30 + $0x8c] sm:$0xf]  ;;  %v760_v11 = vld [vmem:[%s1043_s30 + $0x98] sm:$0xf0]  ;;  %v755_v13 = vor.u32 %v835_v5, %v752_v7  ;;  %v759_v14 = vor.u32 %v838_v9, %v758_v8  ;;  %v734_v15 = vld [vmem:[%s1043_s30 + $0x60] sm:$0xf] }
  0x47   : > { %463 = vmatpush.bf16.msra.mxu0 %v767_v61  ;;  %v833_v16 = vld [vmem:[%s1043_s30 + $0x6c] sm:$0xf0]  ;;  %v831_v17 = vld [vmem:[%s1043_s30 + $0x64] sm:$0xf]  ;;  %v763_v18 = vor.u32 %v836_v10, %v760_v11  ;;  %v736_v19 = vld [vmem:[%s1043_s30 + $0x70] sm:$0xf0] }
  0x48   : > { %477 = vmatpush.bf16.msra.mxu1 %v771_v1  ;;  %491 = vmatpush.bf16.msra.mxu2 %v775_v2  ;;  %v742_v20 = vld [vmem:[%s1043_s30 + $0x68] sm:$0xf]  ;;  %v834_v21 = vld [vmem:[%s1043_s30 + $0x74] sm:$0xf0]  ;;  %v832_v22 = vld [vmem:[%s1043_s30 + $0x6c] sm:$0xf]  ;;  %v735_v24 = vor.u32 %v833_v16, %v734_v15  ;;  %v739_v25 = vor.u32 %v831_v17, %v736_v19 }
  0x49   : > { %505 = vmatpush.bf16.msra.mxu3 %v779_v6  ;;  %v744_v23 = vld [vmem:[%s1043_s30 + $0x78] sm:$0xf0]  ;;  %v743_v26 = vor.u32 %v834_v21, %v742_v20  ;;  %v718_v27 = vld [vmem:[%s1043_s30 + $0x40] sm:$0xf]  ;;  %v829_v28 = vld [vmem:[%s1043_s30 + $0x4c] sm:$0xf0] }
  0x4a   : > { %v827_v29 = vld [vmem:[%s1043_s30 + $0x44] sm:$0xf]  ;;  %v747_v30 = vor.u32 %v832_v22, %v744_v23  ;;  %v720_v31 = vld [vmem:[%s1043_s30 + $0x50] sm:$0xf0]  ;;  %v726_v32 = vld [vmem:[%s1043_s30 + $0x48] sm:$0xf]  ;;  %v719_v36 = vor.u32 %v829_v28, %v718_v27 }
  0x4b   : > { %464 = vmatpush.bf16.msra.mxu0 %v751_v12  ;;  %v830_v33 = vld [vmem:[%s1043_s30 + $0x54] sm:$0xf0]  ;;  %v828_v34 = vld [vmem:[%s1043_s30 + $0x4c] sm:$0xf]  ;;  %v728_v35 = vld [vmem:[%s1043_s30 + $0x58] sm:$0xf0]  ;;  %v723_v39 = vor.u32 %v827_v29, %v720_v31 }
  0x4c   : > { %478 = vmatpush.bf16.msra.mxu1 %v755_v13  ;;  %492 = vmatpush.bf16.msra.mxu2 %v759_v14  ;;  %v702_v37 = vld [vmem:[%s1043_s30 + $0x20] sm:$0xf]  ;;  %v825_v38 = vld [vmem:[%s1043_s30 + $0x2c] sm:$0xf0]  ;;  %v727_v40 = vor.u32 %v830_v33, %v726_v32  ;;  %v823_v41 = vld [vmem:[%s1043_s30 + $0x24] sm:$0xf]  ;;  %v731_v44 = vor.u32 %v828_v34, %v728_v35 }
  0x4d   : > { %506 = vmatpush.bf16.msra.mxu3 %v763_v18  ;;  %v704_v42 = vld [vmem:[%s1043_s30 + $0x30] sm:$0xf0]  ;;  %v710_v43 = vld [vmem:[%s1043_s30 + $0x28] sm:$0xf]  ;;  %v826_v45 = vld [vmem:[%s1043_s30 + $0x34] sm:$0xf0]  ;;  %v703_v51 = vor.u32 %v825_v38, %v702_v37 }
  0x4e   : > { %v283_v46 = vld [vmem:[%s1149_s2] sm:$0xff]  ;;  %v824_v47 = vld [vmem:[%s1043_s30 + $0x2c] sm:$0xf]  ;;  %v712_v48 = vld [vmem:[%s1043_s30 + $0x38] sm:$0xf0]  ;;  %v907_v49 = vmov 0   ;;  %v707_v52 = vor.u32 %v823_v41, %v704_v42  ;;  %v711_v53 = vor.u32 %v826_v45, %v710_v43 }
  0x4f   : > { %465 = vmatpush.bf16.msra.mxu0 %v735_v24  ;;  %879 = vset.pattern.permute.xlu0 %v907_v49  ;;  %v908_v50 = vmov 1   ;;  %v686_v54 = vld [vmem:[%s1043_s30] sm:$0xf]  ;;  %v821_v55 = vld [vmem:[%s1043_s30 + $0xc] sm:$0xf0]  ;;  %v715_v57 = vor.u32 %v824_v47, %v712_v48  ;;  %v909_v63 = vmov 2  }
  0x50   : > { %479 = vmatpush.bf16.msra.mxu1 %v739_v25  ;;  %493 = vmatpush.bf16.msra.mxu2 %v743_v26  ;;  %v819_v56 = vld [vmem:[%s1043_s30 + $0x4] sm:$0xf]  ;;  %v688_v58 = vld [vmem:[%s1043_s30 + $0x10] sm:$0xf0]  ;;  %v694_v59 = vld [vmem:[%s1043_s30 + $0x8] sm:$0xf]  ;;  %v687_v0 = vor.u32 %v821_v55, %v686_v54 }
  0x51   : > { %507 = vmatpush.bf16.msra.mxu3 %v747_v30  ;;  %880 = vset.pattern.permute.xlu1 %v908_v50  ;;  %v822_v60 = vld [vmem:[%s1043_s30 + $0x14] sm:$0xf0]  ;;  %v820_v61 = vld [vmem:[%s1043_s30 + $0xc] sm:$0xf]  ;;  %v696_v62 = vld [vmem:[%s1043_s30 + $0x18] sm:$0xf0]  ;;  %v691_v1 = vor.u32 %v819_v56, %v688_v58 }
  0x52   : > { %287 = vperm.xlu0 %879, %v283_v46   ;;  %542 = vperm.xlu1 %880, %v283_v46   ;;  %v695_v2 = vor.u32 %v822_v60, %v694_v59  ;;  %v284_v3 = vld [vmem:[%s1149_s2 + $0x8] sm:$0xff]  ;;  %v699_v4 = vor.u32 %v820_v61, %v696_v62  ;;  %v818_v5 = vld [vmem:[%s1147_s0] sm:$0xff]  ;;  %s851_s12 = sshll.u32 (%p960_p5), %s670_s15, 4 }
  0x53   : > { %466 = vmatpush.bf16.msra.mxu0 %v719_v36  ;;  %881 = vset.pattern.permute.xlu2 %v909_v63  ;;  %s590_s21 = scalar_lea.vmem (%p960_p5), %s1150_s3, %s851_s12 }
  0x54   : > { %480 = vmatpush.bf16.msra.mxu1 %v723_v39  ;;  %494 = vmatpush.bf16.msra.mxu2 %v727_v40 }
  0x55   : > { %508 = vmatpush.bf16.msra.mxu3 %v731_v44  ;;  %558 = vperm.xlu2 %881, %v283_v46  }
  0x57   : > { %467 = vmatpush.bf16.msra.mxu0 %v703_v51 }
  0x58   : > { %481 = vmatpush.bf16.msra.mxu1 %v707_v52  ;;  %495 = vmatpush.bf16.msra.mxu2 %v711_v53 }
  0x59   : > { %509 = vmatpush.bf16.msra.mxu3 %v715_v57 }
  0x5a   : > { %292 = vperm.xlu0 %879, %v284_v3   ;;  %546 = vperm.xlu1 %880, %v284_v3  }
  0x5b   : > { %468 = vmatpush.bf16.msra.mxu0 %v687_v0 }
  0x5c   : > { %482 = vmatpush.bf16.msra.mxu1 %v691_v1  ;;  %496 = vmatpush.bf16.msra.mxu2 %v695_v2 }
  0x5d   : > { %510 = vmatpush.bf16.msra.mxu3 %v699_v4  ;;  %562 = vperm.xlu2 %881, %v284_v3  }
  0x5e   : > { %469 = vmatmul.bf16.vlgmr.msra.gmra.mxu0 %v818_v5 }
  0x5f   : > { %483 = vmatmul.bf16.vlgmr.msra.gmra.mxu1 %v818_v5  ;;  %497 = vmatmul.bf16.vlgmr.msra.gmra.mxu2 %v818_v5 }
  0x60   : > { %511 = vmatmul.bf16.vlgmr.msra.gmra.mxu3 %v818_v5 }
  0x62   : > { %882 = vset.pattern.permute.xlu0 %v909_v63 }
  0xaf   : > { %v559_v17 = vpop.permute.xlu2 %558 }
  0xb7   : > { %v563_v47 = vpop.permute.xlu2 %562 }
  0xc4   : > { %v288_v6 = vpop.permute.xlu0 %287  ;;  %v543_v13 = vpop.permute.xlu1 %542 }
  0xcc   : > { %v293_v19 = vpop.permute.xlu0 %292  ;;  %v547_v39 = vpop.permute.xlu1 %546 }
  0xdb   : > { %v470_v7 = vpop.f32.mrf.mxu0 }
  0xdc   : > { %v471_v8 = vadd.f32 %v470_v7, %v288_v6  ;;  %v484_v9 = vpop.f32.mrf.mxu1 }
  0xdd   : > { %v485_v10 = vadd.f32 %v484_v9, %v288_v6 }
  0xde   : > { %vm517_vm0 = vcmp.ge.f32.partialorder %v471_v8, 0.0  ;;  %v525_v11 = vmul.f32 0.02, %v471_v8 }
  0xdf   : > { %vm518_vm1 = vcmp.ge.f32.partialorder %v485_v10, 0.0  ;;  %v526_v12 = vmul.f32 0.02, %v485_v10 }
  0xe0   : > { %v533_v14 = vsel %vm517_vm0, %v471_v8, %v525_v11 }
  0xe1   : > { %v534_v15 = vsel %vm518_vm1, %v485_v10, %v526_v12  ;;  %v549_v16 = vmul.f32 %v543_v13, %v533_v14 }
  0xe2   : > { %v550_v18 = vmul.f32 %v543_v13, %v534_v15  ;;  %v498_v20 = vpop.f32.mrf.mxu2 }
  0xe3   : > { %v565_v21 = vadd.f32 %v559_v17, %v549_v16  ;;  %v499_v22 = vadd.f32 %v498_v20, %v288_v6  ;;  %v512_v23 = vpop.f32.mrf.mxu3  ;;  %v472_v24 = vpop.f32.mrf.mxu0 }
  0xe4   : > { %v566_v25 = vadd.f32 %v559_v17, %v550_v18  ;;  %v513_v26 = vadd.f32 %v512_v23, %v288_v6  ;;  %v473_v27 = vadd.f32 %v472_v24, %v293_v19  ;;  %v486_v28 = vpop.f32.mrf.mxu1 }
  0xe5   : > { %vm519_vm2 = vcmp.ge.f32.partialorder %v499_v22, 0.0  ;;  %v527_v29 = vmul.f32 0.02, %v499_v22  ;;  %v487_v30 = vadd.f32 %v486_v28, %v293_v19 }
  0xe6   : > { %v573_v31 = vpack.c.bf16 %v566_v25, %v565_v21  ;;  %vm520_vm3 = vcmp.ge.f32.partialorder %v513_v26, 0.0  ;;  %v528_v32 = vmul.f32 0.02, %v513_v26  ;;  %vm521_vm4 = vcmp.ge.f32.partialorder %v473_v27, 0.0 }
  0xe7   : > { %v535_v33 = vsel %vm519_vm2, %v499_v22, %v527_v29  ;;  %v529_v34 = vmul.f32 0.02, %v473_v27  ;;  %vm522_vm5 = vcmp.ge.f32.partialorder %v487_v30, 0.0  ;;  %v530_v35 = vmul.f32 0.02, %v487_v30 }
  0xe8   : > { %577 = vst [vmem:[%s1120_s11] sm:$0xff] %v573_v31  ;;  %v551_v36 = vmul.f32 %v543_v13, %v535_v33  ;;  %v536_v37 = vsel %vm520_vm3, %v513_v26, %v528_v32 }
  0xe9   : > { %v552_v38 = vmul.f32 %v543_v13, %v536_v37  ;;  %v537_v40 = vsel %vm521_vm4, %v473_v27, %v529_v34  ;;  %v538_v41 = vsel %vm522_vm5, %v487_v30, %v530_v35 }
  0xea   : > { %v567_v42 = vadd.f32 %v559_v17, %v551_v36  ;;  %v553_v43 = vmul.f32 %v547_v39, %v537_v40  ;;  %v554_v44 = vmul.f32 %v547_v39, %v538_v41  ;;  %v500_v45 = vpop.f32.mrf.mxu2 }
  0xeb   : > { %v568_v46 = vadd.f32 %v559_v17, %v552_v38  ;;  %v501_v48 = vadd.f32 %v500_v45, %v293_v19  ;;  %v514_v49 = vpop.f32.mrf.mxu3 }
  0xec   : > { %v569_v50 = vadd.f32 %v563_v47, %v553_v43  ;;  %v570_v51 = vadd.f32 %v563_v47, %v554_v44  ;;  %v515_v52 = vadd.f32 %v514_v49, %v293_v19 }
  0xed   : > { %v574_v53 = vpack.c.bf16 %v568_v46, %v567_v42  ;;  %vm523_vm6 = vcmp.ge.f32.partialorder %v501_v48, 0.0  ;;  %v531_v54 = vmul.f32 0.02, %v501_v48 }
  0xee   : > { %v575_v55 = vpack.c.bf16 %v570_v51, %v569_v50  ;;  %vm524_vm7 = vcmp.ge.f32.partialorder %v515_v52, 0.0  ;;  %v532_v56 = vmul.f32 0.02, %v515_v52 }
  0xef   : > { %578 = vst [vmem:[%s1120_s11 + $0x8] sm:$0xff] %v574_v53  ;;  %v539_v57 = vsel %vm523_vm6, %v501_v48, %v531_v54  ;;  %v603_v0 = vld [vmem:[%s1120_s11] sm:$0xff] (%p960_p5) }
  0xf0   : > { %579 = vst [vmem:[%s1120_s11 + $0x10] sm:$0xff] %v575_v55  ;;  %v555_v58 = vmul.f32 %v547_v39, %v539_v57  ;;  %v540_v59 = vsel %vm524_vm7, %v515_v52, %v532_v56 }
  0xf1   : > { %v556_v60 = vmul.f32 %v547_v39, %v540_v59  ;;  %604 = vst [vmem:[%s590_s21] sm:$0xff] (%p960_p5), %v603_v0 }
  0xf2   : > { %v571_v61 = vadd.f32 %v563_v47, %v555_v58 }
  0xf3   : > { %v572_v62 = vadd.f32 %v563_v47, %v556_v60  ;;  %587 = sbr.rel (!%p960_p5) target bundleno = 256 (0x100), region = 59 }
  0xf5   : > { %v576_v63 = vpack.c.bf16 %v572_v62, %v571_v61 }
  0xf6   : > { %v605_v1 = vld [vmem:[%s1120_s11 + $0x8] sm:$0xff] (%p960_p5) }
  0xf7   : > { %580 = vst [vmem:[%s1120_s11 + $0x18] sm:$0xff] %v576_v63  ;;  %v607_v2 = vld [vmem:[%s1120_s11 + $0x10] sm:$0xff] (%p960_p5) }
  0xf8   : > { %606 = vst [vmem:[%s590_s21 + $0x8] sm:$0xff] %v605_v1 }
  0xf9   : > { %608 = vst [vmem:[%s590_s21 + $0x100] sm:$0xff] %v607_v2 }
  0xfe   : > { %v609_v3 = vld [vmem:[%s1120_s11 + $0x18] sm:$0xff] }
  0xff   : > { %610 = vst [vmem:[%s590_s21 + $0x108] sm:$0xff] %v609_v3 }
 0x100 PF: > { %p10_p10 = scmp.ge.s32.totalorder %s947_s16, 18   ;;  %s1152_s12 = smov %s901_s13 }
 0x101   : > { %s1153_s13 = smov %s958_s19  ;;  %s1154_s14 = smov %s947_s16 }
 0x102   :  { %12 = sbr.rel (!%p10_p10) target bundleno = 2 (0x2), region = 113 }

// kernel: nowcasting_forward.47
= control target key start
LH: loop header
LB: loop body
LE: loop exit
PB: predicated region body
PF: predicated region fallthrough
CT: control target
= control target key end

     0   :  { %s1106_s12 = smov 0   ;;  %s1108_s13 = smov 0   ;;  %s1445_s0 = inlined_call_operand.vmem [shape: bf16[16,128], index: 0, kind: input, shape index: {}]   ;;  %s1446_s1 = inlined_call_operand.vmem [shape: bf16[128,8192], index: 1, kind: input, shape index: {}]   ;;  %s1447_s2 = inlined_call_operand.vmem [shape: f32[16,3], index: 2, kind: input, shape index: {}]   ;;  %s1448_s3 = inlined_call_operand.vmem [shape: f32[16,8192], index: 3, kind: output, shape index: {}]  }
   0x1   :  { %s1110_s14 = smov 0  }
   0x2 LB: > { %s806_s15 = sadd.s32 4294967295, %s1081_s14   ;;  %s1123_s16 = sadd.s32 1, %s1081_s14   ;;  %s1081_s14 = sphi %s1110_s14, %s1466_s14   ;;  %s1077_s13 = sphi %s1108_s13, %s1465_s13   ;;  %s1073_s12 = sphi %s1106_s12, %s1464_s12  }
   0x3   : > { %s38_s17 = ssub.s32 %s1081_s14, %s1123_s16  ;;  %s41_s18 = sadd.s32 1, %s1077_s13 }
   0x4   : > { %p39_p0 = scmp.eq.s32.totalorder %s38_s17, 0  ;;  %p48_p1 = scmp.ne.s32.totalorder %s1077_s13, %s1073_s12 }
   0x5   : > { %p49_p2 = scmp.eq.s32.totalorder %s1081_s14, 0  ;;  %p99_p3 = scmp.eq.s32.totalorder %s806_s15, 15 }
   0x6   : > { %s1134_s19 = scalar_select %p39_p0, %s1077_s13, %s41_s18  }
   0x7   : > { %p50_p4 = por %p49_p2, %p48_p1  ;;  %p1136_p5 = por %p99_p3, %p48_p1 }
   0x8   : > { %p809_p6 = scmp.ge.s32.totalorder %s1081_s14, 16 }
   0xa   : > { %127 = sbr.rel (%p809_p6) target bundleno = 51 (0x33), region = 24 }
   0xf   : > { %130 = sbr.rel (!%p50_p4) target bundleno = 51 (0x33), region = 28  ;;  %s132_s21 = sand.u32 (%p50_p4), 1, %s1077_s13  }
  0x10   : > { %s961_s22 = sshll.u32 (%p50_p4), %s1081_s14, 4  ;;  %s810_s23 = sshll.u32 (%p50_p4), %s132_s21, 8 }
  0x11   : > { %s1146_s26 = scalar_lea.vmem (%p50_p4), %s1446_s1, %s961_s22  ;;  %s1151_s27 = scalar_lea.vmem (%p50_p4), [#allocation2], %s810_s23 }
  0x12   : > { %v150_v0 = vld [vmem:[%s1146_s26] sm:$0xff] (%p50_p4)  ;;  %v152_v1 = vld [vmem:[%s1146_s26 + $0x8] sm:$0xff] (%p50_p4) }
  0x13   : > { %v154_v2 = vld [vmem:[%s1146_s26 + $0x100] sm:$0xff] (%p50_p4)  ;;  %151 = vst [vmem:[%s1151_s27] sm:$0xff] (%p50_p4), %v150_v0  ;;  %v156_v3 = vld [vmem:[%s1146_s26 + $0x108] sm:$0xff] (%p50_p4) }
  0x14   : > { %153 = vst [vmem:[%s1151_s27 + $0x8] sm:$0xff] %v152_v1  ;;  %v158_v4 = vld [vmem:[%s1146_s26 + $0x200] sm:$0xff]  ;;  %v160_v5 = vld [vmem:[%s1146_s26 + $0x208] sm:$0xff] }
  0x15   : > { %155 = vst [vmem:[%s1151_s27 + $0x10] sm:$0xff] %v154_v2  ;;  %v162_v6 = vld [vmem:[%s1146_s26 + $0x300] sm:$0xff]  ;;  %v164_v7 = vld [vmem:[%s1146_s26 + $0x308] sm:$0xff] }
  0x16   : > { %157 = vst [vmem:[%s1151_s27 + $0x18] sm:$0xff] %v156_v3  ;;  %v166_v8 = vld [vmem:[%s1146_s26 + $0x400] sm:$0xff]  ;;  %v168_v9 = vld [vmem:[%s1146_s26 + $0x408] sm:$0xff] }
  0x17   : > { %159 = vst [vmem:[%s1151_s27 + $0x20] sm:$0xff] %v158_v4  ;;  %v170_v10 = vld [vmem:[%s1146_s26 + $0x500] sm:$0xff]  ;;  %v172_v11 = vld [vmem:[%s1146_s26 + $0x508] sm:$0xff] }
  0x18   : > { %161 = vst [vmem:[%s1151_s27 + $0x28] sm:$0xff] %v160_v5  ;;  %v174_v12 = vld [vmem:[%s1146_s26 + $0x600] sm:$0xff]  ;;  %v176_v13 = vld [vmem:[%s1146_s26 + $0x608] sm:$0xff] }
  0x19   : > { %163 = vst [vmem:[%s1151_s27 + $0x30] sm:$0xff] %v162_v6  ;;  %v178_v14 = vld [vmem:[%s1146_s26 + $0x700] sm:$0xff]  ;;  %v180_v15 = vld [vmem:[%s1146_s26 + $0x708] sm:$0xff] }
  0x1a   : > { %165 = vst [vmem:[%s1151_s27 + $0x38] sm:$0xff] %v164_v7  ;;  %v182_v16 = vld [vmem:[%s1146_s26 + $0x800] sm:$0xff]  ;;  %v184_v17 = vld [vmem:[%s1146_s26 + $0x808] sm:$0xff] }
  0x1b   : > { %167 = vst [vmem:[%s1151_s27 + $0x40] sm:$0xff] %v166_v8  ;;  %v186_v18 = vld [vmem:[%s1146_s26 + $0x900] sm:$0xff]  ;;  %v188_v19 = vld [vmem:[%s1146_s26 + $0x908] sm:$0xff] }
  0x1c   : > { %169 = vst [vmem:[%s1151_s27 + $0x48] sm:$0xff] %v168_v9  ;;  %v190_v20 = vld [vmem:[%s1146_s26 + $0xa00] sm:$0xff]  ;;  %v192_v21 = vld [vmem:[%s1146_s26 + $0xa08] sm:$0xff] }
  0x1d   : > { %171 = vst [vmem:[%s1151_s27 + $0x50] sm:$0xff] %v170_v10  ;;  %v194_v22 = vld [vmem:[%s1146_s26 + $0xb00] sm:$0xff]  ;;  %v196_v23 = vld [vmem:[%s1146_s26 + $0xb08] sm:$0xff] }
  0x1e   : > { %173 = vst [vmem:[%s1151_s27 + $0x58] sm:$0xff] %v172_v11  ;;  %v198_v24 = vld [vmem:[%s1146_s26 + $0xc00] sm:$0xff]  ;;  %v200_v25 = vld [vmem:[%s1146_s26 + $0xc08] sm:$0xff] }
  0x1f   : > { %175 = vst [vmem:[%s1151_s27 + $0x60] sm:$0xff] %v174_v12  ;;  %v202_v26 = vld [vmem:[%s1146_s26 + $0xd00] sm:$0xff]  ;;  %v204_v27 = vld [vmem:[%s1146_s26 + $0xd08] sm:$0xff] }
  0x20   : > { %177 = vst [vmem:[%s1151_s27 + $0x68] sm:$0xff] %v176_v13  ;;  %v206_v28 = vld [vmem:[%s1146_s26 + $0xe00] sm:$0xff]  ;;  %v208_v29 = vld [vmem:[%s1146_s26 + $0xe08] sm:$0xff] }
  0x21   : > { %179 = vst [vmem:[%s1151_s27 + $0x70] sm:$0xff] %v178_v14  ;;  %v210_v30 = vld [vmem:[%s1146_s26 + $0xf00] sm:$0xff]  ;;  %v212_v31 = vld [vmem:[%s1146_s26 + $0xf08] sm:$0xff] }
  0x22   : > { %181 = vst [vmem:[%s1151_s27 + $0x78] sm:$0xff] %v180_v15 }
  0x23   : > { %183 = vst [vmem:[%s1151_s27 + $0x80] sm:$0xff] %v182_v16 }
  0x24   : > { %185 = vst [vmem:[%s1151_s27 + $0x88] sm:$0xff] %v184_v17 }
  0x25   : > { %187 = vst [vmem:[%s1151_s27 + $0x90] sm:$0xff] %v186_v18 }
  0x26   : > { %189 = vst [vmem:[%s1151_s27 + $0x98] sm:$0xff] %v188_v19 }
  0x27   : > { %191 = vst [vmem:[%s1151_s27 + $0xa0] sm:$0xff] %v190_v20 }
  0x28   : > { %193 = vst [vmem:[%s1151_s27 + $0xa8] sm:$0xff] %v192_v21 }
  0x29   : > { %195 = vst [vmem:[%s1151_s27 + $0xb0] sm:$0xff] %v194_v22 }
  0x2a   : > { %197 = vst [vmem:[%s1151_s27 + $0xb8] sm:$0xff] %v196_v23 }
  0x2b   : > { %199 = vst [vmem:[%s1151_s27 + $0xc0] sm:$0xff] %v198_v24 }
  0x2c   : > { %201 = vst [vmem:[%s1151_s27 + $0xc8] sm:$0xff] %v200_v25 }
  0x2d   : > { %203 = vst [vmem:[%s1151_s27 + $0xd0] sm:$0xff] %v202_v26 }
  0x2e   : > { %205 = vst [vmem:[%s1151_s27 + $0xd8] sm:$0xff] %v204_v27 }
  0x2f   : > { %207 = vst [vmem:[%s1151_s27 + $0xe0] sm:$0xff] %v206_v28 }
  0x30   : > { %209 = vst [vmem:[%s1151_s27 + $0xe8] sm:$0xff] %v208_v29 }
  0x31   : > { %211 = vst [vmem:[%s1151_s27 + $0xf0] sm:$0xff] %v210_v30 }
  0x32   : > { %213 = vst [vmem:[%s1151_s27 + $0xf8] sm:$0xff] %v212_v31 }
  0x33 PF: > { %p813_p7 = scmp.ge.s32.totalorder %s1081_s14, 1  ;;  %p218_p8 = scmp.lt.s32.totalorder %s1081_s14, 17 }
  0x35   : > { %p219_p9 = pnand %p813_p7, %p218_p8 }
  0x36   : > { %s225_s28 = sand.u32 (!%p219_p9), 1, %s1073_s12  }
  0x37   : > { %222 = sbr.rel (%p219_p9) target bundleno = 284 (0x11c), region = 51  ;;  %s814_s29 = sshll.u32 (!%p219_p9), %s225_s28, 8 }
  0x38   : > { %s1219_s30 = scalar_lea.vmem (!%p219_p9), [#allocation2], %s814_s29  ;;  %s815_s10 = sshll.u32 (!%p219_p9), %s225_s28, 6 }
  0x39   : > { %s1380_s11 = scalar_lea.vmem (!%p219_p9), [#allocation3], %s815_s10 }
  0x3c   : > { %v934_v32 = vld [vmem:[%s1219_s30 + $0xe0] sm:$0xf]  ;;  %v993_v33 = vld [vmem:[%s1219_s30 + $0xec] sm:$0xf0]  ;;  %v991_v34 = vld [vmem:[%s1219_s30 + $0xe4] sm:$0xf] }
  0x3d   : > { %v935_v35 = vor.u32 %v993_v33, %v934_v32  ;;  %v936_v36 = vld [vmem:[%s1219_s30 + $0xf0] sm:$0xf0]  ;;  %v942_v37 = vld [vmem:[%s1219_s30 + $0xe8] sm:$0xf]  ;;  %v994_v38 = vld [vmem:[%s1219_s30 + $0xf4] sm:$0xf0] }
  0x3e   : > { %v939_v39 = vor.u32 %v991_v34, %v936_v36  ;;  %v943_v40 = vor.u32 %v994_v38, %v942_v37  ;;  %v992_v41 = vld [vmem:[%s1219_s30 + $0xec] sm:$0xf]  ;;  %v944_v42 = vld [vmem:[%s1219_s30 + $0xf8] sm:$0xf0]  ;;  %v918_v43 = vld [vmem:[%s1219_s30 + $0xc0] sm:$0xf] }
  0x3f   : > { %461 = vmatpush.bf16.msra.mxu0 %v935_v35  ;;  %v947_v44 = vor.u32 %v992_v41, %v944_v42  ;;  %v989_v45 = vld [vmem:[%s1219_s30 + $0xcc] sm:$0xf0]  ;;  %v987_v46 = vld [vmem:[%s1219_s30 + $0xc4] sm:$0xf]  ;;  %v920_v47 = vld [vmem:[%s1219_s30 + $0xd0] sm:$0xf0] }
  0x40   : > { %475 = vmatpush.bf16.msra.mxu1 %v939_v39  ;;  %489 = vmatpush.bf16.msra.mxu2 %v943_v40  ;;  %v919_v48 = vor.u32 %v989_v45, %v918_v43  ;;  %v923_v49 = vor.u32 %v987_v46, %v920_v47  ;;  %v926_v50 = vld [vmem:[%s1219_s30 + $0xc8] sm:$0xf]  ;;  %v990_v51 = vld [vmem:[%s1219_s30 + $0xd4] sm:$0xf0]  ;;  %v988_v52 = vld [vmem:[%s1219_s30 + $0xcc] sm:$0xf] }
  0x41   : > { %503 = vmatpush.bf16.msra.mxu3 %v947_v44  ;;  %v927_v53 = vor.u32 %v990_v51, %v926_v50  ;;  %v928_v54 = vld [vmem:[%s1219_s30 + $0xd8] sm:$0xf0]  ;;  %v902_v55 = vld [vmem:[%s1219_s30 + $0xa0] sm:$0xf]  ;;  %v985_v56 = vld [vmem:[%s1219_s30 + $0xac] sm:$0xf0] }
  0x42   : > { %v931_v57 = vor.u32 %v988_v52, %v928_v54  ;;  %v983_v58 = vld [vmem:[%s1219_s30 + $0xa4] sm:$0xf]  ;;  %v904_v59 = vld [vmem:[%s1219_s30 + $0xb0] sm:$0xf0]  ;;  %v910_v60 = vld [vmem:[%s1219_s30 + $0xa8] sm:$0xf]  ;;  %v903_v61 = vor.u32 %v985_v56, %v902_v55 }
  0x43   : > { %462 = vmatpush.bf16.msra.mxu0 %v919_v48  ;;  %v986_v62 = vld [vmem:[%s1219_s30 + $0xb4] sm:$0xf0]  ;;  %v984_v63 = vld [vmem:[%s1219_s30 + $0xac] sm:$0xf]  ;;  %v912_v0 = vld [vmem:[%s1219_s30 + $0xb8] sm:$0xf0]  ;;  %v907_v1 = vor.u32 %v983_v58, %v904_v59 }
  0x44   : > { %476 = vmatpush.bf16.msra.mxu1 %v923_v49  ;;  %490 = vmatpush.bf16.msra.mxu2 %v927_v53  ;;  %v911_v2 = vor.u32 %v986_v62, %v910_v60  ;;  %v886_v3 = vld [vmem:[%s1219_s30 + $0x80] sm:$0xf]  ;;  %v981_v4 = vld [vmem:[%s1219_s30 + $0x8c] sm:$0xf0]  ;;  %v979_v5 = vld [vmem:[%s1219_s30 + $0x84] sm:$0xf]  ;;  %v915_v6 = vor.u32 %v984_v63, %v912_v0 }
  0x45   : > { %504 = vmatpush.bf16.msra.mxu3 %v931_v57  ;;  %v888_v7 = vld [vmem:[%s1219_s30 + $0x90] sm:$0xf0]  ;;  %v894_v8 = vld [vmem:[%s1219_s30 + $0x88] sm:$0xf]  ;;  %v982_v9 = vld [vmem:[%s1219_s30 + $0x94] sm:$0xf0]  ;;  %v887_v12 = vor.u32 %v981_v4, %v886_v3 }
  0x46   : > { %v980_v10 = vld [vmem:[%s1219_s30 + $0x8c] sm:$0xf]  ;;  %v896_v11 = vld [vmem:[%s1219_s30 + $0x98] sm:$0xf0]  ;;  %v891_v13 = vor.u32 %v979_v5, %v888_v7  ;;  %v895_v14 = vor.u32 %v982_v9, %v894_v8  ;;  %v870_v15 = vld [vmem:[%s1219_s30 + $0x60] sm:$0xf] }
  0x47   : > { %463 = vmatpush.bf16.msra.mxu0 %v903_v61  ;;  %v977_v16 = vld [vmem:[%s1219_s30 + $0x6c] sm:$0xf0]  ;;  %v975_v17 = vld [vmem:[%s1219_s30 + $0x64] sm:$0xf]  ;;  %v899_v18 = vor.u32 %v980_v10, %v896_v11  ;;  %v872_v19 = vld [vmem:[%s1219_s30 + $0x70] sm:$0xf0] }
  0x48   : > { %477 = vmatpush.bf16.msra.mxu1 %v907_v1  ;;  %491 = vmatpush.bf16.msra.mxu2 %v911_v2  ;;  %v878_v20 = vld [vmem:[%s1219_s30 + $0x68] sm:$0xf]  ;;  %v978_v21 = vld [vmem:[%s1219_s30 + $0x74] sm:$0xf0]  ;;  %v976_v22 = vld [vmem:[%s1219_s30 + $0x6c] sm:$0xf]  ;;  %v871_v24 = vor.u32 %v977_v16, %v870_v15  ;;  %v875_v25 = vor.u32 %v975_v17, %v872_v19 }
  0x49   : > { %505 = vmatpush.bf16.msra.mxu3 %v915_v6  ;;  %v880_v23 = vld [vmem:[%s1219_s30 + $0x78] sm:$0xf0]  ;;  %v879_v26 = vor.u32 %v978_v21, %v878_v20  ;;  %v854_v27 = vld [vmem:[%s1219_s30 + $0x40] sm:$0xf]  ;;  %v973_v28 = vld [vmem:[%s1219_s30 + $0x4c] sm:$0xf0] }
  0x4a   : > { %v971_v29 = vld [vmem:[%s1219_s30 + $0x44] sm:$0xf]  ;;  %v883_v30 = vor.u32 %v976_v22, %v880_v23  ;;  %v856_v31 = vld [vmem:[%s1219_s30 + $0x50] sm:$0xf0]  ;;  %v862_v32 = vld [vmem:[%s1219_s30 + $0x48] sm:$0xf]  ;;  %v855_v36 = vor.u32 %v973_v28, %v854_v27 }
  0x4b   : > { %464 = vmatpush.bf16.msra.mxu0 %v887_v12  ;;  %v974_v33 = vld [vmem:[%s1219_s30 + $0x54] sm:$0xf0]  ;;  %v972_v34 = vld [vmem:[%s1219_s30 + $0x4c] sm:$0xf]  ;;  %v864_v35 = vld [vmem:[%s1219_s30 + $0x58] sm:$0xf0]  ;;  %v859_v39 = vor.u32 %v971_v29, %v856_v31 }
  0x4c   : > { %478 = vmatpush.bf16.msra.mxu1 %v891_v13  ;;  %492 = vmatpush.bf16.msra.mxu2 %v895_v14  ;;  %v838_v37 = vld [vmem:[%s1219_s30 + $0x20] sm:$0xf]  ;;  %v969_v38 = vld [vmem:[%s1219_s30 + $0x2c] sm:$0xf0]  ;;  %v863_v40 = vor.u32 %v974_v33, %v862_v32  ;;  %v967_v41 = vld [vmem:[%s1219_s30 + $0x24] sm:$0xf]  ;;  %v867_v44 = vor.u32 %v972_v34, %v864_v35 }
  0x4d   : > { %506 = vmatpush.bf16.msra.mxu3 %v899_v18  ;;  %v840_v42 = vld [vmem:[%s1219_s30 + $0x30] sm:$0xf0]  ;;  %v846_v43 = vld [vmem:[%s1219_s30 + $0x28] sm:$0xf]  ;;  %v970_v45 = vld [vmem:[%s1219_s30 + $0x34] sm:$0xf0]  ;;  %v839_v51 = vor.u32 %v969_v38, %v838_v37 }
  0x4e   : > { %v283_v46 = vld [vmem:[%s1447_s2] sm:$0xff]  ;;  %v968_v47 = vld [vmem:[%s1219_s30 + $0x2c] sm:$0xf]  ;;  %v848_v48 = vld [vmem:[%s1219_s30 + $0x38] sm:$0xf0]  ;;  %v1083_v49 = vmov 0   ;;  %v843_v52 = vor.u32 %v967_v41, %v840_v42  ;;  %v847_v53 = vor.u32 %v970_v45, %v846_v43 }
  0x4f   : > { %465 = vmatpush.bf16.msra.mxu0 %v871_v24  ;;  %1023 = vset.pattern.permute.xlu0 %v1083_v49  ;;  %v1084_v50 = vmov 1   ;;  %v822_v54 = vld [vmem:[%s1219_s30] sm:$0xf]  ;;  %v965_v55 = vld [vmem:[%s1219_s30 + $0xc] sm:$0xf0]  ;;  %v851_v57 = vor.u32 %v968_v47, %v848_v48  ;;  %v1085_v63 = vmov 2  }
  0x50   : > { %479 = vmatpush.bf16.msra.mxu1 %v875_v25  ;;  %493 = vmatpush.bf16.msra.mxu2 %v879_v26  ;;  %v963_v56 = vld [vmem:[%s1219_s30 + $0x4] sm:$0xf]  ;;  %v824_v58 = vld [vmem:[%s1219_s30 + $0x10] sm:$0xf0]  ;;  %v830_v59 = vld [vmem:[%s1219_s30 + $0x8] sm:$0xf]  ;;  %v823_v0 = vor.u32 %v965_v55, %v822_v54 }
  0x51   : > { %507 = vmatpush.bf16.msra.mxu3 %v883_v30  ;;  %1024 = vset.pattern.permute.xlu1 %v1084_v50  ;;  %v966_v60 = vld [vmem:[%s1219_s30 + $0x14] sm:$0xf0]  ;;  %v964_v61 = vld [vmem:[%s1219_s30 + $0xc] sm:$0xf]  ;;  %v832_v62 = vld [vmem:[%s1219_s30 + $0x18] sm:$0xf0]  ;;  %v827_v1 = vor.u32 %v963_v56, %v824_v58 }
  0x52   : > { %287 = vperm.xlu0 %1023, %v283_v46   ;;  %670 = vperm.xlu1 %1024, %v283_v46   ;;  %v831_v2 = vor.u32 %v966_v60, %v830_v59  ;;  %v284_v3 = vld [vmem:[%s1447_s2 + $0x8] sm:$0xff]  ;;  %v835_v4 = vor.u32 %v964_v61, %v832_v62  ;;  %v962_v5 = vld [vmem:[%s1445_s0] sm:$0xff]  ;;  %s995_s12 = sshll.u32 (%p1136_p5), %s806_s15, 5 }
  0x53   : > { %466 = vmatpush.bf16.msra.mxu0 %v855_v36  ;;  %1025 = vset.pattern.permute.xlu2 %v1085_v63  ;;  %s718_s21 = scalar_lea.vmem (%p1136_p5), %s1448_s3, %s995_s12 }
  0x54   : > { %480 = vmatpush.bf16.msra.mxu1 %v859_v39  ;;  %494 = vmatpush.bf16.msra.mxu2 %v863_v40 }
  0x55   : > { %508 = vmatpush.bf16.msra.mxu3 %v867_v44  ;;  %686 = vperm.xlu2 %1025, %v283_v46  }
  0x57   : > { %467 = vmatpush.bf16.msra.mxu0 %v839_v51 }
  0x58   : > { %481 = vmatpush.bf16.msra.mxu1 %v843_v52  ;;  %495 = vmatpush.bf16.msra.mxu2 %v847_v53 }
  0x59   : > { %509 = vmatpush.bf16.msra.mxu3 %v851_v57 }
  0x5a   : > { %292 = vperm.xlu0 %1023, %v284_v3   ;;  %674 = vperm.xlu1 %1024, %v284_v3  }
  0x5b   : > { %468 = vmatpush.bf16.msra.mxu0 %v823_v0 }
  0x5c   : > { %482 = vmatpush.bf16.msra.mxu1 %v827_v1  ;;  %496 = vmatpush.bf16.msra.mxu2 %v831_v2 }
  0x5d   : > { %510 = vmatpush.bf16.msra.mxu3 %v835_v4  ;;  %690 = vperm.xlu2 %1025, %v284_v3  }
  0x5e   : > { %469 = vmatmul.bf16.vlgmr.msra.gmra.mxu0 %v962_v5 }
  0x5f   : > { %483 = vmatmul.bf16.vlgmr.msra.gmra.mxu1 %v962_v5  ;;  %497 = vmatmul.bf16.vlgmr.msra.gmra.mxu2 %v962_v5 }
  0x60   : > { %511 = vmatmul.bf16.vlgmr.msra.gmra.mxu3 %v962_v5 }
  0x62   : > { %1026 = vset.pattern.permute.xlu0 %v1085_v63 }
  0xc4   : > { %v288_v6 = vpop.permute.xlu0 %287 }
  0xcc   : > { %v293_v13 = vpop.permute.xlu0 %292 }
  0xdb   : > { %v470_v7 = vpop.f32.mrf.mxu0 }
  0xdc   : > { %v471_v8 = vadd.f32 %v470_v7, %v288_v6  ;;  %v484_v9 = vpop.f32.mrf.mxu1 }
  0xdd   : > { %v485_v10 = vadd.f32 %v484_v9, %v288_v6 }
  0xde   : > { %v948_v11 = vmul.f32 -1.442695, %v471_v8 }
  0xdf   : > { %v949_v12 = vmul.f32 -1.442695, %v485_v10 }
  0xe0   : > { %1027 = vpow2.f32 %v948_v11 }
  0xe1   : > { %1029 = vpow2.f32 %v949_v12 }
  0xe2   : > { %v498_v14 = vpop.f32.mrf.mxu2 }
  0xe3   : > { %v499_v15 = vadd.f32 %v498_v14, %v288_v6  ;;  %v512_v16 = vpop.f32.mrf.mxu3  ;;  %v472_v17 = vpop.f32.mrf.mxu0 }
  0xe4   : > { %v513_v18 = vadd.f32 %v512_v16, %v288_v6  ;;  %v473_v19 = vadd.f32 %v472_v17, %v293_v13  ;;  %v486_v20 = vpop.f32.mrf.mxu1 }
  0xe5   : > { %v950_v21 = vmul.f32 -1.442695, %v499_v15  ;;  %v487_v22 = vadd.f32 %v486_v20, %v293_v13 }
  0xe6   : > { %v1028_v23 = vpop.eup %1027  ;;  %v951_v24 = vmul.f32 -1.442695, %v513_v18  ;;  %v952_v27 = vmul.f32 -1.442695, %v473_v19  ;;  %v671_v18 = vpop.permute.xlu1 %670 }
  0xe7   : > { %v1030_v25 = vpop.eup %1029  ;;  %v1294_v26 = vadd.f32 1.0, %v1028_v23  ;;  %1031 = vpow2.f32 %v950_v21  ;;  %v953_v29 = vmul.f32 -1.442695, %v487_v22 }
  0xe8   : > { %v1296_v28 = vadd.f32 1.0, %v1030_v25  ;;  %1033 = vpow2.f32 %v951_v24 }
  0xe9   : > { %1035 = vrcp.f32 %v1294_v26  ;;  %v558_v34 = vand.u32 2147483647, %v1294_v26  ;;  %v560_v37 = vand.u32 2147483648, %v1294_v26  ;;  %vm554_vm0 = vweird.f32 %v1294_v26 }
  0xea   : > { %1037 = vrcp.f32 %v1296_v28  ;;  %v500_v30 = vpop.f32.mrf.mxu2  ;;  %v573_v38 = vand.u32 2147483647, %v1296_v28  ;;  %v575_v44 = vand.u32 2147483648, %v1296_v28  ;;  %vm569_vm2 = vweird.f32 %v1296_v28 }
  0xeb   : > { %1039 = vpow2.f32 %v952_v27  ;;  %v501_v31 = vadd.f32 %v500_v30, %v293_v13  ;;  %v514_v32 = vpop.f32.mrf.mxu3  ;;  %vm1311_vm1 = vcmp.eq.f32.partialorder %v558_v34, 8.507059e+37  ;;  %v561_v50 = vor.u32 1.1754944e-38, %v560_v37 }
  0xec   : > { %1041 = vpow2.f32 %v953_v29  ;;  %v515_v33 = vadd.f32 %v514_v32, %v293_v13  ;;  %vm1318_vm3 = vcmp.eq.f32.partialorder %v573_v38, 8.507059e+37  ;;  %v576_v58 = vor.u32 1.1754944e-38, %v575_v44 }
  0xed   : > { %v1032_v35 = vpop.eup %1031  ;;  %v954_v36 = vmul.f32 -1.442695, %v501_v31 }
  0xee   : > { %v1034_v39 = vpop.eup %1033  ;;  %v1303_v40 = vadd.f32 1.0, %v1032_v35  ;;  %v955_v41 = vmul.f32 -1.442695, %v515_v33  ;;  %v675_v7 = vpop.permute.xlu1 %674 }
  0xef   : > { %v1036_v42 = vpop.eup %1035  ;;  %v1305_v43 = vadd.f32 1.0, %v1034_v39  ;;  %1043 = vpow2.f32 %v954_v36 }
  0xf0   : > { %v1038_v45 = vpop.eup %1037  ;;  %v550_v46 = vmul.f32 %v1036_v42, %v1294_v26  ;;  %1045 = vrcp.f32 %v1303_v40  ;;  %v590_v55 = vand.u32 2147483648, %v1303_v40  ;;  %v588_v59 = vand.u32 2147483647, %v1303_v40 }
  0xf1   : > { %v1040_v48 = vpop.eup %1039  ;;  %v565_v49 = vmul.f32 %v1038_v45, %v1296_v28  ;;  %1047 = vrcp.f32 %v1305_v43  ;;  %vm555_vm4 = vweird.f32 %v1036_v42  ;;  %v603_v61 = vand.u32 2147483647, %v1305_v43  ;;  %v687_v28 = vpop.permute.xlu2 %686 }
  0xf2   : > { %v1042_v52 = vpop.eup %1041  ;;  %v551_v53 = vsub.f32 1.0, %v550_v46  ;;  %v1322_v54 = vadd.f32 1.0, %v1040_v48  ;;  %1049 = vpow2.f32 %v955_v41  ;;  %vm570_vm5 = vweird.f32 %v1038_v45  ;;  %vm1340_vm8 = vmor %vm554_vm0, %vm555_vm4 }
  0xf3   : > { %v566_v56 = vsub.f32 1.0, %v565_v49  ;;  %v1325_v57 = vadd.f32 1.0, %v1042_v52  ;;  %vm584_vm6 = vweird.f32 %v1303_v40  ;;  %v605_v0 = vand.u32 2147483648, %v1305_v43  ;;  %vm571_vm11 = vmor %vm569_vm2, %vm570_vm5 }
  0xf4   : > { %1051 = vrcp.f32 %v1322_v54  ;;  %v552_v60 = vmul.f32 %v1036_v42, %v551_v53  ;;  %v591_v4 = vor.u32 1.1754944e-38, %v590_v55  ;;  %vm599_vm7 = vweird.f32 %v1305_v43 }
  0xf5   : > { %v1044_v62 = vpop.eup %1043  ;;  %1053 = vrcp.f32 %v1325_v57  ;;  %v567_v63 = vmul.f32 %v1038_v45, %v566_v56  ;;  %vm1344_vm10 = vcmp.eq.f32.partialorder %v588_v59, 8.507059e+37  ;;  %v618_v10 = vand.u32 2147483647, %v1322_v54 }
  0xf6   : > { %v1046_v1 = vpop.eup %1045  ;;  %v1333_v2 = vadd.f32 1.0, %v1044_v62  ;;  %v553_v3 = vadd.f32 %v1036_v42, %v552_v60  ;;  %vm1356_vm12 = vcmp.eq.f32.partialorder %v603_v61, 8.507059e+37  ;;  %v606_v15 = vor.u32 1.1754944e-38, %v605_v0 }
  0xf7   : > { %v1048_v5 = vpop.eup %1047  ;;  %v580_v6 = vmul.f32 %v1046_v1, %v1303_v40  ;;  %v568_v8 = vadd.f32 %v1038_v45, %v567_v63  ;;  %vm585_vm9 = vweird.f32 %v1046_v1  ;;  %vm614_vm13 = vweird.f32 %v1322_v54 }
  0xf8   : > { %v1050_v11 = vpop.eup %1049  ;;  %v595_v12 = vmul.f32 %v1048_v5, %v1305_v43  ;;  %1055 = vrcp.f32 %v1333_v2  ;;  %v557_v13 = vsel %vm1340_vm8, %v1036_v42, %v553_v3  ;;  %vm600_vm14 = vweird.f32 %v1048_v5  ;;  %vm586_vm0 = vmor %vm584_vm6, %vm585_vm9 }
  0xf9   : > { %v581_v16 = vsub.f32 1.0, %v580_v6  ;;  %v1362_v17 = vadd.f32 1.0, %v1050_v11  ;;  %v562_v19 = vsel %vm1311_vm1, %v561_v50, %v557_v13  ;;  %v572_v20 = vsel %vm571_vm11, %v1038_v45, %v568_v8 }
  0xfa   : > { %v1052_v21 = vpop.eup %1051  ;;  %v596_v22 = vsub.f32 1.0, %v595_v12  ;;  %v577_v23 = vsel %vm1318_vm3, %v576_v58, %v572_v20  ;;  %v677_v24 = vmul.f32 %v671_v18, %v562_v19  ;;  %vm1370_vm15 = vcmp.eq.f32.partialorder %v618_v10, 8.507059e+37  ;;  %vm601_vm3 = vmor %vm599_vm7, %vm600_vm14 }
  0xfb   : > { %v1054_v25 = vpop.eup %1053  ;;  %v582_v26 = vmul.f32 %v1046_v1, %v581_v16  ;;  %v678_v27 = vmul.f32 %v671_v18, %v577_v23  ;;  %v610_v29 = vmul.f32 %v1052_v21, %v1322_v54  ;;  %1057 = vrcp.f32 %v1362_v17 }
  0xfc   : > { %v597_v31 = vmul.f32 %v1048_v5, %v596_v22  ;;  %v693_v32 = vadd.f32 %v687_v28, %v677_v24  ;;  %v620_v33 = vand.u32 2147483648, %v1322_v54  ;;  %v625_v37 = vmul.f32 %v1054_v25, %v1325_v57 }
  0xfd   : > { %v583_v34 = vadd.f32 %v1046_v1, %v582_v26  ;;  %v694_v35 = vadd.f32 %v687_v28, %v678_v27  ;;  %v611_v36 = vsub.f32 1.0, %v610_v29  ;;  %vm615_vm1 = vweird.f32 %v1052_v21 }
  0xfe   : > { %v1056_v38 = vpop.eup %1055  ;;  %v598_v39 = vadd.f32 %v1048_v5, %v597_v31  ;;  %701 = vst [vmem:[%s1380_s11] sm:$0xff] %v693_v32  ;;  %v621_v41 = vor.u32 1.1754944e-38, %v620_v33  ;;  %vm630_vm2 = vweird.f32 %v1054_v25  ;;  %v626_v45 = vsub.f32 1.0, %v625_v37  ;;  %vm616_vm4 = vmor %vm614_vm13, %vm615_vm1 }
  0xff   : > { %v587_v42 = vsel %vm586_vm0, %v1046_v1, %v583_v34  ;;  %702 = vst [vmem:[%s1380_s11 + $0x8] sm:$0xff] %v694_v35  ;;  %v612_v44 = vmul.f32 %v1052_v21, %v611_v36  ;;  %v633_v40 = vand.u32 2147483647, %v1325_v57  ;;  %v635_v48 = vand.u32 2147483648, %v1325_v57 }
 0x100   : > { %v592_v46 = vsel %vm1344_vm10, %v591_v4, %v587_v42  ;;  %v602_v47 = vsel %vm601_vm3, %v1048_v5, %v598_v39  ;;  %v640_v49 = vmul.f32 %v1056_v38, %v1333_v2  ;;  %v627_v43 = vmul.f32 %v1054_v25, %v626_v45 }
 0x101   : > { %v607_v50 = vsel %vm1356_vm12, %v606_v15, %v602_v47  ;;  %v679_v51 = vmul.f32 %v671_v18, %v592_v46  ;;  %v613_v52 = vadd.f32 %v1052_v21, %v612_v44  ;;  %v1058_v53 = vpop.eup %1057  ;;  %vm629_vm5 = vweird.f32 %v1325_v57 }
 0x102   : > { %v680_v55 = vmul.f32 %v671_v18, %v607_v50  ;;  %vm1398_vm6 = vcmp.eq.f32.partialorder %v633_v40, 8.507059e+37  ;;  %v641_v58 = vsub.f32 1.0, %v640_v49  ;;  %v628_v61 = vadd.f32 %v1054_v25, %v627_v43  ;;  %vm631_vm7 = vmor %vm629_vm5, %vm630_vm2  ;;  %v691_v18 = vpop.permute.xlu2 %690 }
 0x103   : > { %v695_v59 = vadd.f32 %v687_v28, %v679_v51  ;;  %v617_v60 = vsel %vm616_vm4, %v1052_v21, %v613_v52  ;;  %v636_v62 = vor.u32 1.1754944e-38, %v635_v48  ;;  %vm645_vm8 = vweird.f32 %v1056_v38 }
 0x104   : > { %v696_v63 = vadd.f32 %v687_v28, %v680_v55  ;;  %v622_v0 = vsel %vm1370_vm15, %v621_v41, %v617_v60  ;;  %v642_v54 = vmul.f32 %v1056_v38, %v641_v58  ;;  %v632_v57 = vsel %vm631_vm7, %v1054_v25, %v628_v61 }
 0x105   : > { %703 = vst [vmem:[%s1380_s11 + $0x10] sm:$0xff] %v695_v59  ;;  %v648_v1 = vand.u32 2147483647, %v1333_v2  ;;  %v650_v3 = vand.u32 2147483648, %v1333_v2  ;;  %v655_v4 = vmul.f32 %v1058_v53, %v1362_v17  ;;  %v637_v5 = vsel %vm1398_vm6, %v636_v62, %v632_v57 }
 0x106   : > { %704 = vst [vmem:[%s1380_s11 + $0x18] sm:$0xff] %v696_v63  ;;  %v643_v6 = vadd.f32 %v1056_v38, %v642_v54  ;;  %vm644_vm9 = vweird.f32 %v1333_v2  ;;  %v665_v11 = vand.u32 2147483648, %v1362_v17  ;;  %v681_v12 = vmul.f32 %v675_v7, %v622_v0  ;;  %v733_v28 = vld [vmem:[%s1380_s11 + $0x8] sm:$0xff] (%p1136_p5) }
 0x107   : > { %vm646_vm10 = vmor %vm644_vm9, %vm645_vm8  ;;  %vm649_vm11 = vcmp.eq.f32.partialorder %v648_v1, 8.507059e+37  ;;  %v651_v8 = vor.u32 1.1754944e-38, %v650_v3  ;;  %v656_v9 = vsub.f32 1.0, %v655_v4  ;;  %v682_v13 = vmul.f32 %v675_v7, %v637_v5  ;;  %734 = vst [vmem:[%s718_s21 + $0x8] sm:$0xff] (%p1136_p5), %v733_v28 }
 0x108   : > { %v647_v10 = vsel %vm646_vm10, %v1056_v38, %v643_v6  ;;  %vm660_vm12 = vweird.f32 %v1058_v53  ;;  %v663_v16 = vand.u32 2147483647, %v1362_v17  ;;  %v697_v19 = vadd.f32 %v691_v18, %v681_v12 }
 0x109   : > { %v652_v14 = vsel %vm649_vm11, %v651_v8, %v647_v10  ;;  %v657_v15 = vmul.f32 %v1058_v53, %v656_v9  ;;  %v698_v20 = vadd.f32 %v691_v18, %v682_v13  ;;  %vm659_vm13 = vweird.f32 %v1362_v17  ;;  %v731_v17 = vld [vmem:[%s1380_s11] sm:$0xff] (%p1136_p5) }
 0x10a   : > { %v683_v2 = vmul.f32 %v675_v7, %v652_v14  ;;  %vm661_vm14 = vmor %vm659_vm13, %vm660_vm12  ;;  %v666_v22 = vor.u32 1.1754944e-38, %v665_v11  ;;  %705 = vst [vmem:[%s1380_s11 + $0x20] sm:$0xff] %v697_v19  ;;  %vm664_vm15 = vcmp.eq.f32.partialorder %v663_v16, 8.507059e+37 }
 0x10b   : > { %v658_v21 = vadd.f32 %v1058_v53, %v657_v15  ;;  %706 = vst [vmem:[%s1380_s11 + $0x28] sm:$0xff] %v698_v20 }
 0x10c   : > { %v699_v23 = vadd.f32 %v691_v18, %v683_v2  ;;  %v735_v29 = vld [vmem:[%s1380_s11 + $0x10] sm:$0xff] (%p1136_p5)  ;;  %732 = vst [vmem:[%s718_s21] sm:$0xff] (%p1136_p5), %v731_v17 }
 0x10d   : > { %v662_v24 = vsel %vm661_vm14, %v1058_v53, %v658_v21  ;;  %v737_v30 = vld [vmem:[%s1380_s11 + $0x18] sm:$0xff] (%p1136_p5)  ;;  %736 = vst [vmem:[%s718_s21 + $0x10] sm:$0xff] (%p1136_p5), %v735_v29 }
 0x10e   : > { %v667_v25 = vsel %vm664_vm15, %v666_v22, %v662_v24  ;;  %707 = vst [vmem:[%s1380_s11 + $0x30] sm:$0xff] %v699_v23 }
 0x10f   : > { %v684_v26 = vmul.f32 %v675_v7, %v667_v25  ;;  %715 = sbr.rel (!%p1136_p5) target bundleno = 284 (0x11c), region = 59  ;;  %738 = vst [vmem:[%s718_s21 + $0x18] sm:$0xff] (%p1136_p5), %v737_v30 }
 0x111   : > { %v700_v27 = vadd.f32 %v691_v18, %v684_v26  ;;  %v739_v31 = vld [vmem:[%s1380_s11 + $0x20] sm:$0xff] (%p1136_p5) }
 0x112   : > { %v741_v32 = vld [vmem:[%s1380_s11 + $0x28] sm:$0xff] (%p1136_p5)  ;;  %740 = vst [vmem:[%s718_s21 + $0x200] sm:$0xff] (%p1136_p5), %v739_v31 }
 0x113   : > { %708 = vst [vmem:[%s1380_s11 + $0x38] sm:$0xff] %v700_v27 }
 0x114   : > { %742 = vst [vmem:[%s718_s21 + $0x208] sm:$0xff] %v741_v32 }
 0x115   : > { %v743_v33 = vld [vmem:[%s1380_s11 + $0x30] sm:$0xff] }
 0x116   : > { %744 = vst [vmem:[%s718_s21 + $0x210] sm:$0xff] %v743_v33 }
 0x11a   : > { %v745_v34 = vld [vmem:[%s1380_s11 + $0x38] sm:$0xff] }
 0x11b   : > { %746 = vst [vmem:[%s718_s21 + $0x218] sm:$0xff] %v745_v34 }
 0x11c PF: > { %p10_p10 = scmp.ge.s32.totalorder %s1123_s16, 18   ;;  %s1464_s12 = smov %s1077_s13 }
 0x11d   : > { %s1465_s13 = smov %s1134_s19  ;;  %s1466_s14 = smov %s1123_s16 }
 0x11e   :  { %12 = sbr.rel (!%p10_p10) target bundleno = 2 (0x2), region = 113 }

</bundles_post_ra>
